<compile_context>
chip_gen: v6e
topology: v6e:2x2x1
jax: 0.10.0
libtpu: 0.0.40
codegen_flags: <defaults>
</compile_context>

<pallas_src>
import functools

import jax
import jax.numpy as jnp
from jax.experimental import pallas as pl
from jax.experimental.pallas import tpu as pltpu


def _round_up(v, m):
    return (v + m - 1) // m * m


def _attn_net_kernel(x_ref, w1_ref, b1_ref, w2_ref, b2_ref, a_ref, *,
                     matmul_dtype, transpose_out, c_sub):
    x = x_ref[...]
    if x.dtype != matmul_dtype:
        x = x.astype(matmul_dtype)
    # hidden = tanh(x @ W1 + b1): f32 MXU accumulation, f32 epilogue (EUP tanh).
    h = jnp.dot(x, w1_ref[...], preferred_element_type=jnp.float32)
    h = jnp.tanh(h + b1_ref[...])
    # logits = hidden @ W2 + b2 (f32 accumulate, f32 bias add).
    a = jnp.dot(h.astype(matmul_dtype), w2_ref[...],
                preferred_element_type=jnp.float32)
    a = a + b2_ref[...]
    if transpose_out:
        # Lane-dense store for small n_classes: put the row axis on lanes so
        # the HBM writeback is (c_sub, tile_n) instead of a 128x zero-padded
        # (tile_n, 128) f32 tile.  The XLU transpose slot is otherwise idle.
        a_ref[...] = jnp.transpose(a)[:c_sub, :].astype(a_ref.dtype)
    else:
        a_ref[...] = a.astype(a_ref.dtype)


def pack_attn_net_params(w1, b1, w2, b2, *, matmul_dtype=jnp.bfloat16):
    """One-time parameter packing (do at model load, not per forward call).

    Zero-pads feature dims to multiples of 128 (numerically exact: tanh(0)=0 and
    zero W2 rows/cols contribute 0) and casts weights to the MXU dtype.
    """
    L, D = w1.shape
    Dw, C = w2.shape
    assert Dw == D, "weight shapes must be (L, D) and (D, n_classes)"
    Lp, Dp, Cp = _round_up(L, 128), _round_up(D, 128), _round_up(C, 128)
    w1_p = jnp.pad(w1, ((0, Lp - L), (0, Dp - D))).astype(matmul_dtype)
    b1_p = jnp.pad(jnp.reshape(b1, (1, D)), ((0, 0), (0, Dp - D))).astype(jnp.float32)
    w2_p = jnp.pad(w2, ((0, Dp - D), (0, Cp - C))).astype(matmul_dtype)
    b2_p = jnp.pad(jnp.reshape(b2, (1, C)), ((0, 0), (0, Cp - C))).astype(jnp.float32)
    return {"w1": w1_p, "b1": b1_p, "w2": w2_p, "b2": b2_p, "dims": (L, D, C)}


def attn_net_forward(x, params, *, tile_n=1024, core_parallel=False):
    """Fused Linear -> Tanh -> Linear.  Returns (A, x) like Attn_Net.forward.

    x:      (N, L) patch features.  Pass bf16 x for best performance (the x
            read dominates HBM traffic); f32 x works and is cast in-kernel.
    params: output of pack_attn_net_params.
    core_parallel: set True on v7x to shard the row grid across both TCs.
    """
    N, L = x.shape
    L0, D, C = params["dims"]
    assert L0 == L, "x feature dim must match packed weights"
    w1_p, b1_p, w2_p, b2_p = params["w1"], params["b1"], params["w2"], params["b2"]
    Lp, Dp = w1_p.shape
    Cp = w2_p.shape[1]
    matmul_dtype = w1_p.dtype

    # Lane-pad x only when L is not 128-aligned (CLAM defaults L=1024/512 never
    # hit this).  Row (N) raggedness is handled by Pallas masking — no HBM copy.
    x_in = x if Lp == L else jnp.pad(x, ((0, 0), (0, Lp - L)))

    # Row tile: multiple of 256 (MXU-friendly; also the lane axis of the
    # transposed output block, so it must stay 128-aligned).  Clamp for small N
    # so we don't build one huge mostly-OOB tile.
    tile_n = _round_up(max(tile_n, 256), 256)
    if N >= 256:
        tile_n = min(tile_n, max(256, (N // 256) * 256))
    else:
        tile_n = 256
    grid = (pl.cdiv(N, tile_n),)

    out_dtype = jnp.float32  # attention logits stay f32 regardless of x dtype
    transpose_out = C <= 8   # CLAM default n_classes=1 takes this path
    c_sub = 8                # sublane-aligned row count of transposed output

    if transpose_out:
        out_shape = jax.ShapeDtypeStruct((c_sub, N), out_dtype)
        out_spec = pl.BlockSpec((c_sub, tile_n), lambda i: (0, i))
        out_tile_bytes = c_sub * tile_n * 4
        out_hbm_bytes = c_sub * N * 4
    else:
        out_shape = jax.ShapeDtypeStruct((N, Cp), out_dtype)
        out_spec = pl.BlockSpec((tile_n, Cp), lambda i: (i, 0))
        out_tile_bytes = tile_n * Cp * 4
        out_hbm_bytes = N * Cp * 4

    isz_x = x_in.dtype.itemsize
    isz_w = w1_p.dtype.itemsize

    # VMEM budget: double-buffered x/out tiles + resident weights + in-kernel
    # temporaries + headroom, capped so it also fits v7x's 64 MiB VMEM.
    vmem_bytes = (
        2 * tile_n * Lp * isz_x                      # x tiles (double-buffered)
        + 2 * out_tile_bytes                         # output tiles
        + 2 * (Lp * Dp + Dp * Cp) * isz_w            # weights (worst case 2 bufs)
        + 2 * (Dp + Cp) * 4                          # biases
        + tile_n * (Lp * isz_w + Dp * (4 + isz_w) + 2 * Cp * 4)  # temporaries
        + (4 << 20)                                  # headroom
    )
    vmem_bytes = int(min(vmem_bytes, 48 << 20))

    cost = pl.CostEstimate(
        flops=2 * N * Lp * Dp + 2 * N * Dp * Cp,
        transcendentals=N * Dp,
        bytes_accessed=(N * Lp * isz_x + (Lp * Dp + Dp * Cp) * isz_w
                        + (Dp + Cp) * 4 + out_hbm_bytes),
    )

    row_sem = pltpu.CORE_PARALLEL if core_parallel else "parallel"

    kernel = functools.partial(_attn_net_kernel, matmul_dtype=matmul_dtype,
                               transpose_out=transpose_out, c_sub=c_sub)
    a_raw = pl.pallas_call(
        kernel,
        out_shape=out_shape,
        grid_spec=pltpu.PrefetchScalarGridSpec(
            num_scalar_prefetch=0,
            grid=grid,
            in_specs=[
                pl.BlockSpec((tile_n, Lp), lambda i: (i, 0)),  # x tile
                pl.BlockSpec((Lp, Dp), lambda i: (0, 0)),      # W1 (resident)
                pl.BlockSpec((1, Dp), lambda i: (0, 0)),       # b1
                pl.BlockSpec((Dp, Cp), lambda i: (0, 0)),      # W2
                pl.BlockSpec((1, Cp), lambda i: (0, 0)),       # b2
            ],
            out_specs=out_spec,
        ),
        compiler_params=pltpu.CompilerParams(
            dimension_semantics=(row_sem,),
            vmem_limit_bytes=vmem_bytes,
        ),
        cost_estimate=cost,
    )(x_in, w1_p, b1_p, w2_p, b2_p)

    if transpose_out:
        a = a_raw[:C, :].T                 # (N, C); tiny (C <= 8) post-pass
    else:
        a = a_raw if Cp == C else a_raw[:, :C]
    # Module returns the raw input x unchanged alongside the attention scores.
    return a, x


if __name__ == "__main__":
    # Attn_Net defaults: L=1024, D=256, n_classes=1.  N=700 patches so the row
    # grid has full tiles plus a ragged last tile (exercises Pallas masking
    # without any wrapper-side row padding).
    N, L, D, C = 700, 1024, 256, 1

    key = jax.random.PRNGKey(0)
    kx, k1, k2, k3, k4 = jax.random.split(key, 5)

    x = jax.random.normal(kx, (N, L), dtype=jnp.float32)
    w1 = jax.random.normal(k1, (L, D), dtype=jnp.float32) * (1.0 / jnp.sqrt(L))
    b1 = jax.random.normal(k2, (1, D), dtype=jnp.float32) * 0.01
    w2 = jax.random.normal(k3, (D, C), dtype=jnp.float32) * (1.0 / jnp.sqrt(D))
    b2 = jax.random.normal(k4, (1, C), dtype=jnp.float32) * 0.01

    # Pure-JAX f32 reference.
    ref = jnp.tanh(x @ w1 + b1) @ w2 + b2

    # Parity config: f32 x / f32 MXU (test mode only), small tiles -> 3 grid steps.
    params_f32 = pack_attn_net_params(w1, b1, w2, b2, matmul_dtype=jnp.float32)
    a32, x_out = attn_net_forward(x, params_f32, tile_n=256)

    # Production config: bf16 weights + bf16 x (halves the dominant HBM read),
    # default (large) tile.
    params_bf16 = pack_attn_net_params(w1, b1, w2, b2)
    x_bf16 = x.astype(jnp.bfloat16)
    abf, _ = attn_net_forward(x_bf16, params_bf16)

    jax.block_until_ready((a32, abf, x_out))

    assert a32.shape == (N, C) and abf.shape == (N, C) and x_out.shape == (N, L)
    assert jnp.allclose(a32, ref, atol=2e-3, rtol=2e-3), "f32 parity mismatch"
    assert jnp.allclose(abf, ref, atol=7e-2, rtol=7e-2), "bf16 path mismatch"
    assert jnp.array_equal(x_out, x)

    print("KERNEL_OK")
</pallas_src>

<mosaic_0001>
module attributes {stable_mosaic.version = 11 : i64} {
  func.func @_attn_net_kernel(%arg0: i32, %arg1: memref<256x1024xf32, #tpu.memory_space<vmem>>, %arg2: memref<1024x256xf32, #tpu.memory_space<vmem>>, %arg3: memref<1x256xf32, #tpu.memory_space<vmem>>, %arg4: memref<256x128xf32, #tpu.memory_space<vmem>>, %arg5: memref<1x128xf32, #tpu.memory_space<vmem>>, %arg6: memref<8x256xf32, #tpu.memory_space<vmem>>) attributes {dimension_semantics = [#tpu.dimension_semantics<parallel>], iteration_bounds = array<i64: 3>, scalar_prefetch = 0 : i64, scratch_operands = 0 : i64, tpu.core_type = #tpu.core_type<tc>, window_params = [{transform_indices = @transform_0, window_bounds = array<i64: 256, 1024>}, {pipeline_mode = #tpu.pipeline_mode<synchronous>, transform_indices = @transform_1, window_bounds = array<i64: 1024, 256>}, {pipeline_mode = #tpu.pipeline_mode<synchronous>, transform_indices = @transform_2, window_bounds = array<i64: 1, 256>}, {pipeline_mode = #tpu.pipeline_mode<synchronous>, transform_indices = @transform_3, window_bounds = array<i64: 256, 128>}, {pipeline_mode = #tpu.pipeline_mode<synchronous>, transform_indices = @transform_4, window_bounds = array<i64: 1, 128>}, {transform_indices = @transform_5, window_bounds = array<i64: 8, 256>}]} {
    %c0 = arith.constant 0 : index
    %c0_0 = arith.constant 0 : index
    %0 = vector.load %arg1[%c0, %c0_0] : memref<256x1024xf32, #tpu.memory_space<vmem>>, vector<256x1024xf32>
    %c0_1 = arith.constant 0 : index
    %c0_2 = arith.constant 0 : index
    %1 = vector.load %arg2[%c0_1, %c0_2] : memref<1024x256xf32, #tpu.memory_space<vmem>>, vector<1024x256xf32>
    %cst = arith.constant dense<0.000000e+00> : vector<256x256xf32>
    %2 = tpu.matmul %0, %1, %cst {dimension_numbers = #tpu.dot_dimension_numbers<[1], [0], [0], [1], [0, 0, 1, 1], [], []>} : vector<256x1024xf32>, vector<1024x256xf32>, vector<256x256xf32> -> vector<256x256xf32>
    %c0_3 = arith.constant 0 : index
    %c0_4 = arith.constant 0 : index
    %3 = vector.load %arg3[%c0_3, %c0_4] : memref<1x256xf32, #tpu.memory_space<vmem>>, vector<1x256xf32>
    %4 = vector.broadcast %3 : vector<1x256xf32> to vector<256x256xf32>
    %5 = arith.addf %2, %4 : vector<256x256xf32>
    %6 = math.tanh %5 : vector<256x256xf32>
    %c0_5 = arith.constant 0 : index
    %c0_6 = arith.constant 0 : index
    %7 = vector.load %arg4[%c0_5, %c0_6] : memref<256x128xf32, #tpu.memory_space<vmem>>, vector<256x128xf32>
    %cst_7 = arith.constant dense<0.000000e+00> : vector<256x128xf32>
    %8 = tpu.matmul %6, %7, %cst_7 {dimension_numbers = #tpu.dot_dimension_numbers<[1], [0], [0], [1], [0, 0, 1, 1], [], []>} : vector<256x256xf32>, vector<256x128xf32>, vector<256x128xf32> -> vector<256x128xf32>
    %c0_8 = arith.constant 0 : index
    %c0_9 = arith.constant 0 : index
    %9 = vector.load %arg5[%c0_8, %c0_9] : memref<1x128xf32, #tpu.memory_space<vmem>>, vector<1x128xf32>
    %10 = vector.broadcast %9 : vector<1x128xf32> to vector<256x128xf32>
    %11 = arith.addf %8, %10 : vector<256x128xf32>
    %12 = tpu.transpose %11, [1, 0] : vector<256x128xf32> -> vector<128x256xf32>
    %13 = vector.extract_strided_slice %12 {offsets = [0, 0], sizes = [8, 256], strides = [1, 1]} : vector<128x256xf32> to vector<8x256xf32>
    %c0_10 = arith.constant 0 : index
    %c0_11 = arith.constant 0 : index
    %14 = vector.load %arg6[%c0_10, %c0_11] : memref<8x256xf32, #tpu.memory_space<vmem>>, vector<8x256xf32>
    tpu.vector_store %arg6[%c0_10, %c0_11], %13 {strides = array<i32>} : memref<8x256xf32, #tpu.memory_space<vmem>>, vector<8x256xf32>,
    return
  }
  func.func @transform_0(%arg0: i32) -> (i32, i32) {
    %c0_i32 = arith.constant 0 : i32
    %c0_i32_0 = arith.constant 0 : i32
    return %arg0, %c0_i32 : i32, i32
  }
  func.func @transform_1(%arg0: i32) -> (i32, i32) {
    %c0_i32 = arith.constant 0 : i32
    %c0_i32_0 = arith.constant 0 : i32
    %c0_i32_1 = arith.constant 0 : i32
    return %c0_i32, %c0_i32_0 : i32, i32
  }
  func.func @transform_2(%arg0: i32) -> (i32, i32) {
    %c0_i32 = arith.constant 0 : i32
    %c0_i32_0 = arith.constant 0 : i32
    %c0_i32_1 = arith.constant 0 : i32
    return %c0_i32, %c0_i32_0 : i32, i32
  }
  func.func @transform_3(%arg0: i32) -> (i32, i32) {
    %c0_i32 = arith.constant 0 : i32
    %c0_i32_0 = arith.constant 0 : i32
    %c0_i32_1 = arith.constant 0 : i32
    return %c0_i32, %c0_i32_0 : i32, i32
  }
  func.func @transform_4(%arg0: i32) -> (i32, i32) {
    %c0_i32 = arith.constant 0 : i32
    %c0_i32_0 = arith.constant 0 : i32
    %c0_i32_1 = arith.constant 0 : i32
    return %c0_i32, %c0_i32_0 : i32, i32
  }
  func.func @transform_5(%arg0: i32) -> (i32, i32) {
    %c0_i32 = arith.constant 0 : i32
    %c0_i32_0 = arith.constant 0 : i32
    return %c0_i32, %arg0 : i32, i32
  }
}

</mosaic_0001>

<bundles_post_ra>
// kernel: tpu_custom_call.1
= control target key start
LH: loop header
LB: loop body
LE: loop exit
PB: predicated region body
PF: predicated region fallthrough
CT: control target
= control target key end

     0   :  { %10 = vsyncpa [#allocation3], 0  ;;  %s4092_s0 = inlined_call_operand.hbm [shape: f32[700,1024], index: 0, kind: input, shape index: {}]   ;;  %s4093_s1 = inlined_call_operand.hbm [shape: f32[1024,256], index: 1, kind: input, shape index: {}]   ;;  %s4094_s2 = inlined_call_operand.hbm [shape: f32[1,256], index: 2, kind: input, shape index: {}]   ;;  %s4095_s3 = inlined_call_operand.hbm [shape: f32[256,128], index: 3, kind: input, shape index: {}]   ;;  %s4096_s4 = inlined_call_operand.hbm [shape: f32[1,128], index: 4, kind: input, shape index: {}]   ;;  %s4097_s5 = inlined_call_operand.hbm [shape: f32[8,700], index: 5, kind: output, shape index: {}]  }
   0x1   :  { %12 = vsyncpa [#allocation3 + $0x1], 0 }
   0x2   :  { %13 = vsyncpa [#allocation6], 0 }
   0x3   :  { %14 = vsyncpa [#allocation9], 0 }
   0x4   :  { %15 = vsyncpa [#allocation4], 0 }
   0x5   :  { %17 = vsyncpa [#allocation4 + $0x1], 0  ;;  %s2941_s18 = smov 0   ;;  %s2943_s19 = smov 0  }
   0x6   :  { %s2945_s20 = smov 0   ;;  %s2947_s21 = smov 0  }
   0x7 LB: > { %s2962_s22 = sadd.s32 4294967295, %s2896_s21   ;;  %s2381_s23 = sadd.s32 4294967294, %s2896_s21   ;;  %s2896_s21 = sphi %s2947_s21, %s4282_s21   ;;  %s2892_s20 = sphi %s2945_s20, %s4281_s20   ;;  %s2888_s19 = sphi %s2943_s19, %s4280_s19   ;;  %s2884_s18 = sphi %s2941_s18, %s4279_s18  }
   0x8   : > { %s2966_s24 = sadd.s32 1, %s2896_s21   ;;  %s30_s25 = sadd.s32 1, %s2892_s20 }
   0x9   : > { %s27_s26 = ssub.s32 %s2896_s21, %s2966_s24  ;;  %p37_p0 = scmp.ne.s32.totalorder %s2892_s20, %s2888_s19 }
   0xa   : > { %p28_p1 = scmp.eq.s32.totalorder %s27_s26, 0  ;;  %p38_p2 = scmp.eq.s32.totalorder %s2896_s21, 0 }
   0xb   : > { %p43_p3 = scmp.ne.s32.totalorder %s2888_s19, %s2884_s18  ;;  %p4098_p4 = scmp.eq.s32.totalorder %s2962_s22, 0 }
   0xc   : > { %s2978_s27 = scalar_select %p28_p1, %s2892_s20, %s30_s25  }
   0xd   : > { %p2980_p5 = por %p38_p2, %p37_p0  ;;  %p2986_p6 = por %p4098_p4, %p43_p3 }
   0xe   : > { %p151_p7 = scmp.eq.s32.totalorder %s2962_s22, 2  ;;  %p157_p8 = scmp.eq.s32.totalorder %s2381_s23, 2 }
   0xf   : > { %s4104_s29 = scalar_select %p2986_p6, 1, 0 }
  0x10   : > { %p2382_p9 = scmp.ge.s32.totalorder %s2896_s21, 1  ;;  %p164_p10 = scmp.lt.s32.totalorder %s2896_s21, 4 }
  0x11   : > { %p2993_p11 = por %p151_p7, %p37_p0  ;;  %p2997_p12 = por %p157_p8, %p43_p3 }
  0x12   : > { %p3001_p13 = pnand %p2382_p9, %p164_p10  ;;  %s2898_s8 = smov [#allocation5]  }
  0x13   : > { %s4105_s30 = scalar_select %p2993_p11, 1, 0 }
  0x14   : > { %s4106_s6 = scalar_select %p2997_p12, 1, 0 }
  0x15   : > { %p2497_p1 = pneg %p3001_p13  ;;  %s176_s9 = sshll.u32 %s2898_s8, 4  ;;  %s177_s9 = int_to_ptr.vmem [resolvable:$true] %s176_s9 }
  0x16   : > { %s2899_s11 = smov [#allocation8]   ;;  %s2705_s13 = scalar_lea.vmem %s177_s9, 32768 }
  0x17   : > { %p3009_p2 = pnand %p2497_p1, %p4098_p4  ;;  %s200_s12 = sshll.u32 %s2899_s11, 4  ;;  %s201_s12 = int_to_ptr.vmem [resolvable:$true] %s200_s12 }
  0x18   : > { %p2706_p3 = scmp.ne.s32.totalorder %s177_s9, %s2705_s13  ;;  %p2713_p9 = scmp.lt.s32.totalorder %s177_s9, %s177_s9 }
  0x19   : > { %p2696_p0 = pneg %p3009_p2  ;;  %p2714_p10 = scmp.lt.s32.totalorder %s2705_s13, %s2705_s13 }
  0x1b   : > { %p2708_p7 = pnand %p2706_p3, %p2696_p0  ;;  %p2715_p12 = por %p2714_p10, %p2713_p9 }
  0x1d   : > { %p2709_p8 = pneg %p2708_p7 }
  0x1f   : > { %p2716_p1 = pnand %p2715_p12, %p2709_p8 }
  0x21   : > { %2719 = shalt.err (!%p2716_p1)
}
  0x22   : > { %s2900_s14 = smov 256   ;;  %s2901_s15 = smov 16  }
  0x23   : > { %2500 = dma.hbm_to_vmem [thread:$0]  (!%p3009_p2), %s4093_s1, 32768, %s177_s9, [#allocation6], %s2900_s14, %s2900_s14, %s2901_s15  }
  0x24   : > { %s2731_s23 = scalar_lea.vmem %s201_s12, 4096  ;;  %p2739_p11 = scmp.lt.s32.totalorder %s201_s12, %s201_s12 }
  0x25   : > { %p2732_p4 = scmp.ne.s32.totalorder %s201_s12, %s2731_s23  ;;  %p2740_p6 = scmp.lt.s32.totalorder %s2731_s23, %s2731_s23 }
  0x27   : > { %p2734_p3 = pnand %p2732_p4, %p2696_p0  ;;  %p2741_p9 = por %p2740_p6, %p2739_p11 }
  0x29   : > { %p2735_p7 = pneg %p2734_p3 }
  0x2b   : > { %p2742_p12 = pnand %p2741_p9, %p2735_p7 }
  0x2d   : > { %2745 = shalt.err (!%p2742_p12)
}
  0x2e   : > { %s2902_s25 = smov 128   ;;  %s2903_s26 = smov 8  }
  0x2f   : > { %2506 = dma.hbm_to_vmem [thread:$0]  (!%p3009_p2), %s4095_s3, 4096, %s201_s12, [#allocation9], %s2902_s25, %s2902_s25, %s2903_s26  }
  0x30   : > { %s2904_s9 = smov [#allocation7]   ;;  %s2905_s14 = smov [#allocation10]  }
  0x31   : > { %s190_s13 = sshll.u32 %s2904_s9, 4  ;;  %s214_s15 = sshll.u32 %s2905_s14, 4  ;;  %s191_s13 = int_to_ptr.vmem [resolvable:$true] %s190_s13  ;;  %s215_s15 = int_to_ptr.vmem [resolvable:$true] %s214_s15 }
  0x32   : > { %s2757_s16 = scalar_lea.vmem %s191_s13, 32  ;;  %p2765_p8 = scmp.lt.s32.totalorder %s191_s13, %s191_s13 }
  0x33   : > { %p2758_p4 = scmp.ne.s32.totalorder %s191_s13, %s2757_s16  ;;  %p2766_p10 = scmp.lt.s32.totalorder %s2757_s16, %s2757_s16 }
  0x35   : > { %p2760_p6 = pnand %p2758_p4, %p2696_p0  ;;  %p2767_p1 = por %p2766_p10, %p2765_p8 }
  0x37   : > { %p2761_p11 = pneg %p2760_p6 }
  0x39   : > { %p2768_p3 = pnand %p2767_p1, %p2761_p11 }
  0x3b   : > { %2771 = shalt.err (!%p2768_p3)
}
  0x3c   : > { %2503 = dma.hbm_to_vmem [thread:$0]  (!%p3009_p2), %s4094_s2, 32, %s191_s13, [#allocation6]  }
  0x3d   : > { %s2783_s23 = scalar_lea.vmem %s215_s15, 16  ;;  %s2790_s25 = scalar_lea.vmem %s215_s15, 32 }
  0x3e   : > { %p2784_p7 = scmp.ne.s32.totalorder %s215_s15, %s2783_s23  ;;  %p2791_p4 = scmp.lt.s32.totalorder %s215_s15, %s215_s15 }
  0x3f   : > { %p2792_p6 = scmp.lt.s32.totalorder %s2790_s25, %s2783_s23 }
  0x40   : > { %p2786_p9 = pnand %p2784_p7, %p2696_p0 }
  0x41   : > { %p2793_p8 = por %p2792_p6, %p2791_p4 }
  0x42   : > { %p2787_p12 = pneg %p2786_p9 }
  0x44   : > { %p2794_p11 = pnand %p2793_p8, %p2787_p12 }
  0x46   : > { %2797 = shalt.err (!%p2794_p11)
}
  0x47   : > { %2509 = dma.hbm_to_vmem [thread:$0]  (!%p3009_p2), %s4096_s4, 16, %s215_s15, [#allocation9]  }
  0x48   : > { %p2387_p10 = scmp.ge.s32.totalorder %s2896_s21, 3 }
  0x4a   : > { %221 = sbr.rel (%p2387_p10) target bundleno = 111 (0x6f), region = 32 }
  0x4f   : > { %224 = sbr.rel (!%p2980_p5) target bundleno = 111 (0x6f), region = 36  ;;  %s225_s11 = sand.u32 (%p2980_p5), 1, %s2892_s20  }
  0x50   : > { %s2389_s9 = sshll.u32 (%p2980_p5), %s2896_s21, 5  ;;  %s2388_s13 = sshll.u32 (%p2980_p5), %s225_s11, 11 }
  0x51   : > { %s231_s14 = ssub.s32 (%p2980_p5), 88, %s2389_s9  ;;  %s3055_s17 = scalar_lea.sflag (%p2980_p5), [#allocation3], %s225_s11 }
  0x52   : > { %p232_p0 = scmp.lt.s32.totalorder (%p2980_p5), %s231_s14, 32  ;;  %s229_s15 = scalar_lea.vmem (%p2980_p5), [#allocation2], %s2388_s13 }
  0x54   : > { %s4284_s14 = smov (!%p232_p0, %s231_s14), 32 }
  0x55   : > { %s3052_s16 = sshll.u32 %s4284_s14, 10 }
  0x56   : > { %s237_s10 = ssub.s32 32768, %s3052_s16 }
  0x57   : > { %238 = vsyncadd %s3055_s17, %s237_s10  ;;  %p2392_p5 = scmp.ne.s32.totalorder %s3052_s16, 0  ;;  %s2412_s28 = sshll.u32 %s2896_s21, 15 }
  0x58   : > { %s3063_s25 = scalar_lea.hbm %s4092_s0, %s2412_s28  ;;  %s244_s26 = sshll.u32 %s229_s15, 4  ;;  %s3065_s26 = int_to_ptr.vmem [resolvable:$true] %s244_s26 }
  0x59   : > { %s2798_s8 = scalar_lea.hbm %s3063_s25, %s3052_s16  ;;  %s2802_s13 = scalar_lea.hbm %s4092_s0, 90112 }
  0x5a   : > { %p2799_p2 = scmp.ne.s32.totalorder %s3063_s25, %s2798_s8  ;;  %p2803_p7 = scmp.lt.s32.totalorder %s3063_s25, %s4092_s0 }
  0x5b   : > { %p2804_p9 = scmp.lt.s32.totalorder %s2802_s13, %s2798_s8 }
  0x5c   : > { %p2800_p1 = pnand %p2799_p2, %p2392_p5 }
  0x5d   : > { %p2805_p12 = por %p2804_p9, %p2803_p7 }
  0x5e   : > { %p2801_p3 = pneg %p2800_p1 }
  0x60   : > { %p2806_p4 = pnand %p2805_p12, %p2801_p3 }
  0x62   : > { %2809 = shalt.err (!%p2806_p4)
}
  0x63   : > { %s2810_s15 = scalar_lea.vmem %s3065_s26, %s3052_s16  ;;  %s2906_s28 = smov [#allocation2]  }
  0x64   : > { %p2811_p6 = scmp.ne.s32.totalorder %s3065_s26, %s2810_s15  ;;  %s2814_s12 = sshll.u32 %s2906_s28, 4  ;;  %s2815_s12 = int_to_ptr.vmem [resolvable:$false] %s2814_s12 }
  0x65   : > { %s2816_s23 = scalar_lea.vmem %s2815_s12, 65536  ;;  %p2817_p10 = scmp.lt.s32.totalorder %s3065_s26, %s2815_s12 }
  0x66   : > { %p2812_p8 = pnand %p2811_p6, %p2392_p5  ;;  %p2818_p0 = scmp.lt.s32.totalorder %s2816_s23, %s2810_s15 }
  0x68   : > { %p2813_p11 = pneg %p2812_p8  ;;  %p2819_p2 = por %p2818_p0, %p2817_p10 }
  0x6a   : > { %p2820_p1 = pnand %p2819_p2, %p2813_p11 }
  0x6c   : > { %2823 = shalt.err (!%p2820_p1)
}
  0x6d   : > { %s2907_s8 = smov 1024   ;;  %s2908_s11 = smov 64  }
  0x6e   : > { %250 = dma.hbm_to_vmem [thread:$0]  (%p2392_p5), %s3063_s25, %s3052_s16, %s3065_s26, %s3055_s17, %s2907_s8, %s2907_s8, %s2908_s11  }
  0x6f PF: > { %256 = sbr.rel (%p3001_p13) target bundleno = 1024 (0x400), region = 40 }
  0x74   : > { %s3094_s9 = sand.u32 1, %s2888_s19   ;;  %p4109_p3 = scmp.ne.s32.totalorder %s4104_s29, 0 }
  0x75   : > { %s2398_s13 = sshll.u32 %s3094_s9, 11  ;;  %s259_s14 = scalar_lea.sflag [#allocation3], %s3094_s9 }
  0x76   : > { %s3098_s10 = scalar_lea.vmem [#allocation2], %s2398_s13 }
  0x77   : > { %2867 = dma.done.wait (%p4109_p3), %s259_s14, 32768  }
  0x78   : > { %2869 = vsyncadd (%p4109_p3), %s259_s14, 4294934528  ;;  %p4110_p5 = scmp.eq.s32.totalorder %s2962_s22, 0 }
  0x7a   : > { %2871 = dma.done.wait (%p4110_p5), [#allocation6], 32800   ;;  %p4111_p13 = pmov %p4110_p5 }
  0x7b   : > { %p4112_p7 = pmov %p4110_p5 }
  0x7c   : > { %2873 = vsyncadd (%p4111_p13), [#allocation6], 4294934496 }
  0x7d   : > { %2875 = dma.done.wait (%p4112_p7), [#allocation9], 4112   ;;  %p4113_p9 = pmov %p4110_p5 }
  0x7e   : > { %v599_v0 = vld [vmem:[#allocation5 + $0xf8] sm:$0xff]  ;;  %v598_v1 = vld [vmem:[#allocation5 + $0xf0] sm:$0xff]  ;;  %v597_v2 = vld [vmem:[#allocation5 + $0xe8] sm:$0xff]  ;;  %s2403_s29 = sshll.u32 %s3094_s9, 4  ;;  %s2413_s17 = sshll.u32 %s2962_s22, 8 }
  0x7f   : > { %2877 = vsyncadd (%p4113_p9), [#allocation9], 4294963184  ;;  %2414 = vmatprep.subr.mxu1 %v599_v0  ;;  %836 = vmatprep.subr.mxu0 %v599_v0  ;;  %v596_v3 = vld [vmem:[#allocation5 + $0xe0] sm:$0xff]  ;;  %v595_v4 = vld [vmem:[#allocation5 + $0xd8] sm:$0xff]  ;;  %s304_s7 = scalar_lea.vmem [#allocation11], %s2403_s29  ;;  %s2271_s15 = scalar_lea.hbm %s4097_s5, %s2413_s17 }
  0x80   : > { %2446 = vmatpush1.msra.mxu1 %v598_v1  ;;  %837 = vmatpush1.msra.mxu0 %v598_v1  ;;  %v594_v5 = vld [vmem:[#allocation5 + $0xd0] sm:$0xff]  ;;  %v593_v6 = vld [vmem:[#allocation5 + $0xc8] sm:$0xff]  ;;  %v592_v7 = vld [vmem:[#allocation5 + $0xc0] sm:$0xff]  ;;  %s2273_s16 = sshll.u32 %s304_s7, 4  ;;  %s2259_s28 = scalar_lea.sflag [#allocation4], %s3094_s9  ;;  %s4053_s16 = int_to_ptr.vmem [resolvable:$true] %s2273_s16 }
  0x81   : > { %2415 = vmatprep.subr.mxu1 %v597_v2  ;;  %838 = vmatprep.subr.mxu0 %v597_v2  ;;  %v591_v8 = vld [vmem:[#allocation5 + $0xb8] sm:$0xff]  ;;  %v590_v9 = vld [vmem:[#allocation5 + $0xb0] sm:$0xff]  ;;  %v589_v10 = vld [vmem:[#allocation5 + $0xa8] sm:$0xff]  ;;  %s2824_s12 = scalar_lea.vmem %s4053_s16, 256  ;;  %p4277_p4 = scmp.ne.s32.totalorder %s4105_s30, 0 }
  0x82   : > { %2447 = vmatpush1.msra.mxu1 %v596_v3  ;;  %839 = vmatpush1.msra.mxu0 %v596_v3  ;;  %v588_v11 = vld [vmem:[#allocation5 + $0xa0] sm:$0xff]  ;;  %v587_v12 = vld [vmem:[#allocation5 + $0x98] sm:$0xff]  ;;  %v586_v13 = vld [vmem:[#allocation5 + $0x90] sm:$0xff]  ;;  %p2825_p12 = scmp.ne.s32.totalorder %s4053_s16, %s2824_s12  ;;  %s2910_s23 = smov [#allocation11]  }
  0x83   : > { %2416 = vmatprep.subr.mxu1 %v595_v4  ;;  %840 = vmatprep.subr.mxu0 %v595_v4  ;;  %v585_v14 = vld [vmem:[#allocation5 + $0x88] sm:$0xff]  ;;  %v584_v15 = vld [vmem:[#allocation5 + $0x80] sm:$0xff]  ;;  %v583_v16 = vld [vmem:[#allocation5 + $0x78] sm:$0xff]  ;;  %s2828_s8 = sshll.u32 %s2910_s23, 4  ;;  %s2829_s8 = int_to_ptr.vmem [resolvable:$false] %s2828_s8 }
  0x84   : > { %2448 = vmatpush1.msra.mxu1 %v594_v5  ;;  %841 = vmatpush1.msra.mxu0 %v594_v5  ;;  %v582_v17 = vld [vmem:[#allocation5 + $0x70] sm:$0xff]  ;;  %v581_v18 = vld [vmem:[#allocation5 + $0x68] sm:$0xff]  ;;  %v580_v19 = vld [vmem:[#allocation5 + $0x60] sm:$0xff]  ;;  %p2826_p6 = pnand %p2825_p12, %p4277_p4  ;;  %s2830_s22 = scalar_lea.vmem %s2829_s8, 512 }
  0x85   : > { %2417 = vmatprep.subr.mxu1 %v593_v6  ;;  %842 = vmatprep.subr.mxu0 %v593_v6  ;;  %v579_v20 = vld [vmem:[#allocation5 + $0x58] sm:$0xff]  ;;  %v578_v21 = vld [vmem:[#allocation5 + $0x50] sm:$0xff]  ;;  %v577_v22 = vld [vmem:[#allocation5 + $0x48] sm:$0xff]  ;;  %p2831_p11 = scmp.lt.s32.totalorder %s4053_s16, %s2829_s8  ;;  %p2832_p10 = scmp.lt.s32.totalorder %s2830_s22, %s2824_s12 }
  0x86   : > { %2449 = vmatpush1.msra.mxu1 %v592_v7  ;;  %843 = vmatpush1.msra.mxu0 %v592_v7  ;;  %v576_v23 = vld [vmem:[#allocation5 + $0x40] sm:$0xff]  ;;  %v575_v24 = vld [vmem:[#allocation5 + $0x38] sm:$0xff]  ;;  %v574_v25 = vld [vmem:[#allocation5 + $0x30] sm:$0xff]  ;;  %p2827_p8 = pneg %p2826_p6 }
  0x87   : > { %2418 = vmatprep.subr.mxu1 %v591_v8  ;;  %844 = vmatprep.subr.mxu0 %v591_v8  ;;  %v573_v26 = vld [vmem:[#allocation5 + $0x28] sm:$0xff]  ;;  %v572_v27 = vld [vmem:[#allocation5 + $0x20] sm:$0xff]  ;;  %v571_v28 = vld [vmem:[#allocation5 + $0x18] sm:$0xff]  ;;  %p2833_p0 = por %p2832_p10, %p2831_p11 }
  0x88   : > { %2450 = vmatpush1.msra.mxu1 %v590_v9  ;;  %845 = vmatpush1.msra.mxu0 %v590_v9  ;;  %v570_v29 = vld [vmem:[#allocation5 + $0x10] sm:$0xff]  ;;  %v569_v30 = vld [vmem:[#allocation5 + $0x8] sm:$0xff]  ;;  %v568_v31 = vld [vmem:[#allocation5] sm:$0xff] }
  0x89   : > { %2419 = vmatprep.subr.mxu1 %v589_v10  ;;  %846 = vmatprep.subr.mxu0 %v589_v10  ;;  %v631_v32 = vld [vmem:[#allocation5 + $0x1f8] sm:$0xff]  ;;  %v630_v33 = vld [vmem:[#allocation5 + $0x1f0] sm:$0xff]  ;;  %v629_v34 = vld [vmem:[#allocation5 + $0x1e8] sm:$0xff]  ;;  %p2834_p2 = pnand %p2833_p0, %p2827_p8 }
  0x8a   : > { %2451 = vmatpush1.msra.mxu1 %v588_v11  ;;  %847 = vmatpush1.msra.mxu0 %v588_v11  ;;  %v628_v35 = vld [vmem:[#allocation5 + $0x1e0] sm:$0xff]  ;;  %v627_v36 = vld [vmem:[#allocation5 + $0x1d8] sm:$0xff]  ;;  %v626_v37 = vld [vmem:[#allocation5 + $0x1d0] sm:$0xff] }
  0x8b   : > { %2420 = vmatprep.subr.mxu1 %v587_v12  ;;  %848 = vmatprep.subr.mxu0 %v587_v12  ;;  %v625_v38 = vld [vmem:[#allocation5 + $0x1c8] sm:$0xff]  ;;  %v624_v39 = vld [vmem:[#allocation5 + $0x1c0] sm:$0xff]  ;;  %v623_v40 = vld [vmem:[#allocation5 + $0x1b8] sm:$0xff] }
  0x8c   : > { %2452 = vmatpush1.msra.mxu1 %v586_v13  ;;  %849 = vmatpush1.msra.mxu0 %v586_v13  ;;  %v622_v41 = vld [vmem:[#allocation5 + $0x1b0] sm:$0xff]  ;;  %v621_v42 = vld [vmem:[#allocation5 + $0x1a8] sm:$0xff]  ;;  %v620_v43 = vld [vmem:[#allocation5 + $0x1a0] sm:$0xff] }
  0x8d   : > { %2421 = vmatprep.subr.mxu1 %v585_v14  ;;  %850 = vmatprep.subr.mxu0 %v585_v14  ;;  %v619_v44 = vld [vmem:[#allocation5 + $0x198] sm:$0xff]  ;;  %v618_v45 = vld [vmem:[#allocation5 + $0x190] sm:$0xff]  ;;  %v617_v46 = vld [vmem:[#allocation5 + $0x188] sm:$0xff] }
  0x8e   : > { %2453 = vmatpush1.msra.mxu1 %v584_v15  ;;  %851 = vmatpush1.msra.mxu0 %v584_v15  ;;  %v616_v47 = vld [vmem:[#allocation5 + $0x180] sm:$0xff]  ;;  %v615_v48 = vld [vmem:[#allocation5 + $0x178] sm:$0xff]  ;;  %v614_v49 = vld [vmem:[#allocation5 + $0x170] sm:$0xff] }
  0x8f   : > { %2422 = vmatprep.subr.mxu1 %v583_v16  ;;  %852 = vmatprep.subr.mxu0 %v583_v16  ;;  %v613_v50 = vld [vmem:[#allocation5 + $0x168] sm:$0xff]  ;;  %v612_v51 = vld [vmem:[#allocation5 + $0x160] sm:$0xff]  ;;  %v611_v52 = vld [vmem:[#allocation5 + $0x158] sm:$0xff] }
  0x90   : > { %2454 = vmatpush1.msra.mxu1 %v582_v17  ;;  %853 = vmatpush1.msra.mxu0 %v582_v17  ;;  %v610_v53 = vld [vmem:[#allocation5 + $0x150] sm:$0xff]  ;;  %v609_v54 = vld [vmem:[#allocation5 + $0x148] sm:$0xff]  ;;  %v608_v55 = vld [vmem:[#allocation5 + $0x140] sm:$0xff] }
  0x91   : > { %2423 = vmatprep.subr.mxu1 %v581_v18  ;;  %854 = vmatprep.subr.mxu0 %v581_v18  ;;  %v607_v56 = vld [vmem:[#allocation5 + $0x138] sm:$0xff]  ;;  %v606_v57 = vld [vmem:[#allocation5 + $0x130] sm:$0xff]  ;;  %v605_v58 = vld [vmem:[#allocation5 + $0x128] sm:$0xff] }
  0x92   : > { %2455 = vmatpush1.msra.mxu1 %v580_v19  ;;  %855 = vmatpush1.msra.mxu0 %v580_v19  ;;  %v604_v59 = vld [vmem:[#allocation5 + $0x120] sm:$0xff]  ;;  %v603_v60 = vld [vmem:[#allocation5 + $0x118] sm:$0xff]  ;;  %v602_v61 = vld [vmem:[#allocation5 + $0x110] sm:$0xff] }
  0x93   : > { %2424 = vmatprep.subr.mxu1 %v579_v20  ;;  %856 = vmatprep.subr.mxu0 %v579_v20  ;;  %v601_v62 = vld [vmem:[#allocation5 + $0x108] sm:$0xff]  ;;  %v600_v0 = vld [vmem:[#allocation5 + $0x100] sm:$0xff]  ;;  %v663_v2 = vld [vmem:[#allocation5 + $0x2f8] sm:$0xff] }
  0x94   : > { %2456 = vmatpush1.msra.mxu1 %v578_v21  ;;  %857 = vmatpush1.msra.mxu0 %v578_v21  ;;  %v441_v63 = vld [vmem:[%s3098_s10 + $0x408] sm:$0xff]  ;;  %v440_v1 = vld [vmem:[%s3098_s10 + $0x400] sm:$0xff]  ;;  %v662_v4 = vld [vmem:[#allocation5 + $0x2f0] sm:$0xff] }
  0x95   : > { %2425 = vmatprep.subr.mxu1 %v577_v22  ;;  %858 = vmatprep.subr.mxu0 %v577_v22  ;;  %v313_v3 = vld [vmem:[%s3098_s10 + $0x8] sm:$0xff]  ;;  %v312_v5 = vld [vmem:[%s3098_s10] sm:$0xff]  ;;  %v727_v7 = vld [vmem:[#allocation5 + $0x4f8] sm:$0xff] }
  0x96   : > { %2457 = vmatpush1.msra.mxu1 %v576_v23  ;;  %859 = vmatpush1.msra.mxu0 %v576_v23  ;;  %v661_v6 = vld [vmem:[#allocation5 + $0x2e8] sm:$0xff]  ;;  %v660_v9 = vld [vmem:[#allocation5 + $0x2e0] sm:$0xff]  ;;  %v726_v10 = vld [vmem:[#allocation5 + $0x4f0] sm:$0xff] }
  0x97   : > { %2426 = vmatprep.subr.mxu1 %v575_v24  ;;  %860 = vmatprep.subr.mxu0 %v575_v24  ;;  %v449_v8 = vld [vmem:[%s3098_s10 + $0x448] sm:$0xff]  ;;  %v448_v11 = vld [vmem:[%s3098_s10 + $0x440] sm:$0xff]  ;;  %v659_v12 = vld [vmem:[#allocation5 + $0x2d8] sm:$0xff] }
  0x98   : > { %2458 = vmatpush1.msra.mxu1 %v574_v25  ;;  %861 = vmatpush1.msra.mxu0 %v574_v25  ;;  %v725_v13 = vld [vmem:[#allocation5 + $0x4e8] sm:$0xff]  ;;  %v658_v15 = vld [vmem:[#allocation5 + $0x2d0] sm:$0xff]  ;;  %v724_v16 = vld [vmem:[#allocation5 + $0x4e0] sm:$0xff] }
  0x99   : > { %2427 = vmatprep.subr.mxu1 %v573_v26  ;;  %862 = vmatprep.subr.mxu0 %v573_v26  ;;  %v321_v14 = vld [vmem:[%s3098_s10 + $0x48] sm:$0xff]  ;;  %v320_v18 = vld [vmem:[%s3098_s10 + $0x40] sm:$0xff]  ;;  %v723_v19 = vld [vmem:[#allocation5 + $0x4d8] sm:$0xff] }
  0x9a   : > { %2459 = vmatpush1.msra.mxu1 %v572_v27  ;;  %863 = vmatpush1.msra.mxu0 %v572_v27  ;;  %v657_v17 = vld [vmem:[#allocation5 + $0x2c8] sm:$0xff]  ;;  %v656_v21 = vld [vmem:[#allocation5 + $0x2c0] sm:$0xff]  ;;  %v722_v22 = vld [vmem:[#allocation5 + $0x4d0] sm:$0xff] }
  0x9b   : > { %2428 = vmatprep.subr.mxu1 %v571_v28  ;;  %864 = vmatprep.subr.mxu0 %v571_v28  ;;  %v457_v20 = vld [vmem:[%s3098_s10 + $0x488] sm:$0xff]  ;;  %v456_v23 = vld [vmem:[%s3098_s10 + $0x480] sm:$0xff]  ;;  %v655_v24 = vld [vmem:[#allocation5 + $0x2b8] sm:$0xff] }
  0x9c   : > { %2460 = vmatpush1.msra.mxu1 %v570_v29  ;;  %865 = vmatpush1.msra.mxu0 %v570_v29  ;;  %v721_v25 = vld [vmem:[#allocation5 + $0x4c8] sm:$0xff]  ;;  %v654_v27 = vld [vmem:[#allocation5 + $0x2b0] sm:$0xff]  ;;  %v720_v28 = vld [vmem:[#allocation5 + $0x4c0] sm:$0xff] }
  0x9d   : > { %2429 = vmatprep.subr.mxu1 %v569_v30  ;;  %866 = vmatprep.subr.mxu0 %v569_v30  ;;  %v329_v26 = vld [vmem:[%s3098_s10 + $0x88] sm:$0xff]  ;;  %v328_v30 = vld [vmem:[%s3098_s10 + $0x80] sm:$0xff] }
  0x9e   : > { %2461 = vmatpush1.msra.mxu1 %v568_v31  ;;  %867 = vmatpush1.msra.mxu0 %v568_v31  ;;  %v653_v29 = vld [vmem:[#allocation5 + $0x2a8] sm:$0xff]  ;;  %v719_v31 = vld [vmem:[#allocation5 + $0x4b8] sm:$0xff] }
  0x9f   : > { %2430 = vmatprep.subr.mxu1 %v631_v32  ;;  %868 = vmatprep.subr.mxu0 %v631_v32  ;;  %v465_v32 = vld [vmem:[%s3098_s10 + $0x4c8] sm:$0xff] }
  0xa0   : > { %2462 = vmatpush2.msra.mxu1 %v630_v33  ;;  %869 = vmatpush2.msra.mxu0 %v630_v33  ;;  %v652_v33 = vld [vmem:[#allocation5 + $0x2a0] sm:$0xff] }
  0xa1   : > { %2431 = vmatprep.subr.mxu1 %v629_v34  ;;  %870 = vmatprep.subr.mxu0 %v629_v34  ;;  %v718_v34 = vld [vmem:[#allocation5 + $0x4b0] sm:$0xff] }
  0xa2   : > { %2463 = vmatpush2.msra.mxu1 %v628_v35  ;;  %871 = vmatpush2.msra.mxu0 %v628_v35  ;;  %v464_v35 = vld [vmem:[%s3098_s10 + $0x4c0] sm:$0xff] }
  0xa3   : > { %2432 = vmatprep.subr.mxu1 %v627_v36  ;;  %872 = vmatprep.subr.mxu0 %v627_v36  ;;  %v651_v36 = vld [vmem:[#allocation5 + $0x298] sm:$0xff] }
  0xa4   : > { %2464 = vmatpush2.msra.mxu1 %v626_v37  ;;  %873 = vmatpush2.msra.mxu0 %v626_v37  ;;  %v717_v37 = vld [vmem:[#allocation5 + $0x4a8] sm:$0xff] }
  0xa5   : > { %2433 = vmatprep.subr.mxu1 %v625_v38  ;;  %874 = vmatprep.subr.mxu0 %v625_v38  ;;  %v337_v38 = vld [vmem:[%s3098_s10 + $0xc8] sm:$0xff] }
  0xa6   : > { %2465 = vmatpush2.msra.mxu1 %v624_v39  ;;  %875 = vmatpush2.msra.mxu0 %v624_v39  ;;  %v650_v39 = vld [vmem:[#allocation5 + $0x290] sm:$0xff] }
  0xa7   : > { %2434 = vmatprep.subr.mxu1 %v623_v40  ;;  %876 = vmatprep.subr.mxu0 %v623_v40  ;;  %v716_v40 = vld [vmem:[#allocation5 + $0x4a0] sm:$0xff] }
  0xa8   : > { %2466 = vmatpush2.msra.mxu1 %v622_v41  ;;  %877 = vmatpush2.msra.mxu0 %v622_v41  ;;  %v649_v41 = vld [vmem:[#allocation5 + $0x288] sm:$0xff] }
  0xa9   : > { %2435 = vmatprep.subr.mxu1 %v621_v42  ;;  %878 = vmatprep.subr.mxu0 %v621_v42  ;;  %v336_v42 = vld [vmem:[%s3098_s10 + $0xc0] sm:$0xff] }
  0xaa   : > { %2467 = vmatpush2.msra.mxu1 %v620_v43  ;;  %879 = vmatpush2.msra.mxu0 %v620_v43  ;;  %v715_v43 = vld [vmem:[#allocation5 + $0x498] sm:$0xff] }
  0xab   : > { %2436 = vmatprep.subr.mxu1 %v619_v44  ;;  %880 = vmatprep.subr.mxu0 %v619_v44  ;;  %v473_v44 = vld [vmem:[%s3098_s10 + $0x508] sm:$0xff] }
  0xac   : > { %2468 = vmatpush2.msra.mxu1 %v618_v45  ;;  %881 = vmatpush2.msra.mxu0 %v618_v45  ;;  %v648_v45 = vld [vmem:[#allocation5 + $0x280] sm:$0xff] }
  0xad   : > { %2437 = vmatprep.subr.mxu1 %v617_v46  ;;  %882 = vmatprep.subr.mxu0 %v617_v46  ;;  %v714_v46 = vld [vmem:[#allocation5 + $0x490] sm:$0xff] }
  0xae   : > { %2469 = vmatpush2.msra.mxu1 %v616_v47  ;;  %883 = vmatpush2.msra.mxu0 %v616_v47  ;;  %v472_v47 = vld [vmem:[%s3098_s10 + $0x500] sm:$0xff] }
  0xaf   : > { %2438 = vmatprep.subr.mxu1 %v615_v48  ;;  %884 = vmatprep.subr.mxu0 %v615_v48  ;;  %v647_v48 = vld [vmem:[#allocation5 + $0x278] sm:$0xff] }
  0xb0   : > { %2470 = vmatpush2.msra.mxu1 %v614_v49  ;;  %885 = vmatpush2.msra.mxu0 %v614_v49  ;;  %v713_v49 = vld [vmem:[#allocation5 + $0x488] sm:$0xff] }
  0xb1   : > { %2439 = vmatprep.subr.mxu1 %v613_v50  ;;  %886 = vmatprep.subr.mxu0 %v613_v50  ;;  %v345_v50 = vld [vmem:[%s3098_s10 + $0x108] sm:$0xff] }
  0xb2   : > { %2471 = vmatpush2.msra.mxu1 %v612_v51  ;;  %887 = vmatpush2.msra.mxu0 %v612_v51  ;;  %v646_v51 = vld [vmem:[#allocation5 + $0x270] sm:$0xff] }
  0xb3   : > { %2440 = vmatprep.subr.mxu1 %v611_v52  ;;  %888 = vmatprep.subr.mxu0 %v611_v52  ;;  %v712_v52 = vld [vmem:[#allocation5 + $0x480] sm:$0xff] }
  0xb4   : > { %2472 = vmatpush2.msra.mxu1 %v610_v53  ;;  %889 = vmatpush2.msra.mxu0 %v610_v53  ;;  %v645_v53 = vld [vmem:[#allocation5 + $0x268] sm:$0xff] }
  0xb5   : > { %2441 = vmatprep.subr.mxu1 %v609_v54  ;;  %890 = vmatprep.subr.mxu0 %v609_v54  ;;  %v344_v54 = vld [vmem:[%s3098_s10 + $0x100] sm:$0xff] }
  0xb6   : > { %2473 = vmatpush2.msra.mxu1 %v608_v55  ;;  %891 = vmatpush2.msra.mxu0 %v608_v55  ;;  %v711_v55 = vld [vmem:[#allocation5 + $0x478] sm:$0xff] }
  0xb7   : > { %2442 = vmatprep.subr.mxu1 %v607_v56  ;;  %892 = vmatprep.subr.mxu0 %v607_v56  ;;  %v481_v56 = vld [vmem:[%s3098_s10 + $0x548] sm:$0xff] }
  0xb8   : > { %2474 = vmatpush2.msra.mxu1 %v606_v57  ;;  %893 = vmatpush2.msra.mxu0 %v606_v57  ;;  %v644_v57 = vld [vmem:[#allocation5 + $0x260] sm:$0xff] }
  0xb9   : > { %2443 = vmatprep.subr.mxu1 %v605_v58  ;;  %894 = vmatprep.subr.mxu0 %v605_v58  ;;  %v710_v58 = vld [vmem:[#allocation5 + $0x470] sm:$0xff] }
  0xba   : > { %2475 = vmatpush2.msra.mxu1 %v604_v59  ;;  %895 = vmatpush2.msra.mxu0 %v604_v59  ;;  %v480_v59 = vld [vmem:[%s3098_s10 + $0x540] sm:$0xff] }
  0xbb   : > { %2444 = vmatprep.subr.mxu1 %v603_v60  ;;  %896 = vmatprep.subr.mxu0 %v603_v60  ;;  %v643_v60 = vld [vmem:[#allocation5 + $0x258] sm:$0xff] }
  0xbc   : > { %2476 = vmatpush2.msra.mxu1 %v602_v61  ;;  %897 = vmatpush2.msra.mxu0 %v602_v61  ;;  %v709_v61 = vld [vmem:[#allocation5 + $0x468] sm:$0xff] }
  0xbd   : > { %2445 = vmatprep.subr.mxu1 %v601_v62  ;;  %996 = vmatprep.mubr.f32.mxu1 %v441_v63  ;;  %v642_v63 = vld [vmem:[#allocation5 + $0x250] sm:$0xff] }
  0xbe   : > { %2477 = vmatpush2.msra.mxu1 %v600_v0  ;;  %898 = vmatprep.subr.mxu0 %v601_v62  ;;  %v353_v62 = vld [vmem:[%s3098_s10 + $0x148] sm:$0xff] }
  0xbf   : > { %997 = vmatmul.mubr.f32.vlgmr.msra.gmra.mxu1 %v440_v1  ;;  %1093 = vmatprep.subr.mxu1 %v663_v2  ;;  %v641_v1 = vld [vmem:[#allocation5 + $0x248] sm:$0xff]  ;;  %v352_v2 = vld [vmem:[%s3098_s10 + $0x140] sm:$0xff] }
  0xc0   : > { %899 = vmatpush2.msra.mxu0 %v600_v0  ;;  %900 = vmatprep.mubr.f32.mxu0 %v313_v3  ;;  %v708_v0 = vld [vmem:[#allocation5 + $0x460] sm:$0xff]  ;;  %v707_v3 = vld [vmem:[#allocation5 + $0x458] sm:$0xff] }
  0xc1   : > { %1094 = vmatpush1.msra.mxu1 %v662_v4  ;;  %901 = vmatmul.mubr.f32.vlgmr.msra.gmra.mxu0 %v312_v5  ;;  %v489_v4 = vld [vmem:[%s3098_s10 + $0x588] sm:$0xff]  ;;  %v640_v5 = vld [vmem:[#allocation5 + $0x240] sm:$0xff] }
  0xc2   : > { %1095 = vmatprep.subr.mxu1 %v661_v6  ;;  %1350 = vmatprep.subr.mxu0 %v727_v7  ;;  %v706_v6 = vld [vmem:[#allocation5 + $0x450] sm:$0xff]  ;;  %v488_v7 = vld [vmem:[%s3098_s10 + $0x580] sm:$0xff] }
  0xc3   : > { %1002 = vmatprep.mubr.f32.mxu1 %v449_v8  ;;  %1096 = vmatpush1.msra.mxu1 %v660_v9  ;;  %v639_v8 = vld [vmem:[#allocation5 + $0x238] sm:$0xff]  ;;  %v705_v9 = vld [vmem:[#allocation5 + $0x448] sm:$0xff] }
  0xc4   : > { %1351 = vmatpush1.msra.mxu0 %v726_v10  ;;  %1003 = vmatmul.mubr.f32.gmra.mxu1 %v448_v11  ;;  %v361_v10 = vld [vmem:[%s3098_s10 + $0x188] sm:$0xff]  ;;  %v638_v11 = vld [vmem:[#allocation5 + $0x230] sm:$0xff] }
  0xc5   : > { %1097 = vmatprep.subr.mxu1 %v659_v12  ;;  %1352 = vmatprep.subr.mxu0 %v725_v13  ;;  %v704_v12 = vld [vmem:[#allocation5 + $0x440] sm:$0xff]  ;;  %v637_v13 = vld [vmem:[#allocation5 + $0x228] sm:$0xff] }
  0xc6   : > { %906 = vmatprep.mubr.f32.mxu0 %v321_v14  ;;  %1098 = vmatpush1.msra.mxu1 %v658_v15  ;;  %v360_v14 = vld [vmem:[%s3098_s10 + $0x180] sm:$0xff]  ;;  %v703_v15 = vld [vmem:[#allocation5 + $0x438] sm:$0xff] }
  0xc7   : > { %1353 = vmatpush1.msra.mxu0 %v724_v16  ;;  %1099 = vmatprep.subr.mxu1 %v657_v17  ;;  %v497_v16 = vld [vmem:[%s3098_s10 + $0x5c8] sm:$0xff]  ;;  %v636_v17 = vld [vmem:[#allocation5 + $0x220] sm:$0xff] }
  0xc8   : > { %907 = vmatmul.mubr.f32.gmra.mxu0 %v320_v18  ;;  %1354 = vmatprep.subr.mxu0 %v723_v19  ;;  %v702_v18 = vld [vmem:[#allocation5 + $0x430] sm:$0xff]  ;;  %v496_v19 = vld [vmem:[%s3098_s10 + $0x5c0] sm:$0xff] }
  0xc9   : > { %1008 = vmatprep.mubr.f32.mxu1 %v457_v20  ;;  %1100 = vmatpush1.msra.mxu1 %v656_v21  ;;  %v635_v20 = vld [vmem:[#allocation5 + $0x218] sm:$0xff]  ;;  %v701_v21 = vld [vmem:[#allocation5 + $0x428] sm:$0xff] }
  0xca   : > { %1355 = vmatpush1.msra.mxu0 %v722_v22  ;;  %1009 = vmatmul.mubr.f32.gmra.mxu1 %v456_v23  ;;  %v369_v22 = vld [vmem:[%s3098_s10 + $0x1c8] sm:$0xff]  ;;  %v634_v23 = vld [vmem:[#allocation5 + $0x210] sm:$0xff] }
  0xcb   : > { %1101 = vmatprep.subr.mxu1 %v655_v24  ;;  %1356 = vmatprep.subr.mxu0 %v721_v25  ;;  %v700_v24 = vld [vmem:[#allocation5 + $0x420] sm:$0xff]  ;;  %v633_v25 = vld [vmem:[#allocation5 + $0x208] sm:$0xff] }
  0xcc   : > { %912 = vmatprep.mubr.f32.mxu0 %v329_v26  ;;  %1102 = vmatpush1.msra.mxu1 %v654_v27  ;;  %v368_v26 = vld [vmem:[%s3098_s10 + $0x1c0] sm:$0xff]  ;;  %v699_v27 = vld [vmem:[#allocation5 + $0x418] sm:$0xff] }
  0xcd   : > { %1357 = vmatpush1.msra.mxu0 %v720_v28  ;;  %1103 = vmatprep.subr.mxu1 %v653_v29  ;;  %v505_v28 = vld [vmem:[%s3098_s10 + $0x608] sm:$0xff]  ;;  %v632_v29 = vld [vmem:[#allocation5 + $0x200] sm:$0xff] }
  0xce   : > { %913 = vmatmul.mubr.f32.gmra.mxu0 %v328_v30  ;;  %1358 = vmatprep.subr.mxu0 %v719_v31  ;;  %v698_v30 = vld [vmem:[#allocation5 + $0x410] sm:$0xff]  ;;  %v504_v31 = vld [vmem:[%s3098_s10 + $0x600] sm:$0xff] }
  0xcf   : > { %1014 = vmatprep.mubr.f32.mxu1 %v465_v32  ;;  %1104 = vmatpush1.msra.mxu1 %v652_v33  ;;  %v695_v32 = vld [vmem:[#allocation5 + $0x3f8] sm:$0xff]  ;;  %v697_v33 = vld [vmem:[#allocation5 + $0x408] sm:$0xff] }
  0xd0   : > { %1359 = vmatpush1.msra.mxu0 %v718_v34  ;;  %1015 = vmatmul.mubr.f32.gmra.mxu1 %v464_v35  ;;  %v377_v34 = vld [vmem:[%s3098_s10 + $0x208] sm:$0xff]  ;;  %v694_v35 = vld [vmem:[#allocation5 + $0x3f0] sm:$0xff] }
  0xd1   : > { %1105 = vmatprep.subr.mxu1 %v651_v36  ;;  %1360 = vmatprep.subr.mxu0 %v717_v37  ;;  %v696_v36 = vld [vmem:[#allocation5 + $0x400] sm:$0xff]  ;;  %v693_v37 = vld [vmem:[#allocation5 + $0x3e8] sm:$0xff] }
  0xd2   : > { %918 = vmatprep.mubr.f32.mxu0 %v337_v38  ;;  %1106 = vmatpush1.msra.mxu1 %v650_v39  ;;  %v376_v38 = vld [vmem:[%s3098_s10 + $0x200] sm:$0xff]  ;;  %v759_v39 = vld [vmem:[#allocation5 + $0x5f8] sm:$0xff] }
  0xd3   : > { %1361 = vmatpush1.msra.mxu0 %v716_v40  ;;  %1107 = vmatprep.subr.mxu1 %v649_v41  ;;  %v513_v40 = vld [vmem:[%s3098_s10 + $0x648] sm:$0xff]  ;;  %v692_v41 = vld [vmem:[#allocation5 + $0x3e0] sm:$0xff] }
  0xd4   : > { %919 = vmatmul.mubr.f32.gmra.mxu0 %v336_v42  ;;  %1362 = vmatprep.subr.mxu0 %v715_v43  ;;  %v758_v42 = vld [vmem:[#allocation5 + $0x5f0] sm:$0xff]  ;;  %v512_v43 = vld [vmem:[%s3098_s10 + $0x640] sm:$0xff] }
  0xd5   : > { %1020 = vmatprep.mubr.f32.mxu1 %v473_v44  ;;  %1108 = vmatpush1.msra.mxu1 %v648_v45  ;;  %v691_v44 = vld [vmem:[#allocation5 + $0x3d8] sm:$0xff]  ;;  %v757_v45 = vld [vmem:[#allocation5 + $0x5e8] sm:$0xff] }
  0xd6   : > { %1363 = vmatpush1.msra.mxu0 %v714_v46  ;;  %1021 = vmatmul.mubr.f32.gmra.mxu1 %v472_v47  ;;  %v385_v46 = vld [vmem:[%s3098_s10 + $0x248] sm:$0xff]  ;;  %v690_v47 = vld [vmem:[#allocation5 + $0x3d0] sm:$0xff] }
  0xd7   : > { %1109 = vmatprep.subr.mxu1 %v647_v48  ;;  %1364 = vmatprep.subr.mxu0 %v713_v49  ;;  %v756_v48 = vld [vmem:[#allocation5 + $0x5e0] sm:$0xff]  ;;  %v689_v49 = vld [vmem:[#allocation5 + $0x3c8] sm:$0xff] }
  0xd8   : > { %924 = vmatprep.mubr.f32.mxu0 %v345_v50  ;;  %1110 = vmatpush1.msra.mxu1 %v646_v51  ;;  %v384_v50 = vld [vmem:[%s3098_s10 + $0x240] sm:$0xff]  ;;  %v755_v51 = vld [vmem:[#allocation5 + $0x5d8] sm:$0xff] }
  0xd9   : > { %1365 = vmatpush1.msra.mxu0 %v712_v52  ;;  %1111 = vmatprep.subr.mxu1 %v645_v53  ;;  %v521_v52 = vld [vmem:[%s3098_s10 + $0x688] sm:$0xff]  ;;  %v688_v53 = vld [vmem:[#allocation5 + $0x3c0] sm:$0xff] }
  0xda   : > { %925 = vmatmul.mubr.f32.gmra.mxu0 %v344_v54  ;;  %1366 = vmatprep.subr.mxu0 %v711_v55  ;;  %v754_v54 = vld [vmem:[#allocation5 + $0x5d0] sm:$0xff]  ;;  %v520_v55 = vld [vmem:[%s3098_s10 + $0x680] sm:$0xff] }
  0xdb   : > { %1026 = vmatprep.mubr.f32.mxu1 %v481_v56  ;;  %1112 = vmatpush1.msra.mxu1 %v644_v57  ;;  %v687_v56 = vld [vmem:[#allocation5 + $0x3b8] sm:$0xff]  ;;  %v753_v57 = vld [vmem:[#allocation5 + $0x5c8] sm:$0xff] }
  0xdc   : > { %1367 = vmatpush1.msra.mxu0 %v710_v58  ;;  %1027 = vmatmul.mubr.f32.gmra.mxu1 %v480_v59  ;;  %v393_v58 = vld [vmem:[%s3098_s10 + $0x288] sm:$0xff]  ;;  %v686_v59 = vld [vmem:[#allocation5 + $0x3b0] sm:$0xff] }
  0xdd   : > { %1113 = vmatprep.subr.mxu1 %v643_v60  ;;  %1368 = vmatprep.subr.mxu0 %v709_v61  ;;  %v752_v60 = vld [vmem:[#allocation5 + $0x5c0] sm:$0xff]  ;;  %v685_v61 = vld [vmem:[#allocation5 + $0x3a8] sm:$0xff] }
  0xde   : > { %930 = vmatprep.mubr.f32.mxu0 %v353_v62  ;;  %1114 = vmatpush1.msra.mxu1 %v642_v63  ;;  %v392_v62 = vld [vmem:[%s3098_s10 + $0x280] sm:$0xff]  ;;  %v751_v63 = vld [vmem:[#allocation5 + $0x5b8] sm:$0xff] }
  0xdf   : > { %1369 = vmatpush1.msra.mxu0 %v708_v0  ;;  %1115 = vmatprep.subr.mxu1 %v641_v1  ;;  %v529_v0 = vld [vmem:[%s3098_s10 + $0x6c8] sm:$0xff]  ;;  %v684_v1 = vld [vmem:[#allocation5 + $0x3a0] sm:$0xff] }
  0xe0   : > { %931 = vmatmul.mubr.f32.gmra.mxu0 %v352_v2  ;;  %1370 = vmatprep.subr.mxu0 %v707_v3  ;;  %v750_v2 = vld [vmem:[#allocation5 + $0x5b0] sm:$0xff]  ;;  %v528_v3 = vld [vmem:[%s3098_s10 + $0x6c0] sm:$0xff] }
  0xe1   : > { %1032 = vmatprep.mubr.f32.mxu1 %v489_v4  ;;  %1116 = vmatpush1.msra.mxu1 %v640_v5  ;;  %v683_v4 = vld [vmem:[#allocation5 + $0x398] sm:$0xff]  ;;  %v749_v5 = vld [vmem:[#allocation5 + $0x5a8] sm:$0xff] }
  0xe2   : > { %1371 = vmatpush1.msra.mxu0 %v706_v6  ;;  %1033 = vmatmul.mubr.f32.gmra.mxu1 %v488_v7  ;;  %v401_v6 = vld [vmem:[%s3098_s10 + $0x2c8] sm:$0xff]  ;;  %v682_v7 = vld [vmem:[#allocation5 + $0x390] sm:$0xff] }
  0xe3   : > { %1117 = vmatprep.subr.mxu1 %v639_v8  ;;  %1372 = vmatprep.subr.mxu0 %v705_v9  ;;  %v748_v8 = vld [vmem:[#allocation5 + $0x5a0] sm:$0xff]  ;;  %v681_v9 = vld [vmem:[#allocation5 + $0x388] sm:$0xff] }
  0xe4   : > { %936 = vmatprep.mubr.f32.mxu0 %v361_v10  ;;  %1118 = vmatpush1.msra.mxu1 %v638_v11  ;;  %v400_v10 = vld [vmem:[%s3098_s10 + $0x2c0] sm:$0xff]  ;;  %v747_v11 = vld [vmem:[#allocation5 + $0x598] sm:$0xff] }
  0xe5   : > { %1373 = vmatpush1.msra.mxu0 %v704_v12  ;;  %1119 = vmatprep.subr.mxu1 %v637_v13  ;;  %v537_v12 = vld [vmem:[%s3098_s10 + $0x708] sm:$0xff]  ;;  %v680_v13 = vld [vmem:[#allocation5 + $0x380] sm:$0xff] }
  0xe6   : > { %937 = vmatmul.mubr.f32.gmra.mxu0 %v360_v14  ;;  %1374 = vmatprep.subr.mxu0 %v703_v15  ;;  %v746_v14 = vld [vmem:[#allocation5 + $0x590] sm:$0xff]  ;;  %v536_v15 = vld [vmem:[%s3098_s10 + $0x700] sm:$0xff] }
  0xe7   : > { %1038 = vmatprep.mubr.f32.mxu1 %v497_v16  ;;  %1120 = vmatpush1.msra.mxu1 %v636_v17  ;;  %v679_v16 = vld [vmem:[#allocation5 + $0x378] sm:$0xff]  ;;  %v745_v17 = vld [vmem:[#allocation5 + $0x588] sm:$0xff] }
  0xe8   : > { %1375 = vmatpush1.msra.mxu0 %v702_v18  ;;  %1039 = vmatmul.mubr.f32.gmra.mxu1 %v496_v19  ;;  %v409_v18 = vld [vmem:[%s3098_s10 + $0x308] sm:$0xff]  ;;  %v678_v19 = vld [vmem:[#allocation5 + $0x370] sm:$0xff] }
  0xe9   : > { %1121 = vmatprep.subr.mxu1 %v635_v20  ;;  %1376 = vmatprep.subr.mxu0 %v701_v21  ;;  %v744_v20 = vld [vmem:[#allocation5 + $0x580] sm:$0xff]  ;;  %v677_v21 = vld [vmem:[#allocation5 + $0x368] sm:$0xff] }
  0xea   : > { %942 = vmatprep.mubr.f32.mxu0 %v369_v22  ;;  %1122 = vmatpush1.msra.mxu1 %v634_v23  ;;  %v408_v22 = vld [vmem:[%s3098_s10 + $0x300] sm:$0xff]  ;;  %v743_v23 = vld [vmem:[#allocation5 + $0x578] sm:$0xff] }
  0xeb   : > { %1377 = vmatpush1.msra.mxu0 %v700_v24  ;;  %1123 = vmatprep.subr.mxu1 %v633_v25  ;;  %v545_v24 = vld [vmem:[%s3098_s10 + $0x748] sm:$0xff]  ;;  %v676_v25 = vld [vmem:[#allocation5 + $0x360] sm:$0xff] }
  0xec   : > { %943 = vmatmul.mubr.f32.gmra.mxu0 %v368_v26  ;;  %1378 = vmatprep.subr.mxu0 %v699_v27  ;;  %v742_v26 = vld [vmem:[#allocation5 + $0x570] sm:$0xff]  ;;  %v544_v27 = vld [vmem:[%s3098_s10 + $0x740] sm:$0xff] }
  0xed   : > { %1044 = vmatprep.mubr.f32.mxu1 %v505_v28  ;;  %1124 = vmatpush1.msra.mxu1 %v632_v29  ;;  %v675_v28 = vld [vmem:[#allocation5 + $0x358] sm:$0xff]  ;;  %v741_v29 = vld [vmem:[#allocation5 + $0x568] sm:$0xff] }
  0xee   : > { %1379 = vmatpush1.msra.mxu0 %v698_v30  ;;  %1045 = vmatmul.mubr.f32.gmra.mxu1 %v504_v31  ;;  %v417_v30 = vld [vmem:[%s3098_s10 + $0x348] sm:$0xff]  ;;  %v674_v31 = vld [vmem:[#allocation5 + $0x350] sm:$0xff] }
  0xef   : > { %1125 = vmatprep.subr.mxu1 %v695_v32  ;;  %1380 = vmatprep.subr.mxu0 %v697_v33  ;;  %v740_v32 = vld [vmem:[#allocation5 + $0x560] sm:$0xff]  ;;  %v673_v33 = vld [vmem:[#allocation5 + $0x348] sm:$0xff] }
  0xf0   : > { %948 = vmatprep.mubr.f32.mxu0 %v377_v34  ;;  %1126 = vmatpush2.msra.mxu1 %v694_v35  ;;  %v416_v34 = vld [vmem:[%s3098_s10 + $0x340] sm:$0xff]  ;;  %v739_v35 = vld [vmem:[#allocation5 + $0x558] sm:$0xff] }
  0xf1   : > { %1381 = vmatpush1.msra.mxu0 %v696_v36  ;;  %1127 = vmatprep.subr.mxu1 %v693_v37  ;;  %v553_v36 = vld [vmem:[%s3098_s10 + $0x788] sm:$0xff]  ;;  %v672_v37 = vld [vmem:[#allocation5 + $0x340] sm:$0xff] }
  0xf2   : > { %949 = vmatmul.mubr.f32.gmra.mxu0 %v376_v38  ;;  %1382 = vmatprep.subr.mxu0 %v759_v39  ;;  %v738_v38 = vld [vmem:[#allocation5 + $0x550] sm:$0xff]  ;;  %v552_v39 = vld [vmem:[%s3098_s10 + $0x780] sm:$0xff] }
  0xf3   : > { %1050 = vmatprep.mubr.f32.mxu1 %v513_v40  ;;  %1128 = vmatpush2.msra.mxu1 %v692_v41  ;;  %v671_v40 = vld [vmem:[#allocation5 + $0x338] sm:$0xff]  ;;  %v737_v41 = vld [vmem:[#allocation5 + $0x548] sm:$0xff] }
  0xf4   : > { %1383 = vmatpush2.msra.mxu0 %v758_v42  ;;  %1051 = vmatmul.mubr.f32.gmra.mxu1 %v512_v43  ;;  %v425_v42 = vld [vmem:[%s3098_s10 + $0x388] sm:$0xff]  ;;  %v670_v43 = vld [vmem:[#allocation5 + $0x330] sm:$0xff] }
  0xf5   : > { %1129 = vmatprep.subr.mxu1 %v691_v44  ;;  %1384 = vmatprep.subr.mxu0 %v757_v45  ;;  %v736_v44 = vld [vmem:[#allocation5 + $0x540] sm:$0xff]  ;;  %v669_v45 = vld [vmem:[#allocation5 + $0x328] sm:$0xff] }
  0xf6   : > { %954 = vmatprep.mubr.f32.mxu0 %v385_v46  ;;  %1130 = vmatpush2.msra.mxu1 %v690_v47  ;;  %v424_v46 = vld [vmem:[%s3098_s10 + $0x380] sm:$0xff]  ;;  %v735_v47 = vld [vmem:[#allocation5 + $0x538] sm:$0xff] }
  0xf7   : > { %1385 = vmatpush2.msra.mxu0 %v756_v48  ;;  %1131 = vmatprep.subr.mxu1 %v689_v49  ;;  %v561_v48 = vld [vmem:[%s3098_s10 + $0x7c8] sm:$0xff]  ;;  %v668_v49 = vld [vmem:[#allocation5 + $0x320] sm:$0xff] }
  0xf8   : > { %955 = vmatmul.mubr.f32.gmra.mxu0 %v384_v50  ;;  %1386 = vmatprep.subr.mxu0 %v755_v51  ;;  %v734_v50 = vld [vmem:[#allocation5 + $0x530] sm:$0xff]  ;;  %v560_v51 = vld [vmem:[%s3098_s10 + $0x7c0] sm:$0xff] }
  0xf9   : > { %1056 = vmatprep.mubr.f32.mxu1 %v521_v52  ;;  %1132 = vmatpush2.msra.mxu1 %v688_v53  ;;  %v667_v52 = vld [vmem:[#allocation5 + $0x318] sm:$0xff]  ;;  %v733_v53 = vld [vmem:[#allocation5 + $0x528] sm:$0xff] }
  0xfa   : > { %1387 = vmatpush2.msra.mxu0 %v754_v54  ;;  %1057 = vmatmul.mubr.f32.gmra.mxu1 %v520_v55  ;;  %v433_v54 = vld [vmem:[%s3098_s10 + $0x3c8] sm:$0xff]  ;;  %v666_v55 = vld [vmem:[#allocation5 + $0x310] sm:$0xff] }
  0xfb   : > { %1133 = vmatprep.subr.mxu1 %v687_v56  ;;  %1388 = vmatprep.subr.mxu0 %v753_v57  ;;  %v732_v56 = vld [vmem:[#allocation5 + $0x520] sm:$0xff]  ;;  %v665_v57 = vld [vmem:[#allocation5 + $0x308] sm:$0xff] }
  0xfc   : > { %960 = vmatprep.mubr.f32.mxu0 %v393_v58  ;;  %1134 = vmatpush2.msra.mxu1 %v686_v59  ;;  %v432_v58 = vld [vmem:[%s3098_s10 + $0x3c0] sm:$0xff]  ;;  %v731_v59 = vld [vmem:[#allocation5 + $0x518] sm:$0xff] }
  0xfd   : > { %1389 = vmatpush2.msra.mxu0 %v752_v60  ;;  %1135 = vmatprep.subr.mxu1 %v685_v61  ;;  %v664_v60 = vld [vmem:[#allocation5 + $0x300] sm:$0xff]  ;;  %v315_v61 = vld [vmem:[%s3098_s10 + $0x18] sm:$0xff] }
  0xfe   : > { %961 = vmatmul.mubr.f32.gmra.mxu0 %v392_v62  ;;  %1390 = vmatprep.subr.mxu0 %v751_v63  ;;  %v730_v62 = vld [vmem:[#allocation5 + $0x510] sm:$0xff] }
  0xff   : > { %1062 = vmatprep.mubr.f32.mxu1 %v529_v0  ;;  %1136 = vmatpush2.msra.mxu1 %v684_v1  ;;  %v314_v63 = vld [vmem:[%s3098_s10 + $0x10] sm:$0xff]  ;;  %v729_v0 = vld [vmem:[#allocation5 + $0x508] sm:$0xff]  ;;  %v791_v1 = vld [vmem:[#allocation5 + $0x6f8] sm:$0xff] }
 0x100   : > { %1391 = vmatpush2.msra.mxu0 %v750_v2  ;;  %1063 = vmatmul.mubr.f32.gmra.mxu1 %v528_v3  ;;  %v728_v2 = vld [vmem:[#allocation5 + $0x500] sm:$0xff]  ;;  %v317_v3 = vld [vmem:[%s3098_s10 + $0x28] sm:$0xff] }
 0x101   : > { %1137 = vmatprep.subr.mxu1 %v683_v4  ;;  %1392 = vmatprep.subr.mxu0 %v749_v5  ;;  %v790_v4 = vld [vmem:[#allocation5 + $0x6f0] sm:$0xff]  ;;  %v316_v5 = vld [vmem:[%s3098_s10 + $0x20] sm:$0xff] }
 0x102   : > { %966 = vmatprep.mubr.f32.mxu0 %v401_v6  ;;  %1138 = vmatpush2.msra.mxu1 %v682_v7  ;;  %v323_v6 = vld [vmem:[%s3098_s10 + $0x58] sm:$0xff]  ;;  %v789_v7 = vld [vmem:[#allocation5 + $0x6e8] sm:$0xff] }
 0x103   : > { %1393 = vmatpush2.msra.mxu0 %v748_v8  ;;  %1139 = vmatprep.subr.mxu1 %v681_v9  ;;  %v322_v8 = vld [vmem:[%s3098_s10 + $0x50] sm:$0xff]  ;;  %v325_v9 = vld [vmem:[%s3098_s10 + $0x68] sm:$0xff] }
 0x104   : > { %967 = vmatmul.mubr.f32.gmra.mxu0 %v400_v10  ;;  %1394 = vmatprep.subr.mxu0 %v747_v11  ;;  %v788_v10 = vld [vmem:[#allocation5 + $0x6e0] sm:$0xff]  ;;  %v331_v11 = vld [vmem:[%s3098_s10 + $0x98] sm:$0xff] }
 0x105   : > { %1068 = vmatprep.mubr.f32.mxu1 %v537_v12  ;;  %1140 = vmatpush2.msra.mxu1 %v680_v13  ;;  %v324_v12 = vld [vmem:[%s3098_s10 + $0x60] sm:$0xff]  ;;  %v787_v13 = vld [vmem:[#allocation5 + $0x6d8] sm:$0xff] }
 0x106   : > { %1395 = vmatpush2.msra.mxu0 %v746_v14  ;;  %1069 = vmatmul.mubr.f32.gmra.mxu1 %v536_v15  ;;  %v333_v14 = vld [vmem:[%s3098_s10 + $0xa8] sm:$0xff]  ;;  %v786_v15 = vld [vmem:[#allocation5 + $0x6d0] sm:$0xff] }
 0x107   : > { %1141 = vmatprep.subr.mxu1 %v679_v16  ;;  %1396 = vmatprep.subr.mxu0 %v745_v17  ;;  %v330_v16 = vld [vmem:[%s3098_s10 + $0x90] sm:$0xff]  ;;  %v785_v17 = vld [vmem:[#allocation5 + $0x6c8] sm:$0xff] }
 0x108   : > { %972 = vmatprep.mubr.f32.mxu0 %v409_v18  ;;  %1142 = vmatpush2.msra.mxu1 %v678_v19  ;;  %v339_v18 = vld [vmem:[%s3098_s10 + $0xd8] sm:$0xff]  ;;  %v784_v19 = vld [vmem:[#allocation5 + $0x6c0] sm:$0xff] }
 0x109   : > { %1397 = vmatpush2.msra.mxu0 %v744_v20  ;;  %1143 = vmatprep.subr.mxu1 %v677_v21  ;;  %v332_v20 = vld [vmem:[%s3098_s10 + $0xa0] sm:$0xff]  ;;  %v783_v21 = vld [vmem:[#allocation5 + $0x6b8] sm:$0xff] }
 0x10a   : > { %973 = vmatmul.mubr.f32.gmra.mxu0 %v408_v22  ;;  %1398 = vmatprep.subr.mxu0 %v743_v23  ;;  %v341_v22 = vld [vmem:[%s3098_s10 + $0xe8] sm:$0xff]  ;;  %v782_v23 = vld [vmem:[#allocation5 + $0x6b0] sm:$0xff] }
 0x10b   : > { %1074 = vmatprep.mubr.f32.mxu1 %v545_v24  ;;  %1144 = vmatpush2.msra.mxu1 %v676_v25  ;;  %v338_v24 = vld [vmem:[%s3098_s10 + $0xd0] sm:$0xff]  ;;  %v781_v25 = vld [vmem:[#allocation5 + $0x6a8] sm:$0xff] }
 0x10c   : > { %1399 = vmatpush2.msra.mxu0 %v742_v26  ;;  %1075 = vmatmul.mubr.f32.gmra.mxu1 %v544_v27  ;;  %v347_v26 = vld [vmem:[%s3098_s10 + $0x118] sm:$0xff]  ;;  %v780_v27 = vld [vmem:[#allocation5 + $0x6a0] sm:$0xff] }
 0x10d   : > { %1145 = vmatprep.subr.mxu1 %v675_v28  ;;  %1400 = vmatprep.subr.mxu0 %v741_v29  ;;  %v340_v28 = vld [vmem:[%s3098_s10 + $0xe0] sm:$0xff]  ;;  %v779_v29 = vld [vmem:[#allocation5 + $0x698] sm:$0xff] }
 0x10e   : > { %978 = vmatprep.mubr.f32.mxu0 %v417_v30  ;;  %1146 = vmatpush2.msra.mxu1 %v674_v31  ;;  %v349_v30 = vld [vmem:[%s3098_s10 + $0x128] sm:$0xff]  ;;  %v778_v31 = vld [vmem:[#allocation5 + $0x690] sm:$0xff] }
 0x10f   : > { %1401 = vmatpush2.msra.mxu0 %v740_v32  ;;  %1147 = vmatprep.subr.mxu1 %v673_v33  ;;  %v346_v32 = vld [vmem:[%s3098_s10 + $0x110] sm:$0xff]  ;;  %v777_v33 = vld [vmem:[#allocation5 + $0x688] sm:$0xff] }
 0x110   : > { %979 = vmatmul.mubr.f32.gmra.mxu0 %v416_v34  ;;  %1402 = vmatprep.subr.mxu0 %v739_v35  ;;  %v355_v34 = vld [vmem:[%s3098_s10 + $0x158] sm:$0xff]  ;;  %v776_v35 = vld [vmem:[#allocation5 + $0x680] sm:$0xff] }
 0x111   : > { %1080 = vmatprep.mubr.f32.mxu1 %v553_v36  ;;  %1148 = vmatpush2.msra.mxu1 %v672_v37  ;;  %v348_v36 = vld [vmem:[%s3098_s10 + $0x120] sm:$0xff]  ;;  %v775_v37 = vld [vmem:[#allocation5 + $0x678] sm:$0xff] }
 0x112   : > { %1403 = vmatpush2.msra.mxu0 %v738_v38  ;;  %1081 = vmatmul.mubr.f32.gmra.mxu1 %v552_v39  ;;  %v357_v38 = vld [vmem:[%s3098_s10 + $0x168] sm:$0xff]  ;;  %v774_v39 = vld [vmem:[#allocation5 + $0x670] sm:$0xff] }
 0x113   : > { %1149 = vmatprep.subr.mxu1 %v671_v40  ;;  %1404 = vmatprep.subr.mxu0 %v737_v41  ;;  %v354_v40 = vld [vmem:[%s3098_s10 + $0x150] sm:$0xff]  ;;  %v773_v41 = vld [vmem:[#allocation5 + $0x668] sm:$0xff] }
 0x114   : > { %984 = vmatprep.mubr.f32.mxu0 %v425_v42  ;;  %1150 = vmatpush2.msra.mxu1 %v670_v43  ;;  %v363_v42 = vld [vmem:[%s3098_s10 + $0x198] sm:$0xff]  ;;  %v772_v43 = vld [vmem:[#allocation5 + $0x660] sm:$0xff] }
 0x115   : > { %1405 = vmatpush2.msra.mxu0 %v736_v44  ;;  %1151 = vmatprep.subr.mxu1 %v669_v45  ;;  %v356_v44 = vld [vmem:[%s3098_s10 + $0x160] sm:$0xff]  ;;  %v771_v45 = vld [vmem:[#allocation5 + $0x658] sm:$0xff] }
 0x116   : > { %985 = vmatmul.mubr.f32.gmra.mxu0 %v424_v46  ;;  %1406 = vmatprep.subr.mxu0 %v735_v47  ;;  %v365_v46 = vld [vmem:[%s3098_s10 + $0x1a8] sm:$0xff]  ;;  %v770_v47 = vld [vmem:[#allocation5 + $0x650] sm:$0xff] }
 0x117   : > { %1086 = vmatprep.mubr.f32.mxu1 %v561_v48  ;;  %1152 = vmatpush2.msra.mxu1 %v668_v49  ;;  %v362_v48 = vld [vmem:[%s3098_s10 + $0x190] sm:$0xff]  ;;  %v769_v49 = vld [vmem:[#allocation5 + $0x648] sm:$0xff] }
 0x118   : > { %1407 = vmatpush2.msra.mxu0 %v734_v50  ;;  %1087 = vmatmul.mubr.f32.gmra.mxu1 %v560_v51  ;;  %v371_v50 = vld [vmem:[%s3098_s10 + $0x1d8] sm:$0xff]  ;;  %v768_v51 = vld [vmem:[#allocation5 + $0x640] sm:$0xff] }
 0x119   : > { %1153 = vmatprep.subr.mxu1 %v667_v52  ;;  %1408 = vmatprep.subr.mxu0 %v733_v53  ;;  %v364_v52 = vld [vmem:[%s3098_s10 + $0x1a0] sm:$0xff]  ;;  %v767_v53 = vld [vmem:[#allocation5 + $0x638] sm:$0xff] }
 0x11a   : > { %990 = vmatprep.mubr.f32.mxu0 %v433_v54  ;;  %1154 = vmatpush2.msra.mxu1 %v666_v55  ;;  %v373_v54 = vld [vmem:[%s3098_s10 + $0x1e8] sm:$0xff]  ;;  %v766_v55 = vld [vmem:[#allocation5 + $0x630] sm:$0xff] }
 0x11b   : > { %1409 = vmatpush2.msra.mxu0 %v732_v56  ;;  %1155 = vmatprep.subr.mxu1 %v665_v57  ;;  %v370_v56 = vld [vmem:[%s3098_s10 + $0x1d0] sm:$0xff]  ;;  %v765_v57 = vld [vmem:[#allocation5 + $0x628] sm:$0xff] }
 0x11c   : > { %991 = vmatmul.mubr.f32.gmra.mxu0 %v432_v58  ;;  %1410 = vmatprep.subr.mxu0 %v731_v59  ;;  %v379_v58 = vld [vmem:[%s3098_s10 + $0x218] sm:$0xff]  ;;  %v764_v59 = vld [vmem:[#allocation5 + $0x620] sm:$0xff] }
 0x11d   : > { %1156 = vmatpush2.msra.mxu1 %v664_v60  ;;  %1157 = vmatprep.mubr.f32.mxu1 %v315_v61  ;;  %v372_v60 = vld [vmem:[%s3098_s10 + $0x1e0] sm:$0xff]  ;;  %v763_v61 = vld [vmem:[#allocation5 + $0x618] sm:$0xff] }
 0x11e   : > { %1411 = vmatpush2.msra.mxu0 %v730_v62  ;;  %1158 = vmatmul.mubr.f32.vlgmr.msra.gmra.mxu1 %v314_v63  ;;  %v381_v62 = vld [vmem:[%s3098_s10 + $0x228] sm:$0xff]  ;;  %v762_v63 = vld [vmem:[#allocation5 + $0x610] sm:$0xff] }
 0x11f   : > { %1412 = vmatprep.subr.mxu0 %v729_v0  ;;  %1607 = vmatprep.subr.mxu1 %v791_v1  ;;  %v378_v0 = vld [vmem:[%s3098_s10 + $0x210] sm:$0xff]  ;;  %v761_v1 = vld [vmem:[#allocation5 + $0x608] sm:$0xff] }
 0x120   : > { %1413 = vmatpush2.msra.mxu0 %v728_v2  ;;  %1414 = vmatprep.mubr.f32.mxu0 %v317_v3  ;;  %v387_v2 = vld [vmem:[%s3098_s10 + $0x258] sm:$0xff]  ;;  %v760_v3 = vld [vmem:[#allocation5 + $0x600] sm:$0xff] }
 0x121   : > { %1608 = vmatpush1.msra.mxu1 %v790_v4  ;;  %1415 = vmatmul.mubr.f32.vlgmr.msra.gmra.mxu0 %v316_v5  ;;  %v380_v4 = vld [vmem:[%s3098_s10 + $0x220] sm:$0xff]  ;;  %v823_v5 = vld [vmem:[#allocation5 + $0x7f8] sm:$0xff] }
 0x122   : > { %1163 = vmatprep.mubr.f32.mxu1 %v323_v6  ;;  %1609 = vmatprep.subr.mxu1 %v789_v7  ;;  %v389_v6 = vld [vmem:[%s3098_s10 + $0x268] sm:$0xff]  ;;  %v822_v7 = vld [vmem:[#allocation5 + $0x7f0] sm:$0xff] }
 0x123   : > { %1164 = vmatmul.mubr.f32.gmra.mxu1 %v322_v8  ;;  %1420 = vmatprep.mubr.f32.mxu0 %v325_v9  ;;  %v386_v8 = vld [vmem:[%s3098_s10 + $0x250] sm:$0xff]  ;;  %v821_v9 = vld [vmem:[#allocation5 + $0x7e8] sm:$0xff] }
 0x124   : > { %1610 = vmatpush1.msra.mxu1 %v788_v10  ;;  %1169 = vmatprep.mubr.f32.mxu1 %v331_v11  ;;  %v395_v10 = vld [vmem:[%s3098_s10 + $0x298] sm:$0xff]  ;;  %v820_v11 = vld [vmem:[#allocation5 + $0x7e0] sm:$0xff] }
 0x125   : > { %1421 = vmatmul.mubr.f32.gmra.mxu0 %v324_v12  ;;  %1611 = vmatprep.subr.mxu1 %v787_v13  ;;  %v388_v12 = vld [vmem:[%s3098_s10 + $0x260] sm:$0xff]  ;;  %v819_v13 = vld [vmem:[#allocation5 + $0x7d8] sm:$0xff] }
 0x126   : > { %1426 = vmatprep.mubr.f32.mxu0 %v333_v14  ;;  %1612 = vmatpush1.msra.mxu1 %v786_v15  ;;  %v397_v14 = vld [vmem:[%s3098_s10 + $0x2a8] sm:$0xff]  ;;  %v818_v15 = vld [vmem:[#allocation5 + $0x7d0] sm:$0xff] }
 0x127   : > { %1170 = vmatmul.mubr.f32.gmra.mxu1 %v330_v16  ;;  %1613 = vmatprep.subr.mxu1 %v785_v17  ;;  %v394_v16 = vld [vmem:[%s3098_s10 + $0x290] sm:$0xff]  ;;  %v817_v17 = vld [vmem:[#allocation5 + $0x7c8] sm:$0xff] }
 0x128   : > { %1175 = vmatprep.mubr.f32.mxu1 %v339_v18  ;;  %1614 = vmatpush1.msra.mxu1 %v784_v19  ;;  %v403_v18 = vld [vmem:[%s3098_s10 + $0x2d8] sm:$0xff]  ;;  %v816_v19 = vld [vmem:[#allocation5 + $0x7c0] sm:$0xff] }
 0x129   : > { %1427 = vmatmul.mubr.f32.gmra.mxu0 %v332_v20  ;;  %1615 = vmatprep.subr.mxu1 %v783_v21  ;;  %v396_v20 = vld [vmem:[%s3098_s10 + $0x2a0] sm:$0xff]  ;;  %v815_v21 = vld [vmem:[#allocation5 + $0x7b8] sm:$0xff] }
 0x12a   : > { %1432 = vmatprep.mubr.f32.mxu0 %v341_v22  ;;  %1616 = vmatpush1.msra.mxu1 %v782_v23  ;;  %v405_v22 = vld [vmem:[%s3098_s10 + $0x2e8] sm:$0xff]  ;;  %v814_v23 = vld [vmem:[#allocation5 + $0x7b0] sm:$0xff] }
 0x12b   : > { %1176 = vmatmul.mubr.f32.gmra.mxu1 %v338_v24  ;;  %1617 = vmatprep.subr.mxu1 %v781_v25  ;;  %v402_v24 = vld [vmem:[%s3098_s10 + $0x2d0] sm:$0xff]  ;;  %v813_v25 = vld [vmem:[#allocation5 + $0x7a8] sm:$0xff] }
 0x12c   : > { %1181 = vmatprep.mubr.f32.mxu1 %v347_v26  ;;  %1618 = vmatpush1.msra.mxu1 %v780_v27  ;;  %v411_v26 = vld [vmem:[%s3098_s10 + $0x318] sm:$0xff]  ;;  %v812_v27 = vld [vmem:[#allocation5 + $0x7a0] sm:$0xff] }
 0x12d   : > { %1433 = vmatmul.mubr.f32.gmra.mxu0 %v340_v28  ;;  %1619 = vmatprep.subr.mxu1 %v779_v29  ;;  %v404_v28 = vld [vmem:[%s3098_s10 + $0x2e0] sm:$0xff]  ;;  %v811_v29 = vld [vmem:[#allocation5 + $0x798] sm:$0xff] }
 0x12e   : > { %1438 = vmatprep.mubr.f32.mxu0 %v349_v30  ;;  %1620 = vmatpush1.msra.mxu1 %v778_v31  ;;  %v413_v30 = vld [vmem:[%s3098_s10 + $0x328] sm:$0xff]  ;;  %v810_v31 = vld [vmem:[#allocation5 + $0x790] sm:$0xff] }
 0x12f   : > { %1182 = vmatmul.mubr.f32.gmra.mxu1 %v346_v32  ;;  %1621 = vmatprep.subr.mxu1 %v777_v33  ;;  %v410_v32 = vld [vmem:[%s3098_s10 + $0x310] sm:$0xff]  ;;  %v809_v33 = vld [vmem:[#allocation5 + $0x788] sm:$0xff] }
 0x130   : > { %1187 = vmatprep.mubr.f32.mxu1 %v355_v34  ;;  %1622 = vmatpush1.msra.mxu1 %v776_v35  ;;  %v419_v34 = vld [vmem:[%s3098_s10 + $0x358] sm:$0xff]  ;;  %v808_v35 = vld [vmem:[#allocation5 + $0x780] sm:$0xff] }
 0x131   : > { %1439 = vmatmul.mubr.f32.gmra.mxu0 %v348_v36  ;;  %1623 = vmatprep.subr.mxu1 %v775_v37  ;;  %v412_v36 = vld [vmem:[%s3098_s10 + $0x320] sm:$0xff]  ;;  %v807_v37 = vld [vmem:[#allocation5 + $0x778] sm:$0xff] }
 0x132   : > { %1444 = vmatprep.mubr.f32.mxu0 %v357_v38  ;;  %1624 = vmatpush1.msra.mxu1 %v774_v39  ;;  %v421_v38 = vld [vmem:[%s3098_s10 + $0x368] sm:$0xff]  ;;  %v806_v39 = vld [vmem:[#allocation5 + $0x770] sm:$0xff] }
 0x133   : > { %1188 = vmatmul.mubr.f32.gmra.mxu1 %v354_v40  ;;  %1625 = vmatprep.subr.mxu1 %v773_v41  ;;  %v418_v40 = vld [vmem:[%s3098_s10 + $0x350] sm:$0xff]  ;;  %v805_v41 = vld [vmem:[#allocation5 + $0x768] sm:$0xff] }
 0x134   : > { %1193 = vmatprep.mubr.f32.mxu1 %v363_v42  ;;  %1626 = vmatpush1.msra.mxu1 %v772_v43  ;;  %v427_v42 = vld [vmem:[%s3098_s10 + $0x398] sm:$0xff]  ;;  %v804_v43 = vld [vmem:[#allocation5 + $0x760] sm:$0xff] }
 0x135   : > { %1445 = vmatmul.mubr.f32.gmra.mxu0 %v356_v44  ;;  %1627 = vmatprep.subr.mxu1 %v771_v45  ;;  %v420_v44 = vld [vmem:[%s3098_s10 + $0x360] sm:$0xff]  ;;  %v803_v45 = vld [vmem:[#allocation5 + $0x758] sm:$0xff] }
 0x136   : > { %1450 = vmatprep.mubr.f32.mxu0 %v365_v46  ;;  %1628 = vmatpush1.msra.mxu1 %v770_v47  ;;  %v429_v46 = vld [vmem:[%s3098_s10 + $0x3a8] sm:$0xff]  ;;  %v802_v47 = vld [vmem:[#allocation5 + $0x750] sm:$0xff] }
 0x137   : > { %1194 = vmatmul.mubr.f32.gmra.mxu1 %v362_v48  ;;  %1629 = vmatprep.subr.mxu1 %v769_v49  ;;  %v426_v48 = vld [vmem:[%s3098_s10 + $0x390] sm:$0xff]  ;;  %v801_v49 = vld [vmem:[#allocation5 + $0x748] sm:$0xff] }
 0x138   : > { %1199 = vmatprep.mubr.f32.mxu1 %v371_v50  ;;  %1630 = vmatpush1.msra.mxu1 %v768_v51  ;;  %v435_v50 = vld [vmem:[%s3098_s10 + $0x3d8] sm:$0xff]  ;;  %v800_v51 = vld [vmem:[#allocation5 + $0x740] sm:$0xff] }
 0x139   : > { %1451 = vmatmul.mubr.f32.gmra.mxu0 %v364_v52  ;;  %1631 = vmatprep.subr.mxu1 %v767_v53  ;;  %v428_v52 = vld [vmem:[%s3098_s10 + $0x3a0] sm:$0xff]  ;;  %v799_v53 = vld [vmem:[#allocation5 + $0x738] sm:$0xff] }
 0x13a   : > { %1456 = vmatprep.mubr.f32.mxu0 %v373_v54  ;;  %1632 = vmatpush1.msra.mxu1 %v766_v55  ;;  %v437_v54 = vld [vmem:[%s3098_s10 + $0x3e8] sm:$0xff]  ;;  %v798_v55 = vld [vmem:[#allocation5 + $0x730] sm:$0xff] }
 0x13b   : > { %1200 = vmatmul.mubr.f32.gmra.mxu1 %v370_v56  ;;  %1633 = vmatprep.subr.mxu1 %v765_v57  ;;  %v434_v56 = vld [vmem:[%s3098_s10 + $0x3d0] sm:$0xff]  ;;  %v797_v57 = vld [vmem:[#allocation5 + $0x728] sm:$0xff] }
 0x13c   : > { %1205 = vmatprep.mubr.f32.mxu1 %v379_v58  ;;  %1634 = vmatpush1.msra.mxu1 %v764_v59  ;;  %v443_v58 = vld [vmem:[%s3098_s10 + $0x418] sm:$0xff]  ;;  %v796_v59 = vld [vmem:[#allocation5 + $0x720] sm:$0xff] }
 0x13d   : > { %1457 = vmatmul.mubr.f32.gmra.mxu0 %v372_v60  ;;  %1635 = vmatprep.subr.mxu1 %v763_v61  ;;  %v436_v60 = vld [vmem:[%s3098_s10 + $0x3e0] sm:$0xff]  ;;  %v795_v61 = vld [vmem:[#allocation5 + $0x718] sm:$0xff] }
 0x13e   : > { %1462 = vmatprep.mubr.f32.mxu0 %v381_v62  ;;  %1636 = vmatpush1.msra.mxu1 %v762_v63  ;;  %v445_v62 = vld [vmem:[%s3098_s10 + $0x428] sm:$0xff]  ;;  %v794_v63 = vld [vmem:[#allocation5 + $0x710] sm:$0xff] }
 0x13f   : > { %1206 = vmatmul.mubr.f32.gmra.mxu1 %v378_v0  ;;  %1637 = vmatprep.subr.mxu1 %v761_v1  ;;  %v442_v0 = vld [vmem:[%s3098_s10 + $0x410] sm:$0xff]  ;;  %v793_v1 = vld [vmem:[#allocation5 + $0x708] sm:$0xff] }
 0x140   : > { %1211 = vmatprep.mubr.f32.mxu1 %v387_v2  ;;  %1638 = vmatpush1.msra.mxu1 %v760_v3  ;;  %v451_v2 = vld [vmem:[%s3098_s10 + $0x458] sm:$0xff]  ;;  %v792_v3 = vld [vmem:[#allocation5 + $0x700] sm:$0xff] }
 0x141   : > { %1463 = vmatmul.mubr.f32.gmra.mxu0 %v380_v4  ;;  %1639 = vmatprep.subr.mxu1 %v823_v5  ;;  %v444_v4 = vld [vmem:[%s3098_s10 + $0x420] sm:$0xff]  ;;  %v453_v5 = vld [vmem:[%s3098_s10 + $0x468] sm:$0xff] }
 0x142   : > { %1468 = vmatprep.mubr.f32.mxu0 %v389_v6  ;;  %1640 = vmatpush2.msra.mxu1 %v822_v7  ;;  %v450_v6 = vld [vmem:[%s3098_s10 + $0x450] sm:$0xff]  ;;  %v459_v7 = vld [vmem:[%s3098_s10 + $0x498] sm:$0xff] }
 0x143   : > { %1212 = vmatmul.mubr.f32.gmra.mxu1 %v386_v8  ;;  %1641 = vmatprep.subr.mxu1 %v821_v9  ;;  %v452_v8 = vld [vmem:[%s3098_s10 + $0x460] sm:$0xff]  ;;  %v461_v9 = vld [vmem:[%s3098_s10 + $0x4a8] sm:$0xff] }
 0x144   : > { %1217 = vmatprep.mubr.f32.mxu1 %v395_v10  ;;  %1642 = vmatpush2.msra.mxu1 %v820_v11  ;;  %v458_v10 = vld [vmem:[%s3098_s10 + $0x490] sm:$0xff]  ;;  %v467_v11 = vld [vmem:[%s3098_s10 + $0x4d8] sm:$0xff] }
 0x145   : > { %1469 = vmatmul.mubr.f32.gmra.mxu0 %v388_v12  ;;  %1643 = vmatprep.subr.mxu1 %v819_v13  ;;  %v460_v12 = vld [vmem:[%s3098_s10 + $0x4a0] sm:$0xff]  ;;  %v469_v13 = vld [vmem:[%s3098_s10 + $0x4e8] sm:$0xff] }
 0x146   : > { %1474 = vmatprep.mubr.f32.mxu0 %v397_v14  ;;  %1644 = vmatpush2.msra.mxu1 %v818_v15  ;;  %v466_v14 = vld [vmem:[%s3098_s10 + $0x4d0] sm:$0xff]  ;;  %v475_v15 = vld [vmem:[%s3098_s10 + $0x518] sm:$0xff] }
 0x147   : > { %1218 = vmatmul.mubr.f32.gmra.mxu1 %v394_v16  ;;  %1645 = vmatprep.subr.mxu1 %v817_v17  ;;  %v468_v16 = vld [vmem:[%s3098_s10 + $0x4e0] sm:$0xff]  ;;  %v477_v17 = vld [vmem:[%s3098_s10 + $0x528] sm:$0xff] }
 0x148   : > { %1223 = vmatprep.mubr.f32.mxu1 %v403_v18  ;;  %1646 = vmatpush2.msra.mxu1 %v816_v19  ;;  %v474_v18 = vld [vmem:[%s3098_s10 + $0x510] sm:$0xff]  ;;  %v483_v19 = vld [vmem:[%s3098_s10 + $0x558] sm:$0xff] }
 0x149   : > { %1475 = vmatmul.mubr.f32.gmra.mxu0 %v396_v20  ;;  %1647 = vmatprep.subr.mxu1 %v815_v21  ;;  %v476_v20 = vld [vmem:[%s3098_s10 + $0x520] sm:$0xff]  ;;  %v485_v21 = vld [vmem:[%s3098_s10 + $0x568] sm:$0xff] }
 0x14a   : > { %1480 = vmatprep.mubr.f32.mxu0 %v405_v22  ;;  %1648 = vmatpush2.msra.mxu1 %v814_v23  ;;  %v482_v22 = vld [vmem:[%s3098_s10 + $0x550] sm:$0xff]  ;;  %v491_v23 = vld [vmem:[%s3098_s10 + $0x598] sm:$0xff] }
 0x14b   : > { %1224 = vmatmul.mubr.f32.gmra.mxu1 %v402_v24  ;;  %1649 = vmatprep.subr.mxu1 %v813_v25  ;;  %v484_v24 = vld [vmem:[%s3098_s10 + $0x560] sm:$0xff]  ;;  %v493_v25 = vld [vmem:[%s3098_s10 + $0x5a8] sm:$0xff] }
 0x14c   : > { %1229 = vmatprep.mubr.f32.mxu1 %v411_v26  ;;  %1650 = vmatpush2.msra.mxu1 %v812_v27  ;;  %v490_v26 = vld [vmem:[%s3098_s10 + $0x590] sm:$0xff]  ;;  %v1943_v27 = vld [vmem:[#allocation8 + $0x78] sm:$0xff] }
 0x14d   : > { %1481 = vmatmul.mubr.f32.gmra.mxu0 %v404_v28  ;;  %1651 = vmatprep.subr.mxu1 %v811_v29  ;;  %v499_v28 = vld [vmem:[%s3098_s10 + $0x5d8] sm:$0xff]  ;;  %v4101_v29 = vmov 0.0  }
 0x14e   : > { %1486 = vmatprep.mubr.f32.mxu0 %v413_v30  ;;  %1652 = vmatpush2.msra.mxu1 %v810_v31  ;;  %v492_v30 = vld [vmem:[%s3098_s10 + $0x5a0] sm:$0xff]  ;;  %v501_v31 = vld [vmem:[%s3098_s10 + $0x5e8] sm:$0xff] }
 0x14f   : > { %1230 = vmatmul.mubr.f32.gmra.mxu1 %v410_v32  ;;  %1653 = vmatprep.subr.mxu1 %v809_v33  ;;  %v498_v32 = vld [vmem:[%s3098_s10 + $0x5d0] sm:$0xff] }
 0x150   : > { %1235 = vmatprep.mubr.f32.mxu1 %v419_v34  ;;  %1654 = vmatpush2.msra.mxu1 %v808_v35  ;;  %v1942_v33 = vld [vmem:[#allocation8 + $0x70] sm:$0xff]  ;;  %v500_v35 = vld [vmem:[%s3098_s10 + $0x5e0] sm:$0xff] }
 0x151   : > { %1487 = vmatmul.mubr.f32.gmra.mxu0 %v412_v36  ;;  %1655 = vmatprep.subr.mxu1 %v807_v37  ;;  %v507_v34 = vld [vmem:[%s3098_s10 + $0x618] sm:$0xff]  ;;  %v509_v36 = vld [vmem:[%s3098_s10 + $0x628] sm:$0xff]  ;;  %v506_v37 = vld [vmem:[%s3098_s10 + $0x610] sm:$0xff] }
 0x152   : > { %1492 = vmatprep.mubr.f32.mxu0 %v421_v38  ;;  %1656 = vmatpush2.msra.mxu1 %v806_v39  ;;  %v1941_v38 = vld [vmem:[#allocation8 + $0x68] sm:$0xff]  ;;  %v515_v39 = vld [vmem:[%s3098_s10 + $0x658] sm:$0xff] }
 0x153   : > { %1236 = vmatmul.mubr.f32.gmra.mxu1 %v418_v40  ;;  %1657 = vmatprep.subr.mxu1 %v805_v41  ;;  %v508_v40 = vld [vmem:[%s3098_s10 + $0x620] sm:$0xff]  ;;  %v517_v41 = vld [vmem:[%s3098_s10 + $0x668] sm:$0xff] }
 0x154   : > { %1241 = vmatprep.mubr.f32.mxu1 %v427_v42  ;;  %1658 = vmatpush2.msra.mxu1 %v804_v43  ;;  %v514_v43 = vld [vmem:[%s3098_s10 + $0x650] sm:$0xff] }
 0x155   : > { %1493 = vmatmul.mubr.f32.gmra.mxu0 %v420_v44  ;;  %1659 = vmatprep.subr.mxu1 %v803_v45  ;;  %v1940_v44 = vld [vmem:[#allocation8 + $0x60] sm:$0xff]  ;;  %v523_v45 = vld [vmem:[%s3098_s10 + $0x698] sm:$0xff] }
 0x156   : > { %1498 = vmatprep.mubr.f32.mxu0 %v429_v46  ;;  %1660 = vmatpush2.msra.mxu1 %v802_v47 }
 0x157   : > { %1242 = vmatmul.mubr.f32.gmra.mxu1 %v426_v48  ;;  %1661 = vmatprep.subr.mxu1 %v801_v49  ;;  %v516_v48 = vld [vmem:[%s3098_s10 + $0x660] sm:$0xff]  ;;  %v525_v49 = vld [vmem:[%s3098_s10 + $0x6a8] sm:$0xff] }
 0x158   : > { %1247 = vmatprep.mubr.f32.mxu1 %v435_v50  ;;  %1662 = vmatpush2.msra.mxu1 %v800_v51  ;;  %v522_v50 = vld [vmem:[%s3098_s10 + $0x690] sm:$0xff] }
 0x159   : > { %1499 = vmatmul.mubr.f32.gmra.mxu0 %v428_v52  ;;  %1663 = vmatprep.subr.mxu1 %v799_v53  ;;  %v1939_v53 = vld [vmem:[#allocation8 + $0x58] sm:$0xff] }
 0x15a   : > { %1504 = vmatprep.mubr.f32.mxu0 %v437_v54  ;;  %1664 = vmatpush2.msra.mxu1 %v798_v55  ;;  %v531_v54 = vld [vmem:[%s3098_s10 + $0x6d8] sm:$0xff]  ;;  %v524_v55 = vld [vmem:[%s3098_s10 + $0x6a0] sm:$0xff] }
 0x15b   : > { %1248 = vmatmul.mubr.f32.gmra.mxu1 %v434_v56  ;;  %1665 = vmatprep.subr.mxu1 %v797_v57  ;;  %v533_v57 = vld [vmem:[%s3098_s10 + $0x6e8] sm:$0xff] }
 0x15c   : > { %1253 = vmatprep.mubr.f32.mxu1 %v443_v58  ;;  %1666 = vmatpush2.msra.mxu1 %v796_v59  ;;  %v530_v58 = vld [vmem:[%s3098_s10 + $0x6d0] sm:$0xff] }
 0x15d   : > { %1505 = vmatmul.mubr.f32.gmra.mxu0 %v436_v60  ;;  %1667 = vmatprep.subr.mxu1 %v795_v61  ;;  %v1938_v60 = vld [vmem:[#allocation8 + $0x50] sm:$0xff] }
 0x15e   : > { %1510 = vmatprep.mubr.f32.mxu0 %v445_v62  ;;  %1668 = vmatpush2.msra.mxu1 %v794_v63  ;;  %v539_v61 = vld [vmem:[%s3098_s10 + $0x718] sm:$0xff]  ;;  %v532_v62 = vld [vmem:[%s3098_s10 + $0x6e0] sm:$0xff] }
 0x15f   : > { %1254 = vmatmul.mubr.f32.gmra.mxu1 %v442_v0  ;;  %1669 = vmatprep.subr.mxu1 %v793_v1  ;;  %v541_v1 = vld [vmem:[%s3098_s10 + $0x728] sm:$0xff] }
 0x160   : > { %1259 = vmatprep.mubr.f32.mxu1 %v451_v2  ;;  %1670 = vmatpush2.msra.mxu1 %v792_v3  ;;  %v538_v2 = vld [vmem:[%s3098_s10 + $0x710] sm:$0xff] }
 0x161   : > { %1511 = vmatmul.mubr.f32.gmra.mxu0 %v444_v4  ;;  %1967 = vmatprep.subr.mxu0 %v4101_v29  ;;  %v1937_v4 = vld [vmem:[#allocation8 + $0x48] sm:$0xff] }
 0x162   : > { %1516 = vmatprep.mubr.f32.mxu0 %v453_v5  ;;  %1968 = vmatpush1.msra.mxu0 %v1943_v27  ;;  %v547_v5 = vld [vmem:[%s3098_s10 + $0x758] sm:$0xff] }
 0x163   : > { %1260 = vmatmul.mubr.f32.gmra.mxu1 %v450_v6  ;;  %1969 = vmatprep.subr.mxu0 %v4101_v29  ;;  %v540_v6 = vld [vmem:[%s3098_s10 + $0x720] sm:$0xff]  ;;  %v1934_v27 = vld [vmem:[#allocation8 + $0x30] sm:$0xff] }
 0x164   : > { %1265 = vmatprep.mubr.f32.mxu1 %v459_v7  ;;  %1970 = vmatpush1.msra.mxu0 %v1942_v33 }
 0x165   : > { %1517 = vmatmul.mubr.f32.gmra.mxu0 %v452_v8  ;;  %1971 = vmatprep.subr.mxu0 %v4101_v29  ;;  %v549_v8 = vld [vmem:[%s3098_s10 + $0x768] sm:$0xff] }
 0x166   : > { %1522 = vmatprep.mubr.f32.mxu0 %v461_v9  ;;  %1972 = vmatpush1.msra.mxu0 %v1941_v38  ;;  %v546_v9 = vld [vmem:[%s3098_s10 + $0x750] sm:$0xff] }
 0x167   : > { %1266 = vmatmul.mubr.f32.gmra.mxu1 %v458_v10  ;;  %1973 = vmatprep.subr.mxu0 %v4101_v29  ;;  %v326_v38 = vld [vmem:[%s3098_s10 + $0x70] sm:$0xff] }
 0x168   : > { %1271 = vmatprep.mubr.f32.mxu1 %v467_v11  ;;  %1974 = vmatpush1.msra.mxu0 %v1940_v44 }
 0x169   : > { %1523 = vmatmul.mubr.f32.gmra.mxu0 %v460_v12  ;;  %1975 = vmatprep.subr.mxu0 %v4101_v29  ;;  %v1936_v12 = vld [vmem:[#allocation8 + $0x40] sm:$0xff] }
 0x16a   : > { %1528 = vmatprep.mubr.f32.mxu0 %v469_v13  ;;  %1976 = vmatpush1.msra.mxu0 %v1939_v53  ;;  %v555_v13 = vld [vmem:[%s3098_s10 + $0x798] sm:$0xff] }
 0x16b   : > { %1272 = vmatmul.mubr.f32.gmra.mxu1 %v466_v14  ;;  %1977 = vmatprep.subr.mxu0 %v4101_v29  ;;  %v548_v14 = vld [vmem:[%s3098_s10 + $0x760] sm:$0xff] }
 0x16c   : > { %1277 = vmatprep.mubr.f32.mxu1 %v475_v15  ;;  %1978 = vmatpush1.msra.mxu0 %v1938_v60  ;;  %v351_v60 = vld [vmem:[%s3098_s10 + $0x138] sm:$0xff] }
 0x16d   : > { %1529 = vmatmul.mubr.f32.gmra.mxu0 %v468_v16  ;;  %1979 = vmatprep.subr.mxu0 %v4101_v29  ;;  %v557_v16 = vld [vmem:[%s3098_s10 + $0x7a8] sm:$0xff] }
 0x16e   : > { %1534 = vmatprep.mubr.f32.mxu0 %v477_v17  ;;  %1980 = vmatpush1.msra.mxu0 %v1937_v4  ;;  %v554_v17 = vld [vmem:[%s3098_s10 + $0x790] sm:$0xff]  ;;  %v359_v4 = vld [vmem:[%s3098_s10 + $0x178] sm:$0xff] }
 0x16f   : > { %1278 = vmatmul.mubr.f32.gmra.mxu1 %v474_v18  ;;  %1981 = vmatprep.subr.mxu0 %v4101_v29 }
 0x170   : > { %1283 = vmatprep.mubr.f32.mxu1 %v483_v19  ;;  %1982 = vmatpush1.msra.mxu0 %v1936_v12  ;;  %v1935_v19 = vld [vmem:[#allocation8 + $0x38] sm:$0xff]  ;;  %v1928_v12 = vld [vmem:[#allocation8] sm:$0xff] }
 0x171   : > { %1535 = vmatmul.mubr.f32.gmra.mxu0 %v476_v20  ;;  %1983 = vmatprep.subr.mxu0 %v4101_v29  ;;  %v563_v20 = vld [vmem:[%s3098_s10 + $0x7d8] sm:$0xff] }
 0x172   : > { %1540 = vmatprep.mubr.f32.mxu0 %v485_v21  ;;  %v556_v21 = vld [vmem:[%s3098_s10 + $0x7a0] sm:$0xff]  ;;  %1984 = vmatpush1.msra.mxu0 %v1935_v19 }
 0x173   : > { %1284 = vmatmul.mubr.f32.gmra.mxu1 %v482_v22  ;;  %1985 = vmatprep.subr.mxu0 %v4101_v29 }
 0x174   : > { %1289 = vmatprep.mubr.f32.mxu1 %v491_v23  ;;  %1986 = vmatpush1.msra.mxu0 %v1934_v27 }
 0x175   : > { %1541 = vmatmul.mubr.f32.gmra.mxu0 %v484_v24  ;;  %v565_v24 = vld [vmem:[%s3098_s10 + $0x7e8] sm:$0xff]  ;;  %1987 = vmatprep.subr.mxu0 %v4101_v29 }
 0x176   : > { %1546 = vmatprep.mubr.f32.mxu0 %v493_v25  ;;  %v562_v25 = vld [vmem:[%s3098_s10 + $0x7d0] sm:$0xff] }
 0x177   : > { %1290 = vmatmul.mubr.f32.gmra.mxu1 %v490_v26 }
 0x178   : > { %1295 = vmatprep.mubr.f32.mxu1 %v499_v28  ;;  %v319_v28 = vld [vmem:[%s3098_s10 + $0x38] sm:$0xff] }
 0x179   : > { %1547 = vmatmul.mubr.f32.gmra.mxu0 %v492_v30  ;;  %v564_v30 = vld [vmem:[%s3098_s10 + $0x7e0] sm:$0xff] }
 0x17a   : > { %1552 = vmatprep.mubr.f32.mxu0 %v501_v31 }
 0x17b   : > { %1296 = vmatmul.mubr.f32.gmra.mxu1 %v498_v32  ;;  %v318_v32 = vld [vmem:[%s3098_s10 + $0x30] sm:$0xff] }
 0x17c   : > { %1301 = vmatprep.mubr.f32.mxu1 %v507_v34 }
 0x17d   : > { %1553 = vmatmul.mubr.f32.gmra.mxu0 %v500_v35  ;;  %v1933_v35 = vld [vmem:[#allocation8 + $0x28] sm:$0xff] }
 0x17e   : > { %1558 = vmatprep.mubr.f32.mxu0 %v509_v36  ;;  %v327_v36 = vld [vmem:[%s3098_s10 + $0x78] sm:$0xff]  ;;  %1988 = vmatpush1.msra.mxu0 %v1933_v35 }
 0x17f   : > { %1302 = vmatmul.mubr.f32.gmra.mxu1 %v506_v37  ;;  %v3281_v42 = vpop.f32.mrf.mxu1  ;;  %1989 = vmatprep.subr.mxu0 %v4101_v29 }
 0x180   : > { %1307 = vmatprep.mubr.f32.mxu1 %v515_v39 }
 0x181   : > { %1559 = vmatmul.mubr.f32.gmra.mxu0 %v508_v40  ;;  %v3286_v46 = vpop.f32.mrf.mxu0  ;;  %v3288_v47 = vpop.f32.mrf.mxu1  ;;  %v1932_v40 = vld [vmem:[#allocation8 + $0x20] sm:$0xff] }
 0x182   : > { %1564 = vmatprep.mubr.f32.mxu0 %v517_v41  ;;  %v335_v41 = vld [vmem:[%s3098_s10 + $0xb8] sm:$0xff]  ;;  %1990 = vmatpush1.msra.mxu0 %v1932_v40  ;;  %v1957_v40 = vld [vmem:[#allocation8 + $0xe8] sm:$0xff] }
 0x183   : > { %1308 = vmatmul.mubr.f32.gmra.mxu1 %v514_v43  ;;  %v3294_v51 = vpop.f32.mrf.mxu0  ;;  %1991 = vmatprep.subr.mxu0 %v4101_v29 }
 0x184   : > { %1313 = vmatprep.mubr.f32.mxu1 %v523_v45  ;;  %v3296_v52 = vpop.f32.mrf.mxu1  ;;  %v334_v45 = vld [vmem:[%s3098_s10 + $0xb0] sm:$0xff] }
 0x185   : > { %1565 = vmatmul.mubr.f32.gmra.mxu0 %v516_v48 }
 0x186   : > { %1570 = vmatprep.mubr.f32.mxu0 %v525_v49  ;;  %v3300_v56 = vpop.f32.mrf.mxu1  ;;  %v1931_v49 = vld [vmem:[#allocation8 + $0x18] sm:$0xff] }
 0x187   : > { %1314 = vmatmul.mubr.f32.gmra.mxu1 %v522_v50  ;;  %v343_v50 = vld [vmem:[%s3098_s10 + $0xf8] sm:$0xff]  ;;  %1992 = vmatpush1.msra.mxu0 %v1931_v49  ;;  %v390_v49 = vld [vmem:[%s3098_s10 + $0x270] sm:$0xff] }
 0x188   : > { %1319 = vmatprep.mubr.f32.mxu1 %v531_v54  ;;  %v3305_v59 = vpop.f32.mrf.mxu0  ;;  %1993 = vmatprep.subr.mxu0 %v4101_v29  ;;  %v342_v54 = vld [vmem:[%s3098_s10 + $0xf0] sm:$0xff] }
 0x189   : > { %1571 = vmatmul.mubr.f32.gmra.mxu0 %v524_v55 }
 0x18a   : > { %1576 = vmatprep.mubr.f32.mxu0 %v533_v57  ;;  %v3309_v63 = vpop.f32.mrf.mxu0  ;;  %v3311_v0 = vpop.f32.mrf.mxu1 }
 0x18b   : > { %1320 = vmatmul.mubr.f32.gmra.mxu1 %v530_v58  ;;  %v1930_v58 = vld [vmem:[#allocation8 + $0x10] sm:$0xff] }
 0x18c   : > { %1325 = vmatprep.mubr.f32.mxu1 %v539_v61  ;;  %v3316_v3 = vpop.f32.mrf.mxu1  ;;  %1994 = vmatpush1.msra.mxu0 %v1930_v58  ;;  %v1956_v58 = vld [vmem:[#allocation8 + $0xe0] sm:$0xff] }
 0x18d   : > { %1577 = vmatmul.mubr.f32.gmra.mxu0 %v532_v62  ;;  %1995 = vmatprep.subr.mxu0 %v4101_v29  ;;  %v350_v62 = vld [vmem:[%s3098_s10 + $0x130] sm:$0xff] }
 0x18e   : > { %1582 = vmatprep.mubr.f32.mxu0 %v541_v1  ;;  %v3320_v7 = vpop.f32.mrf.mxu0 }
 0x18f   : > { %1326 = vmatmul.mubr.f32.gmra.mxu1 %v538_v2  ;;  %v1929_v2 = vld [vmem:[#allocation8 + $0x8] sm:$0xff] }
 0x190   : > { %1331 = vmatprep.mubr.f32.mxu1 %v547_v5  ;;  %v3325_v10 = vpop.f32.mrf.mxu0  ;;  %v3327_v11 = vpop.f32.mrf.mxu1  ;;  %1996 = vmatpush1.msra.mxu0 %v1929_v2  ;;  %v398_v2 = vld [vmem:[%s3098_s10 + $0x2b0] sm:$0xff] }
 0x191   : > { %1583 = vmatmul.mubr.f32.gmra.mxu0 %v540_v6  ;;  %1997 = vmatprep.subr.mxu0 %v4101_v29 }
 0x192   : > { %1588 = vmatprep.mubr.f32.mxu0 %v549_v8  ;;  %v3331_v15 = vpop.f32.mrf.mxu1  ;;  %v358_v8 = vld [vmem:[%s3098_s10 + $0x170] sm:$0xff]  ;;  %1998 = vmatpush1.msra.mxu0 %v1928_v12  ;;  %v407_v12 = vld [vmem:[%s3098_s10 + $0x2f8] sm:$0xff] }
 0x193   : > { %1332 = vmatmul.mubr.f32.gmra.mxu1 %v546_v9  ;;  %1999 = vmatprep.subr.mxu0 %v4101_v29 }
 0x194   : > { %1337 = vmatprep.mubr.f32.mxu1 %v555_v13  ;;  %v3336_v18 = vpop.f32.mrf.mxu0  ;;  %v367_v13 = vld [vmem:[%s3098_s10 + $0x1b8] sm:$0xff] }
 0x195   : > { %1589 = vmatmul.mubr.f32.gmra.mxu0 %v548_v14 }
 0x196   : > { %1594 = vmatprep.mubr.f32.mxu0 %v557_v16  ;;  %v3340_v22 = vpop.f32.mrf.mxu0  ;;  %v3342_v23 = vpop.f32.mrf.mxu1  ;;  %v366_v16 = vld [vmem:[%s3098_s10 + $0x1b0] sm:$0xff] }
 0x197   : > { %1338 = vmatmul.mubr.f32.gmra.mxu1 %v554_v17 }
 0x198   : > { %1343 = vmatprep.mubr.f32.mxu1 %v563_v20  ;;  %v3347_v26 = vpop.f32.mrf.mxu1  ;;  %v1959_v20 = vld [vmem:[#allocation8 + $0xf8] sm:$0xff] }
 0x199   : > { %1595 = vmatmul.mubr.f32.gmra.mxu0 %v556_v21  ;;  %v375_v21 = vld [vmem:[%s3098_s10 + $0x1f8] sm:$0xff] }
 0x19a   : > { %1600 = vmatprep.mubr.f32.mxu0 %v565_v24  ;;  %v3351_v31 = vpop.f32.mrf.mxu0  ;;  %2000 = vmatpush2.msra.mxu0 %v1959_v20  ;;  %v406_v20 = vld [vmem:[%s3098_s10 + $0x2f0] sm:$0xff] }
 0x19b   : > { %4114 = vst [vmem:[#allocation16_spill] sm:$0xff] %v3351_v31  ;;  %1344 = vmatmul.mubr.f32.gmra.mxu1 %v562_v25  ;;  %2001 = vmatprep.subr.mxu0 %v4101_v29  ;;  %v374_v25 = vld [vmem:[%s3098_s10 + $0x1f0] sm:$0xff] }
 0x19c   : > { %1671 = vmatprep.mubr.f32.mxu1 %v319_v28  ;;  %v3355_v33 = vpop.f32.mrf.mxu0  ;;  %v3357_v34 = vpop.f32.mrf.mxu1  ;;  %v1958_v28 = vld [vmem:[#allocation8 + $0xf0] sm:$0xff] }
 0x19d   : > { %4115 = vst [vmem:[#allocation17_spill] sm:$0xff] %v3355_v33  ;;  %1601 = vmatmul.mubr.f32.gmra.mxu0 %v564_v30  ;;  %v383_v30 = vld [vmem:[%s3098_s10 + $0x238] sm:$0xff] }
 0x19e   : > { %v3360_v37 = vpop.f32.mrf.mxu1  ;;  %2002 = vmatpush2.msra.mxu0 %v1958_v28  ;;  %v415_v28 = vld [vmem:[%s3098_s10 + $0x338] sm:$0xff] }
 0x19f   : > { %1672 = vmatmul.mubr.f32.vlgmr.msra.gmra.mxu1 %v318_v32  ;;  %2003 = vmatprep.subr.mxu0 %v4101_v29 }
 0x1a0   : > { %1677 = vmatprep.mubr.f32.mxu1 %v327_v36  ;;  %v3364_v39 = vpop.f32.mrf.mxu0  ;;  %v382_v36 = vld [vmem:[%s3098_s10 + $0x230] sm:$0xff]  ;;  %2004 = vmatpush2.msra.mxu0 %v1957_v40 }
 0x1a1   : > { %4116 = vst [vmem:[#allocation18_spill] sm:$0xff] %v3364_v39  ;;  %2005 = vmatprep.subr.mxu0 %v4101_v29  ;;  %v495_v39 = vld [vmem:[%s3098_s10 + $0x5b8] sm:$0xff] }
 0x1a2   : > { %v3367_v43 = vpop.f32.mrf.mxu0  ;;  %v3369_v44 = vpop.f32.mrf.mxu1  ;;  %2006 = vmatpush2.msra.mxu0 %v1956_v58  ;;  %v423_v58 = vld [vmem:[%s3098_s10 + $0x378] sm:$0xff] }
 0x1a3   : > { %4117 = vst [vmem:[#allocation19_spill] sm:$0xff] %v3367_v43  ;;  %1678 = vmatmul.mubr.f32.gmra.mxu1 %v326_v38  ;;  %2007 = vmatprep.subr.mxu0 %v4101_v29 }
 0x1a4   : > { %1683 = vmatprep.mubr.f32.mxu1 %v335_v41  ;;  %v3373_v48 = vpop.f32.mrf.mxu1  ;;  %v391_v41 = vld [vmem:[%s3098_s10 + $0x278] sm:$0xff] }
 0x1a6   : > { %v3376_v53 = vpop.f32.mrf.mxu0 }
 0x1a7   : > { %4118 = vst [vmem:[#allocation20_spill] sm:$0xff] %v3376_v53  ;;  %1684 = vmatmul.mubr.f32.gmra.mxu1 %v334_v45  ;;  %v1945_v53 = vld [vmem:[#allocation8 + $0x88] sm:$0xff] }
 0x1a8   : > { %1689 = vmatprep.mubr.f32.mxu1 %v343_v50  ;;  %v3380_v55 = vpop.f32.mrf.mxu0  ;;  %v3382_v57 = vpop.f32.mrf.mxu1 }
 0x1a9   : > { %4119 = vst [vmem:[#allocation21_spill] sm:$0xff] %v3380_v55  ;;  %v487_v55 = vld [vmem:[%s3098_s10 + $0x578] sm:$0xff] }
 0x1aa   : > { %v3385_v61 = vpop.f32.mrf.mxu1 }
 0x1ab   : > { %1690 = vmatmul.mubr.f32.gmra.mxu1 %v342_v54 }
 0x1ac   : > { %1695 = vmatprep.mubr.f32.mxu1 %v351_v60  ;;  %v3389_v1 = vpop.f32.mrf.mxu0  ;;  %v399_v60 = vld [vmem:[%s3098_s10 + $0x2b8] sm:$0xff] }
 0x1ad   : > { %4120 = vst [vmem:[#allocation22_spill] sm:$0xff] %v3389_v1 }
 0x1ae   : > { %v3392_v5 = vpop.f32.mrf.mxu0  ;;  %v3394_v6 = vpop.f32.mrf.mxu1 }
 0x1af   : > { %4121 = vst [vmem:[#allocation23_spill] sm:$0xff] %v3392_v5  ;;  %1696 = vmatmul.mubr.f32.gmra.mxu1 %v350_v62  ;;  %v1946_v5 = vld [vmem:[#allocation8 + $0x90] sm:$0xff] }
 0x1b0   : > { %1701 = vmatprep.mubr.f32.mxu1 %v359_v4  ;;  %v3398_v9 = vpop.f32.mrf.mxu1 }
 0x1b2   : > { %v3401_v14 = vpop.f32.mrf.mxu0 }
 0x1b3   : > { %4122 = vst [vmem:[#allocation24_spill] sm:$0xff] %v3401_v14  ;;  %1702 = vmatmul.mubr.f32.gmra.mxu1 %v358_v8  ;;  %v1955_v8 = vld [vmem:[#allocation8 + $0xd8] sm:$0xff] }
 0x1b4   : > { %1707 = vmatprep.mubr.f32.mxu1 %v367_v13  ;;  %v3405_v17 = vpop.f32.mrf.mxu0  ;;  %v3407_v19 = vpop.f32.mrf.mxu1  ;;  %2008 = vmatpush2.msra.mxu0 %v1955_v8  ;;  %v479_v14 = vld [vmem:[%s3098_s10 + $0x538] sm:$0xff] }
 0x1b5   : > { %4123 = vst [vmem:[#allocation25_spill] sm:$0xff] %v3405_v17  ;;  %2009 = vmatprep.subr.mxu0 %v4101_v29 }
 0x1b6   : > { %v3410_v24 = vpop.f32.mrf.mxu1 }
 0x1b7   : > { %1708 = vmatmul.mubr.f32.gmra.mxu1 %v366_v16 }
 0x1b8   : > { %1713 = vmatprep.mubr.f32.mxu1 %v375_v21  ;;  %v3414_v27 = vpop.f32.mrf.mxu0 }
 0x1b9   : > { %4124 = vst [vmem:[#allocation26_spill] sm:$0xff] %v3414_v27  ;;  %v1947_v27 = vld [vmem:[#allocation8 + $0x98] sm:$0xff] }
 0x1ba   : > { %v3417_v32 = vpop.f32.mrf.mxu0  ;;  %v3419_v35 = vpop.f32.mrf.mxu1 }
 0x1bb   : > { %4125 = vst [vmem:[#allocation27_spill] sm:$0xff] %v3417_v32  ;;  %1714 = vmatmul.mubr.f32.gmra.mxu1 %v374_v25  ;;  %v1954_v25 = vld [vmem:[#allocation8 + $0xd0] sm:$0xff] }
 0x1bc   : > { %1719 = vmatprep.mubr.f32.mxu1 %v383_v30  ;;  %v3423_v38 = vpop.f32.mrf.mxu1  ;;  %2010 = vmatpush2.msra.mxu0 %v1954_v25  ;;  %v471_v32 = vld [vmem:[%s3098_s10 + $0x4f8] sm:$0xff] }
 0x1bd   : > { %2011 = vmatprep.subr.mxu0 %v4101_v29 }
 0x1be   : > { %v3426_v45 = vpop.f32.mrf.mxu0 }
 0x1bf   : > { %4126 = vst [vmem:[#allocation28_spill] sm:$0xff] %v3426_v45  ;;  %1720 = vmatmul.mubr.f32.gmra.mxu1 %v382_v36  ;;  %v414_v36 = vld [vmem:[%s3098_s10 + $0x330] sm:$0xff] }
 0x1c0   : > { %1725 = vmatprep.mubr.f32.mxu1 %v391_v41  ;;  %v3430_v50 = vpop.f32.mrf.mxu0  ;;  %v3432_v54 = vpop.f32.mrf.mxu1 }
 0x1c1   : > { %4127 = vst [vmem:[#allocation29_spill] sm:$0xff] %v3430_v50 }
 0x1c2   : > { %v3435_v62 = vpop.f32.mrf.mxu1 }
 0x1c3   : > { %1726 = vmatmul.mubr.f32.gmra.mxu1 %v390_v49  ;;  %v1953_v49 = vld [vmem:[#allocation8 + $0xc8] sm:$0xff] }
 0x1c4   : > { %1731 = vmatprep.mubr.f32.mxu1 %v399_v60  ;;  %v3439_v4 = vpop.f32.mrf.mxu0  ;;  %2012 = vmatpush2.msra.mxu0 %v1953_v49  ;;  %v430_v49 = vld [vmem:[%s3098_s10 + $0x3b0] sm:$0xff] }
 0x1c5   : > { %4128 = vst [vmem:[#allocation30_spill] sm:$0xff] %v3439_v4  ;;  %2013 = vmatprep.subr.mxu0 %v4101_v29 }
 0x1c6   : > { %v3442_v13 = vpop.f32.mrf.mxu0  ;;  %v3444_v16 = vpop.f32.mrf.mxu1 }
 0x1c7   : > { %4129 = vst [vmem:[#allocation31_spill] sm:$0xff] %v3442_v13  ;;  %1732 = vmatmul.mubr.f32.gmra.mxu1 %v398_v2  ;;  %v422_v2 = vld [vmem:[%s3098_s10 + $0x370] sm:$0xff] }
 0x1c8   : > { %1737 = vmatprep.mubr.f32.mxu1 %v407_v12  ;;  %v3448_v21 = vpop.f32.mrf.mxu1  ;;  %v1952_v12 = vld [vmem:[#allocation8 + $0xc0] sm:$0xff] }
 0x1c9   : > { %2014 = vmatpush2.msra.mxu0 %v1952_v12 }
 0x1ca   : > { %v3451_v30 = vpop.f32.mrf.mxu0  ;;  %2015 = vmatprep.subr.mxu0 %v4101_v29 }
 0x1cb   : > { %4130 = vst [vmem:[#allocation32_spill] sm:$0xff] %v3451_v30  ;;  %1738 = vmatmul.mubr.f32.gmra.mxu1 %v406_v20  ;;  %v431_v20 = vld [vmem:[%s3098_s10 + $0x3b8] sm:$0xff] }
 0x1cc   : > { %1743 = vmatprep.mubr.f32.mxu1 %v415_v28  ;;  %v3455_v40 = vpop.f32.mrf.mxu0  ;;  %v3457_v41 = vpop.f32.mrf.mxu1  ;;  %v447_v30 = vld [vmem:[%s3098_s10 + $0x438] sm:$0xff] }
 0x1cd   : > { %4131 = vst [vmem:[#allocation33_spill] sm:$0xff] %v3455_v40 }
 0x1ce   : > { %v3460_v60 = vpop.f32.mrf.mxu1 }
 0x1cf   : > { %1744 = vmatmul.mubr.f32.gmra.mxu1 %v414_v36  ;;  %v1951_v36 = vld [vmem:[#allocation8 + $0xb8] sm:$0xff] }
 0x1d0   : > { %1749 = vmatprep.mubr.f32.mxu1 %v423_v58  ;;  %v3464_v8 = vpop.f32.mrf.mxu0  ;;  %v439_v58 = vld [vmem:[%s3098_s10 + $0x3f8] sm:$0xff]  ;;  %2016 = vmatpush2.msra.mxu0 %v1951_v36 }
 0x1d1   : > { %4132 = vst [vmem:[#allocation34_spill] sm:$0xff] %v3464_v8  ;;  %2017 = vmatprep.subr.mxu0 %v4101_v29 }
 0x1d2   : > { %v3467_v25 = vpop.f32.mrf.mxu0  ;;  %v3469_v28 = vpop.f32.mrf.mxu1 }
 0x1d3   : > { %4133 = vst [vmem:[#allocation35_spill] sm:$0xff] %v3467_v25  ;;  %1750 = vmatmul.mubr.f32.gmra.mxu1 %v422_v2  ;;  %v438_v2 = vld [vmem:[%s3098_s10 + $0x3f0] sm:$0xff] }
 0x1d4   : > { %1755 = vmatprep.mubr.f32.mxu1 %v431_v20  ;;  %v3473_v40 = vpop.f32.mrf.mxu1  ;;  %v1950_v20 = vld [vmem:[#allocation8 + $0xb0] sm:$0xff] }
 0x1d5   : > { %2018 = vmatpush2.msra.mxu0 %v1950_v20 }
 0x1d6   : > { %v3476_v8 = vpop.f32.mrf.mxu0  ;;  %2019 = vmatprep.subr.mxu0 %v4101_v29 }
 0x1d7   : > { %4134 = vst [vmem:[#allocation36_spill] sm:$0xff] %v3476_v8  ;;  %1756 = vmatmul.mubr.f32.gmra.mxu1 %v430_v49  ;;  %v446_v49 = vld [vmem:[%s3098_s10 + $0x430] sm:$0xff]  ;;  %v455_v8 = vld [vmem:[%s3098_s10 + $0x478] sm:$0xff] }
 0x1d8   : > { %1761 = vmatprep.mubr.f32.mxu1 %v439_v58  ;;  %v3479_v12 = vpop.f32.mrf.mxu0  ;;  %v3481_v25 = vpop.f32.mrf.mxu1  ;;  %v1949_v58 = vld [vmem:[#allocation8 + $0xa8] sm:$0xff] }
 0x1d9   : > { %4135 = vst [vmem:[#allocation37_spill] sm:$0xff] %v3479_v12  ;;  %2020 = vmatpush2.msra.mxu0 %v1949_v58 }
 0x1da   : > { %v3485_v13 = vpop.f32.mrf.mxu1  ;;  %2021 = vmatprep.subr.mxu0 %v4101_v29  ;;  %v462_v29 = vld [vmem:[%s3098_s10 + $0x4b0] sm:$0xff] }
 0x1db   : > { %1762 = vmatmul.mubr.f32.gmra.mxu1 %v438_v2  ;;  %v454_v2 = vld [vmem:[%s3098_s10 + $0x470] sm:$0xff] }
 0x1dc   : > { %v3488_v36 = vpop.f32.mrf.mxu0  ;;  %1767 = vmatprep.mubr.f32.mxu1 %v447_v30  ;;  %v463_v30 = vld [vmem:[%s3098_s10 + $0x4b8] sm:$0xff] }
 0x1dd   : > { %4136 = vst [vmem:[#allocation38_spill] sm:$0xff] %v3488_v36  ;;  %v1948_v36 = vld [vmem:[#allocation8 + $0xa0] sm:$0xff] }
 0x1de   : > { %v3492_v12 = vpop.f32.mrf.mxu0  ;;  %v3494_v4 = vpop.f32.mrf.mxu1  ;;  %2022 = vmatpush2.msra.mxu0 %v1948_v36 }
 0x1df   : > { %4137 = vst [vmem:[#allocation39_spill] sm:$0xff] %v3492_v12  ;;  %1768 = vmatmul.mubr.f32.gmra.mxu1 %v446_v49  ;;  %v4138_v49 = vmov 0.0  }
 0x1e0   : > { %v3497_v20 = vpop.f32.mrf.mxu1  ;;  %1773 = vmatprep.mubr.f32.mxu1 %v455_v8  ;;  %2023 = vmatprep.subr.mxu0 %v4138_v49 }
 0x1e1   : > { %v3500_v50 = vpop.f32.mrf.mxu0  ;;  %2024 = vmatpush2.msra.mxu0 %v1947_v27 }
 0x1e2   : > { %2025 = vmatprep.subr.mxu0 %v4138_v49 }
 0x1e3   : > { %v3503_v45 = vpop.f32.mrf.mxu1  ;;  %v3505_v58 = vpop.f32.mrf.mxu0  ;;  %1774 = vmatmul.mubr.f32.gmra.mxu1 %v454_v2  ;;  %v470_v2 = vld [vmem:[%s3098_s10 + $0x4f0] sm:$0xff]  ;;  %2026 = vmatpush2.msra.mxu0 %v1946_v5 }
 0x1e4   : > { %1779 = vmatprep.mubr.f32.mxu1 %v463_v30  ;;  %2027 = vmatprep.subr.mxu0 %v4138_v49 }
 0x1e5   : > { %v3509_v12 = vpop.f32.mrf.mxu1  ;;  %v3511_v8 = vpop.f32.mrf.mxu0  ;;  %2028 = vmatpush2.msra.mxu0 %v1945_v53 }
 0x1e6   : > { %2029 = vmatprep.subr.mxu0 %v4138_v49  ;;  %v503_v49 = vld [vmem:[%s3098_s10 + $0x5f8] sm:$0xff] }
 0x1e7   : > { %v3514_v17 = vpop.f32.mrf.mxu1  ;;  %1780 = vmatmul.mubr.f32.gmra.mxu1 %v462_v29  ;;  %v3518_v36 = vpop.f32.mrf.mxu0  ;;  %v478_v29 = vld [vmem:[%s3098_s10 + $0x530] sm:$0xff] }
 0x1e8   : > { %1785 = vmatprep.mubr.f32.mxu1 %v471_v32 }
 0x1e9   : > { %v3520_v30 = vpop.f32.mrf.mxu1  ;;  %v3527_v27 = vpop.f32.mrf.mxu0 }
 0x1ea   : > { %4139 = vst [vmem:[#allocation40_spill] sm:$0xff] %v3520_v30  ;;  %4141 = vst [vmem:[#allocation42_spill] sm:$0xff] %v3527_v27 }
 0x1eb   : > { %v3523_v1 = vpop.f32.mrf.mxu1  ;;  %1786 = vmatmul.mubr.f32.gmra.mxu1 %v470_v2  ;;  %v486_v2 = vld [vmem:[%s3098_s10 + $0x570] sm:$0xff]  ;;  %v3536_v5 = vpop.f32.mrf.mxu0 }
 0x1ec   : > { %4140 = vst [vmem:[#allocation41_spill] sm:$0xff] %v3523_v1  ;;  %1791 = vmatprep.mubr.f32.mxu1 %v479_v14  ;;  %4144 = vst [vmem:[#allocation45_spill] sm:$0xff] %v3536_v5 }
 0x1ed   : > { %v3529_v32 = vpop.f32.mrf.mxu1  ;;  %v3544_v53 = vpop.f32.mrf.mxu0 }
 0x1ee   : > { %4142 = vst [vmem:[#allocation43_spill] sm:$0xff] %v3529_v32  ;;  %v1944_v32 = vld [vmem:[#allocation8 + $0x80] sm:$0xff]  ;;  %4147 = vst [vmem:[#allocation48_spill] sm:$0xff] %v3544_v53 }
 0x1ef   : > { %v3532_v43 = vpop.f32.mrf.mxu1  ;;  %1792 = vmatmul.mubr.f32.gmra.mxu1 %v478_v29  ;;  %2030 = vmatpush2.msra.mxu0 %v1944_v32  ;;  %v494_v29 = vld [vmem:[%s3098_s10 + $0x5b0] sm:$0xff]  ;;  %v3552_v5 = vpop.f32.mrf.mxu0 }
 0x1f0   : > { %4143 = vst [vmem:[#allocation44_spill] sm:$0xff] %v3532_v43  ;;  %1797 = vmatprep.mubr.f32.mxu1 %v487_v55  ;;  %4150 = vst [vmem:[#allocation51_spill] sm:$0xff] %v3552_v5  ;;  %v518_v5 = vld [vmem:[%s3098_s10 + $0x670] sm:$0xff] }
 0x1f1   : > { %v3538_v14 = vpop.f32.mrf.mxu1 }
 0x1f2   : > { %4145 = vst [vmem:[#allocation46_spill] sm:$0xff] %v3538_v14  ;;  %v502_v14 = vld [vmem:[%s3098_s10 + $0x5f0] sm:$0xff] }
 0x1f3   : > { %v3541_v33 = vpop.f32.mrf.mxu1  ;;  %1798 = vmatmul.mubr.f32.gmra.mxu1 %v486_v2  ;;  %v511_v2 = vld [vmem:[%s3098_s10 + $0x638] sm:$0xff] }
 0x1f4   : > { %4146 = vst [vmem:[#allocation47_spill] sm:$0xff] %v3541_v33  ;;  %1803 = vmatprep.mubr.f32.mxu1 %v495_v39  ;;  %v510_v33 = vld [vmem:[%s3098_s10 + $0x630] sm:$0xff] }
 0x1f5   : > { %v3546_v55 = vpop.f32.mrf.mxu1 }
 0x1f6   : > { %4148 = vst [vmem:[#allocation49_spill] sm:$0xff] %v3546_v55  ;;  %v3560_v55 = vpop.f32.mrf.mxu0 }
 0x1f7   : > { %v3549_v43 = vpop.f32.mrf.mxu1  ;;  %1804 = vmatmul.mubr.f32.gmra.mxu1 %v494_v29  ;;  %4153 = vst [vmem:[#allocation54_spill] sm:$0xff] %v3560_v55  ;;  %v519_v29 = vld [vmem:[%s3098_s10 + $0x678] sm:$0xff]  ;;  %v526_v55 = vld [vmem:[%s3098_s10 + $0x6b0] sm:$0xff] }
 0x1f8   : > { %4149 = vst [vmem:[#allocation50_spill] sm:$0xff] %v3549_v43  ;;  %1809 = vmatprep.mubr.f32.mxu1 %v503_v49 }
 0x1f9   : > { %v3554_v32 = vpop.f32.mrf.mxu1 }
 0x1fa   : > { %4151 = vst [vmem:[#allocation52_spill] sm:$0xff] %v3554_v32  ;;  %v3568_v32 = vpop.f32.mrf.mxu0 }
 0x1fb   : > { %v3557_v39 = vpop.f32.mrf.mxu1  ;;  %1810 = vmatmul.mubr.f32.gmra.mxu1 %v502_v14  ;;  %4156 = vst [vmem:[#allocation57_spill] sm:$0xff] %v3568_v32  ;;  %v527_v14 = vld [vmem:[%s3098_s10 + $0x6b8] sm:$0xff]  ;;  %v534_v32 = vld [vmem:[%s3098_s10 + $0x6f0] sm:$0xff] }
 0x1fc   : > { %4152 = vst [vmem:[#allocation53_spill] sm:$0xff] %v3557_v39  ;;  %1815 = vmatprep.mubr.f32.mxu1 %v511_v2 }
 0x1fd   : > { %v3562_v43 = vpop.f32.mrf.mxu1 }
 0x1fe   : > { %4154 = vst [vmem:[#allocation55_spill] sm:$0xff] %v3562_v43  ;;  %v3576_v43 = vpop.f32.mrf.mxu0 }
 0x1ff   : > { %v3565_v49 = vpop.f32.mrf.mxu1  ;;  %1816 = vmatmul.mubr.f32.gmra.mxu1 %v510_v33  ;;  %4159 = vst [vmem:[#allocation60_spill] sm:$0xff] %v3576_v43  ;;  %v535_v33 = vld [vmem:[%s3098_s10 + $0x6f8] sm:$0xff] }
 0x200   : > { %4155 = vst [vmem:[#allocation56_spill] sm:$0xff] %v3565_v49  ;;  %1821 = vmatprep.mubr.f32.mxu1 %v519_v29 }
 0x201   : > { %v3570_v39 = vpop.f32.mrf.mxu1 }
 0x202   : > { %4157 = vst [vmem:[#allocation58_spill] sm:$0xff] %v3570_v39  ;;  %v3584_v39 = vpop.f32.mrf.mxu0 }
 0x203   : > { %v3573_v2 = vpop.f32.mrf.mxu1  ;;  %1822 = vmatmul.mubr.f32.gmra.mxu1 %v518_v5  ;;  %4162 = vst [vmem:[#allocation63_spill] sm:$0xff] %v3584_v39  ;;  %v543_v5 = vld [vmem:[%s3098_s10 + $0x738] sm:$0xff] }
 0x204   : > { %4158 = vst [vmem:[#allocation59_spill] sm:$0xff] %v3573_v2  ;;  %1827 = vmatprep.mubr.f32.mxu1 %v527_v14  ;;  %v542_v2 = vld [vmem:[%s3098_s10 + $0x730] sm:$0xff] }
 0x205   : > { %v3578_v49 = vpop.f32.mrf.mxu1 }
 0x206   : > { %4160 = vst [vmem:[#allocation61_spill] sm:$0xff] %v3578_v49  ;;  %v3592_v49 = vpop.f32.mrf.mxu0 }
 0x207   : > { %v3581_v29 = vpop.f32.mrf.mxu1  ;;  %1828 = vmatmul.mubr.f32.gmra.mxu1 %v526_v55  ;;  %4165 = vst [vmem:[#allocation66_spill] sm:$0xff] %v3592_v49  ;;  %v551_v55 = vld [vmem:[%s3098_s10 + $0x778] sm:$0xff] }
 0x208   : > { %4161 = vst [vmem:[#allocation62_spill] sm:$0xff] %v3581_v29  ;;  %1833 = vmatprep.mubr.f32.mxu1 %v535_v33  ;;  %v826_v33 = vlaneseq  ;;  %v3600_v39 = vpop.f32.mrf.mxu0 }
 0x209   : > { %v3586_v53 = vpop.f32.mrf.mxu1  ;;  %4168 = vst [vmem:[#allocation69_spill] sm:$0xff] %v3600_v39 }
 0x20a   : > { %4163 = vst [vmem:[#allocation64_spill] sm:$0xff] %v3586_v53  ;;  %v550_v53 = vld [vmem:[%s3098_s10 + $0x770] sm:$0xff]  ;;  %v3608_v49 = vpop.f32.mrf.mxu0 }
 0x20b   : > { %v3589_v14 = vpop.f32.mrf.mxu1  ;;  %1834 = vmatmul.mubr.f32.gmra.mxu1 %v534_v32  ;;  %v559_v32 = vld [vmem:[%s3098_s10 + $0x7b8] sm:$0xff]  ;;  %4171 = vst [vmem:[#allocation72_spill] sm:$0xff] %v3608_v49 }
 0x20c   : > { %4164 = vst [vmem:[#allocation65_spill] sm:$0xff] %v3589_v14  ;;  %1839 = vmatprep.mubr.f32.mxu1 %v543_v5  ;;  %v827_v5 = vshrl.u32 %v826_v33, 7  ;;  %v3616_v30 = vpop.f32.mrf.mxu0 }
 0x20d   : > { %v3594_v43 = vpop.f32.mrf.mxu1 }
 0x20e   : > { %4166 = vst [vmem:[#allocation67_spill] sm:$0xff] %v3594_v43  ;;  %v558_v43 = vld [vmem:[%s3098_s10 + $0x7b0] sm:$0xff]  ;;  %v832_v39 = vsub.s32 1, %v827_v5 }
 0x20f   : > { %v3597_v29 = vpop.f32.mrf.mxu1  ;;  %1840 = vmatmul.mubr.f32.gmra.mxu1 %v542_v2  ;;  %v828_v2 = vsub.s32 0, %v827_v5 }
 0x210   : > { %4167 = vst [vmem:[#allocation68_spill] sm:$0xff] %v3597_v29  ;;  %1845 = vmatprep.mubr.f32.mxu1 %v551_v55  ;;  %v567_v29 = vld [vmem:[%s3098_s10 + $0x7f8] sm:$0xff]  ;;  %v824_v55 = vld [vmem:[#allocation7] sm:$0x3] }
 0x211   : > { %v3602_v1 = vpop.f32.mrf.mxu1 }
 0x212   : > { %4169 = vst [vmem:[#allocation70_spill] sm:$0xff] %v3602_v1  ;;  %v566_v1 = vld [vmem:[%s3098_s10 + $0x7f0] sm:$0xff] }
 0x213   : > { %v3605_v14 = vpop.f32.mrf.mxu1  ;;  %1846 = vmatmul.mubr.f32.gmra.mxu1 %v550_v53  ;;  %v3620_v53 = vrot.slane %v824_v55, %v828_v2 }
 0x214   : > { %4170 = vst [vmem:[#allocation71_spill] sm:$0xff] %v3605_v14  ;;  %1851 = vmatprep.mubr.f32.mxu1 %v559_v32  ;;  %v3624_v14 = vrot.slane %v824_v55, %v832_v39 }
 0x215   : > { %v3610_v27 = vpop.f32.mrf.mxu1 }
 0x216   : > { %4172 = vst [vmem:[#allocation73_spill] sm:$0xff] %v3610_v27  ;;  %v3626_v27 = vpop.f32.mrf.mxu0  ;;  %v1001_v5 = vadd.f32 %v3288_v47, %v3624_v14  ;;  %v1011_v47 = vadd.f32 %v3311_v0, %v3620_v53  ;;  %v1019_v0 = vadd.f32 %v3331_v15, %v3624_v14  ;;  %v1029_v15 = vadd.f32 %v3357_v34, %v3620_v53 }
 0x217   : > { %v3613_v31 = vpop.f32.mrf.mxu1  ;;  %1852 = vmatmul.mubr.f32.gmra.mxu1 %v558_v43  ;;  %4176 = vst [vmem:[#allocation77_spill] sm:$0xff] %v3626_v27  ;;  %v999_v43 = vadd.f32 %v3281_v42, %v3620_v53  ;;  %v1037_v34 = vadd.f32 %v3373_v48, %v3624_v14  ;;  %v1047_v48 = vadd.f32 %v3394_v6, %v3620_v53 }
 0x218   : > { %4173 = vst [vmem:[#allocation74_spill] sm:$0xff] %v3613_v31  ;;  %1857 = vmatprep.mubr.f32.mxu1 %v567_v29  ;;  %v3636_v2 = vpop.f32.mrf.mxu0  ;;  %v1055_v6 = vadd.f32 %v3410_v24, %v3624_v14  ;;  %v1065_v24 = vadd.f32 %v3432_v54, %v3620_v53  ;;  %v1073_v54 = vadd.f32 %v3448_v21, %v3624_v14 }
 0x219   : > { %v3618_v33 = vpop.f32.mrf.mxu1  ;;  %v1083_v21 = vadd.f32 %v3469_v28, %v3620_v53  ;;  %v1089_v28 = vadd.f32 %v3481_v25, %v3620_v53 }
 0x21a   : > { %4174 = vst [vmem:[#allocation75_spill] sm:$0xff] %v3618_v33  ;;  %v3646_v42 = vpop.f32.mrf.mxu0 }
 0x21b   : > { %v3622_v32 = vpop.f32.mrf.mxu1  ;;  %1858 = vmatmul.mubr.f32.gmra.mxu1 %v566_v1  ;;  %v1005_v1 = vadd.f32 %v3296_v52, %v3620_v53  ;;  %v1013_v52 = vadd.f32 %v3316_v3, %v3624_v14  ;;  %v1023_v3 = vadd.f32 %v3342_v23, %v3620_v53  ;;  %v1031_v23 = vadd.f32 %v3360_v37, %v3624_v14 }
 0x21c   : > { %4175 = vst [vmem:[#allocation76_spill] sm:$0xff] %v3622_v32  ;;  %v1041_v37 = vadd.f32 %v3382_v57, %v3620_v53  ;;  %v1049_v57 = vadd.f32 %v3398_v9, %v3624_v14  ;;  %v1059_v9 = vadd.f32 %v3419_v35, %v3620_v53  ;;  %v1067_v35 = vadd.f32 %v3435_v62, %v3624_v14 }
 0x21d   : > { %v3628_v49 = vpop.f32.mrf.mxu1  ;;  %v1077_v62 = vadd.f32 %v3457_v41, %v3620_v53 }
 0x21e   : > { %4177 = vst [vmem:[#allocation78_spill] sm:$0xff] %v3628_v49  ;;  %v1007_v49 = vadd.f32 %v3300_v56, %v3624_v14  ;;  %v1017_v56 = vadd.f32 %v3327_v11, %v3620_v53  ;;  %v1025_v11 = vadd.f32 %v3347_v26, %v3624_v14  ;;  %v1035_v26 = vadd.f32 %v3369_v44, %v3620_v53 }
 0x21f   : > { %v1255_v29 = vpop.f32.mrf.mxu1  ;;  %v1043_v44 = vadd.f32 %v3385_v61, %v3624_v14  ;;  %v1053_v61 = vadd.f32 %v3407_v19, %v3620_v53  ;;  %v1061_v19 = vadd.f32 %v3423_v38, %v3624_v14  ;;  %v1071_v38 = vadd.f32 %v3444_v16, %v3620_v53 }
 0x220   : > { %v3634_v31 = vadd.f32 %v1255_v29, %v999_v43  ;;  %v1079_v16 = vadd.f32 %v3460_v60, %v3624_v14  ;;  %v1085_v60 = vadd.f32 %v3473_v40, %v3624_v14  ;;  %v1091_v40 = vadd.f32 %v3485_v13, %v3624_v14 }
 0x221   : > { %v1257_v33 = vpop.f32.mrf.mxu1  ;;  %v917_v13 = vadd.f32 %v3325_v10, %v3624_v14  ;;  %v923_v10 = vadd.f32 %v3340_v22, %v3624_v14  ;;  %v4200_v22 = vld [vmem:[#allocation17_spill] sm:$0xff] }
 0x222   : > { %v3640_v39 = vadd.f32 %v1257_v33, %v1001_v5  ;;  %v3656_v5 = vpop.f32.mrf.mxu0 }
 0x223   : > { %v1261_v55 = vpop.f32.mrf.mxu1 }
 0x224   : > { %4178 = vst [vmem:[#allocation79_spill] sm:$0xff] %v3640_v39  ;;  %v3644_v32 = vadd.f32 %v1261_v55, %v1005_v1 }
 0x225   : > { %v1263_v27 = vpop.f32.mrf.mxu1 }
 0x226   : > { %v3650_v43 = vadd.f32 %v1263_v27, %v1007_v49  ;;  %v3666_v49 = vpop.f32.mrf.mxu0 }
 0x227   : > { %v1267_v29 = vpop.f32.mrf.mxu1 }
 0x228   : > { %4179 = vst [vmem:[#allocation80_spill] sm:$0xff] %v3650_v43  ;;  %v3654_v33 = vadd.f32 %v1267_v29, %v1011_v47 }
 0x229   : > { %v1269_v39 = vpop.f32.mrf.mxu1 }
 0x22a   : > { %v3660_v1 = vadd.f32 %v1269_v39, %v1013_v52  ;;  %v3676_v52 = vpop.f32.mrf.mxu0 }
 0x22b   : > { %v1273_v55 = vpop.f32.mrf.mxu1 }
 0x22c   : > { %4180 = vst [vmem:[#allocation81_spill] sm:$0xff] %v3660_v1  ;;  %v3664_v27 = vadd.f32 %v1273_v55, %v1017_v56 }
 0x22d   : > { %v1275_v43 = vpop.f32.mrf.mxu1 }
 0x22e   : > { %v3670_v47 = vadd.f32 %v1275_v43, %v1019_v0  ;;  %v3686_v0 = vpop.f32.mrf.mxu0 }
 0x22f   : > { %v1279_v29 = vpop.f32.mrf.mxu1 }
 0x230   : > { %4181 = vst [vmem:[#allocation82_spill] sm:$0xff] %v3670_v47  ;;  %v3674_v39 = vadd.f32 %v1279_v29, %v1023_v3 }
 0x231   : > { %v1281_v1 = vpop.f32.mrf.mxu1 }
 0x232   : > { %v3680_v56 = vadd.f32 %v1281_v1, %v1025_v11  ;;  %v3696_v11 = vpop.f32.mrf.mxu0 }
 0x233   : > { %v1285_v55 = vpop.f32.mrf.mxu1 }
 0x234   : > { %4182 = vst [vmem:[#allocation83_spill] sm:$0xff] %v3680_v56  ;;  %v3684_v43 = vadd.f32 %v1285_v55, %v1029_v15 }
 0x235   : > { %v1287_v47 = vpop.f32.mrf.mxu1 }
 0x236   : > { %v3690_v3 = vadd.f32 %v1287_v47, %v1031_v23  ;;  %v3706_v23 = vpop.f32.mrf.mxu0 }
 0x237   : > { %v1291_v29 = vpop.f32.mrf.mxu1 }
 0x238   : > { %4183 = vst [vmem:[#allocation84_spill] sm:$0xff] %v3690_v3  ;;  %v3694_v1 = vadd.f32 %v1291_v29, %v1035_v26 }
 0x239   : > { %v1293_v56 = vpop.f32.mrf.mxu1 }
 0x23a   : > { %v3700_v15 = vadd.f32 %v1293_v56, %v1037_v34  ;;  %v3716_v34 = vpop.f32.mrf.mxu0 }
 0x23b   : > { %v1297_v55 = vpop.f32.mrf.mxu1 }
 0x23c   : > { %4184 = vst [vmem:[#allocation85_spill] sm:$0xff] %v3700_v15  ;;  %v3704_v47 = vadd.f32 %v1297_v55, %v1041_v37 }
 0x23d   : > { %v1299_v3 = vpop.f32.mrf.mxu1 }
 0x23e   : > { %v3710_v26 = vadd.f32 %v1299_v3, %v1043_v44  ;;  %v3726_v44 = vpop.f32.mrf.mxu0 }
 0x23f   : > { %v1303_v29 = vpop.f32.mrf.mxu1 }
 0x240   : > { %4185 = vst [vmem:[#allocation86_spill] sm:$0xff] %v3710_v26  ;;  %v3714_v56 = vadd.f32 %v1303_v29, %v1047_v48 }
 0x241   : > { %v1305_v15 = vpop.f32.mrf.mxu1 }
 0x242   : > { %v3720_v37 = vadd.f32 %v1305_v15, %v1049_v57  ;;  %v3736_v57 = vpop.f32.mrf.mxu0 }
 0x243   : > { %v1309_v55 = vpop.f32.mrf.mxu1 }
 0x244   : > { %4186 = vst [vmem:[#allocation87_spill] sm:$0xff] %v3720_v37  ;;  %v3724_v3 = vadd.f32 %v1309_v55, %v1053_v61 }
 0x245   : > { %v1311_v26 = vpop.f32.mrf.mxu1 }
 0x246   : > { %v3730_v48 = vadd.f32 %v1311_v26, %v1055_v6  ;;  %v3746_v6 = vpop.f32.mrf.mxu0 }
 0x247   : > { %v1315_v29 = vpop.f32.mrf.mxu1 }
 0x248   : > { %4187 = vst [vmem:[#allocation88_spill] sm:$0xff] %v3730_v48  ;;  %v3734_v15 = vadd.f32 %v1315_v29, %v1059_v9 }
 0x249   : > { %v1317_v37 = vpop.f32.mrf.mxu1 }
 0x24a   : > { %v3740_v61 = vadd.f32 %v1317_v37, %v1061_v19  ;;  %v3756_v19 = vpop.f32.mrf.mxu0 }
 0x24b   : > { %v1321_v55 = vpop.f32.mrf.mxu1 }
 0x24c   : > { %4188 = vst [vmem:[#allocation89_spill] sm:$0xff] %v3740_v61  ;;  %v3744_v26 = vadd.f32 %v1321_v55, %v1065_v24 }
 0x24d   : > { %v1323_v48 = vpop.f32.mrf.mxu1 }
 0x24e   : > { %v3750_v9 = vadd.f32 %v1323_v48, %v1067_v35  ;;  %v3766_v35 = vpop.f32.mrf.mxu0 }
 0x24f   : > { %v1327_v29 = vpop.f32.mrf.mxu1 }
 0x250   : > { %4189 = vst [vmem:[#allocation90_spill] sm:$0xff] %v3750_v9  ;;  %v3754_v37 = vadd.f32 %v1327_v29, %v1071_v38  ;;  %v903_v29 = vadd.f32 %v3286_v46, %v3620_v53  ;;  %v909_v46 = vadd.f32 %v3305_v59, %v3620_v53  ;;  %v915_v59 = vadd.f32 %v3320_v7, %v3620_v53 }
 0x251   : > { %v1329_v61 = vpop.f32.mrf.mxu1  ;;  %v921_v7 = vadd.f32 %v3336_v18, %v3620_v53  ;;  %v4197_v18 = vld [vmem:[#allocation16_spill] sm:$0xff] }
 0x252   : > { %v3760_v24 = vadd.f32 %v1329_v61, %v1073_v54  ;;  %v905_v61 = vadd.f32 %v3294_v51, %v3624_v14  ;;  %v911_v51 = vadd.f32 %v3309_v63, %v3624_v14 }
 0x253   : > { %v1333_v55 = vpop.f32.mrf.mxu1 }
 0x254   : > { %v3764_v48 = vadd.f32 %v1333_v55, %v1077_v62  ;;  %v3780_v62 = vpop.f32.mrf.mxu0 }
 0x255   : > { %v1335_v9 = vpop.f32.mrf.mxu1 }
 0x256   : > { %4190 = vst [vmem:[#allocation91_spill] sm:$0xff] %v3764_v48  ;;  %v3770_v38 = vadd.f32 %v1335_v9, %v1079_v16  ;;  %v1160_v16 = vadd.f32 %v3494_v4, %v903_v29  ;;  %v1166_v29 = vadd.f32 %v3503_v45, %v909_v46  ;;  %v1172_v45 = vadd.f32 %v3514_v17, %v915_v59  ;;  %v4199_v59 = vld [vmem:[#allocation41_spill] sm:$0xff] }
 0x257   : > { %v1339_v41 = vpop.f32.mrf.mxu1 }
 0x258   : > { %4191 = vst [vmem:[#allocation92_spill] sm:$0xff] %v3770_v38  ;;  %v3778_v54 = vadd.f32 %v1339_v41, %v1083_v21  ;;  %v1162_v21 = vadd.f32 %v3497_v20, %v905_v61  ;;  %v1417_v4 = vadd.f32 %v3500_v50, %v1160_v16  ;;  %v1423_v50 = vadd.f32 %v3511_v8, %v1166_v29  ;;  %v4196_v16 = vld [vmem:[#allocation40_spill] sm:$0xff]  ;;  %v4198_v29 = vld [vmem:[#allocation42_spill] sm:$0xff] }
 0x259   : > { %v1341_v55 = vpop.f32.mrf.mxu1  ;;  %v927_v8 = vadd.f32 %v4197_v18, %v3620_v53  ;;  %v1429_v17 = vadd.f32 %v4198_v29, %v1172_v45  ;;  %v4205_v18 = vld [vmem:[#allocation44_spill] sm:$0xff] }
 0x25a   : > { %4192 = vst [vmem:[#allocation93_spill] sm:$0xff] %v3778_v54  ;;  %v3784_v9 = vadd.f32 %v1341_v55, %v1085_v60  ;;  %v3796_v54 = vpop.f32.mrf.mxu0  ;;  %v1419_v20 = vadd.f32 %v3505_v58, %v1162_v21 }
 0x25b   : > { %v1345_v38 = vpop.f32.mrf.mxu1  ;;  %v1184_v29 = vadd.f32 %v4205_v18, %v927_v8 }
 0x25c   : > { %4193 = vst [vmem:[#allocation94_spill] sm:$0xff] %v3784_v9  ;;  %v3794_v41 = vadd.f32 %v1345_v38, %v1089_v28  ;;  %v1168_v38 = vadd.f32 %v3509_v12, %v911_v51  ;;  %v3808_v61 = vpop.f32.mrf.mxu0  ;;  %v1174_v12 = vadd.f32 %v4196_v16, %v917_v13  ;;  %v4203_v16 = vld [vmem:[#allocation18_spill] sm:$0xff] }
 0x25d   : > { %v1347_v25 = vpop.f32.mrf.mxu1  ;;  %v933_v45 = vadd.f32 %v4203_v16, %v3620_v53  ;;  %v4210_v16 = vld [vmem:[#allocation54_spill] sm:$0xff] }
 0x25e   : > { %4194 = vst [vmem:[#allocation95_spill] sm:$0xff] %v3794_v41  ;;  %v3798_v60 = vadd.f32 %v1347_v25, %v1091_v40  ;;  %v1425_v58 = vadd.f32 %v3518_v36, %v1168_v38  ;;  %v3818_v51 = vpop.f32.mrf.mxu0  ;;  %v929_v36 = vadd.f32 %v4200_v22, %v3624_v14  ;;  %v4201_v38 = vld [vmem:[#allocation45_spill] sm:$0xff]  ;;  %v4206_v22 = vld [vmem:[#allocation19_spill] sm:$0xff]  ;;  %v1441_v8 = vadd.f32 %v4210_v16, %v1184_v29  ;;  %v4216_v16 = vld [vmem:[#allocation60_spill] sm:$0xff] }
 0x25f   : > { %v1673_v63 = vpop.f32.mrf.mxu1  ;;  %v1431_v13 = vadd.f32 %v4201_v38, %v1174_v12  ;;  %v935_v12 = vadd.f32 %v4206_v22, %v3624_v14  ;;  %v4207_v38 = vld [vmem:[#allocation51_spill] sm:$0xff]  ;;  %v4212_v22 = vld [vmem:[#allocation21_spill] sm:$0xff] }
 0x260   : > { %4195 = vst [vmem:[#allocation96_spill] sm:$0xff] %v3798_v60  ;;  %v1674_v55 = vadd.f32 %v1673_v63, %v1417_v4  ;;  %v1178_v63 = vadd.f32 %v4199_v59, %v921_v7 }
 0x261   : > { %v1675_v28 = vpop.f32.mrf.mxu1 }
 0x262   : > { %v1676_v40 = vadd.f32 %v1675_v28, %v1419_v20  ;;  %v4202_v28 = vld [vmem:[#allocation43_spill] sm:$0xff] }
 0x263   : > { %v1679_v46 = vpop.f32.mrf.mxu1 }
 0x264   : > { %2566 = vtanh.f32 %v1676_v40  ;;  %v1680_v21 = vadd.f32 %v1679_v46, %v1423_v50  ;;  %v1180_v40 = vadd.f32 %v4202_v28, %v923_v10 }
 0x265   : > { %2568 = vtanh.f32 %v1674_v55  ;;  %v1681_v25 = vpop.f32.mrf.mxu1  ;;  %v3828_v55 = vpop.f32.mrf.mxu0 }
 0x266   : > { %v1682_v4 = vadd.f32 %v1681_v25, %v1425_v58  ;;  %v4204_v25 = vld [vmem:[#allocation48_spill] sm:$0xff]  ;;  %v1437_v10 = vadd.f32 %v4207_v38, %v1180_v40  ;;  %v941_v40 = vadd.f32 %v4212_v22, %v3624_v14  ;;  %v4213_v38 = vld [vmem:[#allocation57_spill] sm:$0xff]  ;;  %v4217_v22 = vld [vmem:[#allocation50_spill] sm:$0xff] }
 0x267   : > { %v1685_v20 = vpop.f32.mrf.mxu1  ;;  %v1435_v7 = vadd.f32 %v4204_v25, %v1178_v63  ;;  %v4211_v25 = vld [vmem:[#allocation47_spill] sm:$0xff] }
 0x268   : > { %2570 = vtanh.f32 %v1682_v4  ;;  %v1686_v50 = vadd.f32 %v1685_v20, %v1429_v17  ;;  %v4208_v4 = vld [vmem:[#allocation46_spill] sm:$0xff]  ;;  %v1190_v18 = vadd.f32 %v4211_v25, %v933_v45 }
 0x269   : > { %2572 = vtanh.f32 %v1680_v21  ;;  %v1687_v46 = vpop.f32.mrf.mxu1  ;;  %v1186_v28 = vadd.f32 %v4208_v4, %v929_v36  ;;  %v3838_v21 = vpop.f32.mrf.mxu0  ;;  %v4215_v45 = vld [vmem:[#allocation22_spill] sm:$0xff] }
 0x26a   : > { %v1688_v58 = vadd.f32 %v1687_v46, %v1431_v13  ;;  %v4209_v46 = vld [vmem:[#allocation20_spill] sm:$0xff]  ;;  %v945_v29 = vadd.f32 %v4215_v45, %v3620_v53  ;;  %v1447_v25 = vadd.f32 %v4216_v16, %v1190_v18  ;;  %v4222_v16 = vld [vmem:[#allocation66_spill] sm:$0xff] }
 0x26b   : > { %v1691_v59 = vpop.f32.mrf.mxu1  ;;  %v939_v63 = vadd.f32 %v4209_v46, %v3620_v53  ;;  %v1443_v36 = vadd.f32 %v4213_v38, %v1186_v28  ;;  %v4219_v38 = vld [vmem:[#allocation63_spill] sm:$0xff] }
 0x26c   : > { %2574 = vtanh.f32 %v1688_v58  ;;  %v1692_v17 = vadd.f32 %v1691_v59, %v1435_v7  ;;  %v4214_v58 = vld [vmem:[#allocation49_spill] sm:$0xff]  ;;  %v3848_v7 = vpop.f32.mrf.mxu0 }
 0x26d   : > { %2576 = vtanh.f32 %v1686_v50  ;;  %v1693_v20 = vpop.f32.mrf.mxu1  ;;  %v1192_v4 = vadd.f32 %v4214_v58, %v935_v12  ;;  %v1196_v41 = vadd.f32 %v4217_v22, %v939_v63  ;;  %v4218_v12 = vld [vmem:[#allocation23_spill] sm:$0xff]  ;;  %v4221_v63 = vld [vmem:[#allocation24_spill] sm:$0xff] }
 0x26e   : > { %v1694_v13 = vadd.f32 %v1693_v20, %v1437_v10 }
 0x26f   : > { %v1697_v60 = vpop.f32.mrf.mxu1  ;;  %v1449_v58 = vadd.f32 %v4219_v38, %v1192_v4  ;;  %v1453_v22 = vadd.f32 %v4222_v16, %v1196_v41  ;;  %v4225_v38 = vld [vmem:[#allocation69_spill] sm:$0xff]  ;;  %v4228_v16 = vld [vmem:[#allocation72_spill] sm:$0xff] }
 0x270   : > { %2578 = vtanh.f32 %v1694_v13  ;;  %v1698_v59 = vadd.f32 %v1697_v60, %v1441_v8  ;;  %v947_v13 = vadd.f32 %v4218_v12, %v3624_v14  ;;  %v4223_v12 = vld [vmem:[#allocation53_spill] sm:$0xff] }
 0x271   : > { %v2567_v50 = vpop.eup %2566  ;;  %2580 = vtanh.f32 %v1692_v17  ;;  %v1699_v10 = vpop.f32.mrf.mxu1  ;;  %v4220_v17 = vld [vmem:[#allocation52_spill] sm:$0xff]  ;;  %v1202_v9 = vadd.f32 %v4223_v12, %v945_v29  ;;  %v4227_v29 = vld [vmem:[#allocation26_spill] sm:$0xff] }
 0x272   : > { %v2569_v20 = vpop.eup %2568  ;;  %v1700_v46 = vadd.f32 %v1699_v10, %v1443_v36  ;;  %2031 = vmatprep.mubr.f32.mxu0 %v2567_v50  ;;  %v1198_v60 = vadd.f32 %v4220_v17, %v941_v40  ;;  %v3858_v36 = vpop.f32.mrf.mxu0  ;;  %v4224_v40 = vld [vmem:[#allocation25_spill] sm:$0xff] }
 0x273   : > { %v1703_v28 = vpop.f32.mrf.mxu1  ;;  %2032 = vmatmul.mubr.f32.vlgmr.msra.gmra.mxu0 %v2569_v20  ;;  %v951_v20 = vadd.f32 %v4221_v63, %v3620_v53  ;;  %v1459_v12 = vadd.f32 %v4228_v16, %v1202_v9 }
 0x274   : > { %2582 = vtanh.f32 %v1700_v46  ;;  %v1704_v50 = vadd.f32 %v1703_v28, %v1447_v25  ;;  %v953_v46 = vadd.f32 %v4224_v40, %v3624_v14  ;;  %v1455_v17 = vadd.f32 %v4225_v38, %v1198_v60  ;;  %v4229_v40 = vld [vmem:[#allocation56_spill] sm:$0xff] }
 0x275   : > { %v2571_v8 = vpop.eup %2570  ;;  %2584 = vtanh.f32 %v1698_v59  ;;  %v1705_v10 = vpop.f32.mrf.mxu1  ;;  %v4226_v59 = vld [vmem:[#allocation55_spill] sm:$0xff]  ;;  %v1208_v48 = vadd.f32 %v4229_v40, %v951_v20  ;;  %v4232_v20 = vld [vmem:[#allocation28_spill] sm:$0xff] }
 0x276   : > { %v2573_v45 = vpop.eup %2572  ;;  %v1706_v18 = vadd.f32 %v1705_v10, %v1449_v58  ;;  %2036 = vmatprep.mubr.f32.mxu0 %v2571_v8  ;;  %v1204_v25 = vadd.f32 %v4226_v59, %v947_v13  ;;  %v3868_v58 = vpop.f32.mrf.mxu0  ;;  %v4230_v13 = vld [vmem:[#allocation27_spill] sm:$0xff] }
 0x277   : > { %v1709_v4 = vpop.f32.mrf.mxu1  ;;  %2037 = vmatmul.mubr.f32.gmra.mxu0 %v2573_v45  ;;  %v957_v45 = vadd.f32 %v4227_v29, %v3620_v53  ;;  %v4233_v29 = vld [vmem:[#allocation77_spill] sm:$0xff]  ;;  %v4234_v40 = vld [vmem:[#allocation59_spill] sm:$0xff] }
 0x278   : > { %2586 = vtanh.f32 %v1706_v18  ;;  %v1710_v8 = vadd.f32 %v1709_v4, %v1453_v22  ;;  %v959_v18 = vadd.f32 %v4230_v13, %v3624_v14  ;;  %v1461_v38 = vadd.f32 %v3616_v30, %v1204_v25 }
 0x279   : > { %v2575_v28 = vpop.eup %2574  ;;  %2588 = vtanh.f32 %v1704_v50  ;;  %v1711_v10 = vpop.f32.mrf.mxu1  ;;  %v4231_v50 = vld [vmem:[#allocation58_spill] sm:$0xff]  ;;  %v1465_v16 = vadd.f32 %v4233_v29, %v1208_v48  ;;  %v1214_v13 = vadd.f32 %v4234_v40, %v957_v45 }
 0x27a   : > { %v2577_v63 = vpop.eup %2576  ;;  %v1712_v41 = vadd.f32 %v1711_v10, %v1455_v17  ;;  %2041 = vmatprep.mubr.f32.mxu0 %v2575_v28  ;;  %v1210_v22 = vadd.f32 %v4231_v50, %v953_v46  ;;  %v3878_v17 = vpop.f32.mrf.mxu0  ;;  %v4235_v46 = vld [vmem:[#allocation29_spill] sm:$0xff]  ;;  %v4237_v45 = vld [vmem:[#allocation30_spill] sm:$0xff] }
 0x27b   : > { %v1715_v60 = vpop.f32.mrf.mxu1  ;;  %2042 = vmatmul.mubr.f32.gmra.mxu0 %v2577_v63  ;;  %v963_v63 = vadd.f32 %v4232_v20, %v3620_v53  ;;  %v965_v25 = vadd.f32 %v4235_v46, %v3624_v14  ;;  %v1471_v20 = vadd.f32 %v3646_v42, %v1214_v13  ;;  %v4238_v29 = vld [vmem:[#allocation62_spill] sm:$0xff] }
 0x27c   : > { %2590 = vtanh.f32 %v1712_v41  ;;  %v1716_v59 = vadd.f32 %v1715_v60, %v1459_v12  ;;  %v1467_v41 = vadd.f32 %v3636_v2, %v1210_v22 }
 0x27d   : > { %v2579_v4 = vpop.eup %2578  ;;  %2592 = vtanh.f32 %v1710_v8  ;;  %v1717_v28 = vpop.f32.mrf.mxu1  ;;  %v4236_v8 = vld [vmem:[#allocation61_spill] sm:$0xff]  ;;  %v1220_v40 = vadd.f32 %v4238_v29, %v963_v63  ;;  %v4241_v63 = vld [vmem:[#allocation32_spill] sm:$0xff] }
 0x27e   : > { %v2581_v10 = vpop.eup %2580  ;;  %v1718_v9 = vadd.f32 %v1717_v28, %v1461_v38  ;;  %2046 = vmatprep.mubr.f32.mxu0 %v2579_v4  ;;  %v1216_v12 = vadd.f32 %v4236_v8, %v959_v18  ;;  %v3888_v38 = vpop.f32.mrf.mxu0  ;;  %v4239_v18 = vld [vmem:[#allocation31_spill] sm:$0xff]  ;;  %v975_v13 = vadd.f32 %v4241_v63, %v3620_v53 }
 0x27f   : > { %v1721_v30 = vpop.f32.mrf.mxu1  ;;  %2047 = vmatmul.mubr.f32.gmra.mxu0 %v2581_v10  ;;  %v969_v10 = vadd.f32 %v4237_v45, %v3620_v53  ;;  %v971_v22 = vadd.f32 %v4239_v18, %v3624_v14 }
 0x280   : > { %2594 = vtanh.f32 %v1718_v9  ;;  %v1722_v50 = vadd.f32 %v1721_v30, %v1465_v16  ;;  %v1473_v9 = vadd.f32 %v3656_v5, %v1216_v12  ;;  %v3898_v46 = vpop.f32.mrf.mxu0 }
 0x281   : > { %v2583_v60 = vpop.eup %2582  ;;  %2596 = vtanh.f32 %v1716_v59  ;;  %v1723_v4 = vpop.f32.mrf.mxu1  ;;  %v4240_v59 = vld [vmem:[#allocation64_spill] sm:$0xff] }
 0x282   : > { %v2585_v28 = vpop.eup %2584  ;;  %v1724_v48 = vadd.f32 %v1723_v4, %v1467_v41  ;;  %2051 = vmatprep.mubr.f32.mxu0 %v2583_v60  ;;  %v1222_v16 = vadd.f32 %v4240_v59, %v965_v25  ;;  %v1477_v4 = vadd.f32 %v3666_v49, %v1220_v40  ;;  %v4243_v25 = vld [vmem:[#allocation33_spill] sm:$0xff] }
 0x283   : > { %v1727_v2 = vpop.f32.mrf.mxu1  ;;  %2052 = vmatmul.mubr.f32.gmra.mxu0 %v2585_v28  ;;  %v4242_v28 = vld [vmem:[#allocation65_spill] sm:$0xff]  ;;  %v977_v12 = vadd.f32 %v4243_v25, %v3624_v14 }
 0x284   : > { %2598 = vtanh.f32 %v1724_v48  ;;  %v1728_v41 = vadd.f32 %v1727_v2, %v1471_v20  ;;  %v1226_v45 = vadd.f32 %v4242_v28, %v969_v10  ;;  %v1479_v48 = vadd.f32 %v3676_v52, %v1222_v16  ;;  %v3908_v2 = vpop.f32.mrf.mxu0  ;;  %v4245_v10 = vld [vmem:[#allocation34_spill] sm:$0xff] }
 0x285   : > { %v2587_v30 = vpop.eup %2586  ;;  %2600 = vtanh.f32 %v1722_v50  ;;  %v1729_v8 = vpop.f32.mrf.mxu1  ;;  %v4244_v50 = vld [vmem:[#allocation67_spill] sm:$0xff]  ;;  %v981_v40 = vadd.f32 %v4245_v10, %v3620_v53 }
 0x286   : > { %v2589_v60 = vpop.eup %2588  ;;  %v1730_v42 = vadd.f32 %v1729_v8, %v1473_v9  ;;  %2056 = vmatprep.mubr.f32.mxu0 %v2587_v30  ;;  %v1228_v20 = vadd.f32 %v4244_v50, %v971_v22  ;;  %v1483_v30 = vadd.f32 %v3686_v0, %v1226_v45  ;;  %v4246_v8 = vld [vmem:[#allocation68_spill] sm:$0xff]  ;;  %v4247_v22 = vld [vmem:[#allocation35_spill] sm:$0xff]  ;;  %v3918_v28 = vpop.f32.mrf.mxu0 }
 0x287   : > { %v1733_v5 = vpop.f32.mrf.mxu1  ;;  %2057 = vmatmul.mubr.f32.gmra.mxu0 %v2589_v60  ;;  %v1232_v60 = vadd.f32 %v4246_v8, %v975_v13  ;;  %v983_v16 = vadd.f32 %v4247_v22, %v3624_v14  ;;  %v4249_v13 = vld [vmem:[#allocation36_spill] sm:$0xff] }
 0x288   : > { %2602 = vtanh.f32 %v1730_v42  ;;  %v1734_v18 = vadd.f32 %v1733_v5, %v1477_v4  ;;  %v1485_v42 = vadd.f32 %v3696_v11, %v1228_v20  ;;  %v987_v45 = vadd.f32 %v4249_v13, %v3620_v53 }
 0x289   : > { %v2591_v29 = vpop.eup %2590  ;;  %2604 = vtanh.f32 %v1728_v41  ;;  %v1735_v9 = vpop.f32.mrf.mxu1  ;;  %v4248_v41 = vld [vmem:[#allocation70_spill] sm:$0xff]  ;;  %v1489_v50 = vadd.f32 %v3706_v23, %v1232_v60 }
 0x28a   : > { %v2593_v59 = vpop.eup %2592  ;;  %v1736_v49 = vadd.f32 %v1735_v9, %v1479_v48  ;;  %2061 = vmatprep.mubr.f32.mxu0 %v2591_v29  ;;  %v1234_v63 = vadd.f32 %v4248_v41, %v977_v12  ;;  %v4250_v29 = vld [vmem:[#allocation71_spill] sm:$0xff]  ;;  %v4251_v12 = vld [vmem:[#allocation37_spill] sm:$0xff]  ;;  %v4254_v41 = vld [vmem:[#allocation74_spill] sm:$0xff] }
 0x28b   : > { %v1739_v52 = vpop.f32.mrf.mxu1  ;;  %2062 = vmatmul.mubr.f32.gmra.mxu0 %v2593_v59  ;;  %v1238_v9 = vadd.f32 %v4250_v29, %v981_v40  ;;  %v989_v20 = vadd.f32 %v4251_v12, %v3624_v14  ;;  %v4253_v40 = vld [vmem:[#allocation38_spill] sm:$0xff] }
 0x28c   : > { %2606 = vtanh.f32 %v1736_v49  ;;  %v1740_v5 = vadd.f32 %v1739_v52, %v1483_v30  ;;  %v1491_v59 = vadd.f32 %v3716_v34, %v1234_v63  ;;  %v3928_v30 = vpop.f32.mrf.mxu0  ;;  %v993_v60 = vadd.f32 %v4253_v40, %v3620_v53 }
 0x28d   : > { %v2595_v4 = vpop.eup %2594  ;;  %2608 = vtanh.f32 %v1734_v18  ;;  %v1741_v25 = vpop.f32.mrf.mxu1  ;;  %v4252_v18 = vld [vmem:[#allocation73_spill] sm:$0xff] }
 0x28e   : > { %v2597_v48 = vpop.eup %2596  ;;  %v1742_v0 = vadd.f32 %v1741_v25, %v1485_v42  ;;  %2066 = vmatprep.mubr.f32.mxu0 %v2595_v4  ;;  %v1240_v49 = vadd.f32 %v4252_v18, %v983_v16  ;;  %v1495_v42 = vadd.f32 %v3726_v44, %v1238_v9  ;;  %v1244_v4 = vadd.f32 %v4254_v41, %v987_v45  ;;  %v4255_v16 = vld [vmem:[#allocation39_spill] sm:$0xff]  ;;  %v3938_v13 = vpop.f32.mrf.mxu0  ;;  %v4257_v9 = vld [vmem:[#allocation76_spill] sm:$0xff] }
 0x28f   : > { %v1745_v11 = vpop.f32.mrf.mxu1  ;;  %2067 = vmatmul.mubr.f32.gmra.mxu0 %v2597_v48  ;;  %v995_v63 = vadd.f32 %v4255_v16, %v3624_v14 }
 0x290   : > { %2610 = vtanh.f32 %v1742_v0  ;;  %v1746_v8 = vadd.f32 %v1745_v11, %v1489_v50  ;;  %v1497_v25 = vadd.f32 %v3736_v57, %v1240_v49  ;;  %v1501_v45 = vadd.f32 %v3746_v6, %v1244_v4  ;;  %v4258_v57 = vld [vmem:[#allocation78_spill] sm:$0xff]  ;;  %v3944_v18 = vpop.f32.mrf.mxu0 }
 0x291   : > { %v2599_v10 = vpop.eup %2598  ;;  %2612 = vtanh.f32 %v1740_v5  ;;  %v1747_v52 = vpop.f32.mrf.mxu1  ;;  %v4256_v5 = vld [vmem:[#allocation75_spill] sm:$0xff]  ;;  %v1250_v11 = vadd.f32 %v4257_v9, %v993_v60 }
 0x292   : > { %v2601_v22 = vpop.eup %2600  ;;  %v1748_v23 = vadd.f32 %v1747_v52, %v1491_v59  ;;  %2071 = vmatprep.mubr.f32.mxu0 %v2599_v10  ;;  %v1246_v48 = vadd.f32 %v4256_v5, %v989_v20  ;;  %v1252_v20 = vadd.f32 %v4258_v57, %v995_v63  ;;  %v3948_v40 = vpop.f32.mrf.mxu0 }
 0x293   : > { %v1751_v34 = vpop.f32.mrf.mxu1  ;;  %2072 = vmatmul.mubr.f32.gmra.mxu0 %v2601_v22  ;;  %v1507_v6 = vadd.f32 %v3766_v35, %v1250_v11  ;;  %v4259_v35 = vld [vmem:[#allocation79_spill] sm:$0xff] }
 0x294   : > { %2614 = vtanh.f32 %v1748_v23  ;;  %v1752_v50 = vadd.f32 %v1751_v34, %v1495_v42  ;;  %v1503_v14 = vadd.f32 %v3756_v19, %v1246_v48  ;;  %v1509_v23 = vadd.f32 %v3780_v62, %v1252_v20 }
 0x295   : > { %v2603_v0 = vpop.eup %2602  ;;  %2616 = vtanh.f32 %v1746_v8  ;;  %v1753_v53 = vpop.f32.mrf.mxu1  ;;  %v1513_v34 = vadd.f32 %v3796_v54, %v3634_v31  ;;  %v1515_v63 = vadd.f32 %v3808_v61, %v4259_v35  ;;  %v4260_v31 = vld [vmem:[#allocation80_spill] sm:$0xff] }
 0x296   : > { %v2605_v29 = vpop.eup %2604  ;;  %v1754_v44 = vadd.f32 %v1753_v53, %v1497_v25  ;;  %2076 = vmatprep.mubr.f32.mxu0 %v2603_v0  ;;  %v3954_v25 = vpop.f32.mrf.mxu0  ;;  %v1519_v53 = vadd.f32 %v3818_v51, %v3644_v32  ;;  %v1521_v54 = vadd.f32 %v3828_v55, %v4260_v31  ;;  %v4261_v32 = vld [vmem:[#allocation81_spill] sm:$0xff] }
 0x297   : > { %v1757_v12 = vpop.f32.mrf.mxu1  ;;  %2077 = vmatmul.mubr.f32.gmra.mxu0 %v2605_v29  ;;  %v1527_v51 = vadd.f32 %v3848_v7, %v4261_v32 }
 0x298   : > { %2618 = vtanh.f32 %v1754_v44  ;;  %v1758_v49 = vadd.f32 %v1757_v12, %v1501_v45  ;;  %v3960_v44 = vpop.f32.mrf.mxu0 }
 0x299   : > { %v2607_v59 = vpop.eup %2606  ;;  %2620 = vtanh.f32 %v1752_v50  ;;  %v1759_v10 = vpop.f32.mrf.mxu1 }
 0x29a   : > { %v2609_v8 = vpop.eup %2608  ;;  %v1760_v52 = vadd.f32 %v1759_v10, %v1503_v14  ;;  %2081 = vmatprep.mubr.f32.mxu0 %v2607_v59  ;;  %v1525_v14 = vadd.f32 %v3838_v21, %v3654_v33  ;;  %v3966_v20 = vpop.f32.mrf.mxu0  ;;  %v4262_v33 = vld [vmem:[#allocation82_spill] sm:$0xff] }
 0x29b   : > { %v1763_v22 = vpop.f32.mrf.mxu1  ;;  %2082 = vmatmul.mubr.f32.gmra.mxu0 %v2609_v8  ;;  %v1533_v21 = vadd.f32 %v3868_v58, %v4262_v33 }
 0x29c   : > { %2622 = vtanh.f32 %v1760_v52  ;;  %v1764_v60 = vadd.f32 %v1763_v22, %v1507_v6  ;;  %v1531_v52 = vadd.f32 %v3858_v36, %v3664_v27  ;;  %v3972_v22 = vpop.f32.mrf.mxu0  ;;  %v4263_v27 = vld [vmem:[#allocation83_spill] sm:$0xff] }
 0x29d   : > { %v2611_v19 = vpop.eup %2610  ;;  %2624 = vtanh.f32 %v1758_v49  ;;  %v1765_v42 = vpop.f32.mrf.mxu1  ;;  %v1539_v36 = vadd.f32 %v3888_v38, %v4263_v27 }
 0x29e   : > { %v2613_v41 = vpop.eup %2612  ;;  %v1766_v4 = vadd.f32 %v1765_v42, %v1509_v23  ;;  %2086 = vmatprep.mubr.f32.mxu0 %v2611_v19 }
 0x29f   : > { %v1769_v16 = vpop.f32.mrf.mxu1  ;;  %2087 = vmatmul.mubr.f32.gmra.mxu0 %v2613_v41  ;;  %v1537_v41 = vadd.f32 %v3878_v17, %v3674_v39  ;;  %v4264_v39 = vld [vmem:[#allocation84_spill] sm:$0xff] }
 0x2a0   : > { %2626 = vtanh.f32 %v1766_v4  ;;  %v1770_v5 = vadd.f32 %v1769_v16, %v1513_v34  ;;  %v3978_v34 = vpop.f32.mrf.mxu0  ;;  %v1545_v17 = vadd.f32 %v3908_v2, %v4264_v39 }
 0x2a1   : > { %v2615_v62 = vpop.eup %2614  ;;  %2628 = vtanh.f32 %v1764_v60  ;;  %v1771_v48 = vpop.f32.mrf.mxu1 }
 0x2a2   : > { %v2617_v0 = vpop.eup %2616  ;;  %v1772_v50 = vadd.f32 %v1771_v48, %v1515_v63  ;;  %2091 = vmatprep.mubr.f32.mxu0 %v2615_v62 }
 0x2a3   : > { %v1775_v29 = vpop.f32.mrf.mxu1  ;;  %2092 = vmatmul.mubr.f32.gmra.mxu0 %v2617_v0  ;;  %v3984_v0 = vpop.f32.mrf.mxu0 }
 0x2a4   : > { %2630 = vtanh.f32 %v1772_v50  ;;  %v1776_v45 = vadd.f32 %v1775_v29, %v1519_v53  ;;  %v1579_v39 = vadd.f32 %v3984_v0, %v3744_v26 }
 0x2a5   : > { %v2619_v61 = vpop.eup %2618  ;;  %2632 = vtanh.f32 %v1770_v5  ;;  %v1777_v9 = vpop.f32.mrf.mxu1  ;;  %v1543_v5 = vadd.f32 %v3898_v46, %v3684_v43  ;;  %v4265_v43 = vld [vmem:[#allocation85_spill] sm:$0xff] }
 0x2a6   : > { %v2621_v11 = vpop.eup %2620  ;;  %v1778_v12 = vadd.f32 %v1777_v9, %v1521_v54  ;;  %2096 = vmatprep.mubr.f32.mxu0 %v2619_v61  ;;  %v1549_v54 = vadd.f32 %v3918_v28, %v3694_v1  ;;  %v1551_v46 = vadd.f32 %v3928_v30, %v4265_v43  ;;  %v4266_v1 = vld [vmem:[#allocation86_spill] sm:$0xff] }
 0x2a7   : > { %v1781_v57 = vpop.f32.mrf.mxu1  ;;  %2097 = vmatmul.mubr.f32.gmra.mxu0 %v2621_v11  ;;  %v1557_v28 = vadd.f32 %v3944_v18, %v4266_v1 }
 0x2a8   : > { %2634 = vtanh.f32 %v1778_v12  ;;  %v1782_v59 = vadd.f32 %v1781_v57, %v1525_v14  ;;  %v1555_v57 = vadd.f32 %v3938_v13, %v3704_v47  ;;  %v4267_v47 = vld [vmem:[#allocation87_spill] sm:$0xff] }
 0x2a9   : > { %v2623_v55 = vpop.eup %2622  ;;  %2636 = vtanh.f32 %v1776_v45  ;;  %v1783_v49 = vpop.f32.mrf.mxu1  ;;  %v1563_v13 = vadd.f32 %v3954_v25, %v4267_v47 }
 0x2aa   : > { %v2625_v10 = vpop.eup %2624  ;;  %v1784_v8 = vadd.f32 %v1783_v49, %v1527_v51  ;;  %2101 = vmatprep.mubr.f32.mxu0 %v2623_v55  ;;  %v1580_v45 = vpop.f32.mrf.mxu0 }
 0x2ab   : > { %v1787_v6 = vpop.f32.mrf.mxu1  ;;  %2102 = vmatmul.mubr.f32.gmra.mxu0 %v2625_v10 }
 0x2ac   : > { %2638 = vtanh.f32 %v1784_v8  ;;  %v1788_v23 = vadd.f32 %v1787_v6, %v1531_v52  ;;  %v1584_v30 = vpop.f32.mrf.mxu0  ;;  %v1561_v8 = vadd.f32 %v3948_v40, %v3714_v56  ;;  %v4268_v56 = vld [vmem:[#allocation88_spill] sm:$0xff] }
 0x2ad   : > { %v2627_v7 = vpop.eup %2626  ;;  %2640 = vtanh.f32 %v1782_v59  ;;  %v1789_v19 = vpop.f32.mrf.mxu1  ;;  %v1569_v40 = vadd.f32 %v3966_v20, %v4268_v56 }
 0x2ae   : > { %v2629_v60 = vpop.eup %2628  ;;  %v1790_v42 = vadd.f32 %v1789_v19, %v1533_v21  ;;  %2106 = vmatprep.mubr.f32.mxu0 %v2627_v7  ;;  %v1586_v18 = vpop.f32.mrf.mxu0  ;;  %v1567_v19 = vadd.f32 %v3960_v44, %v3724_v3  ;;  %v4269_v3 = vld [vmem:[#allocation89_spill] sm:$0xff] }
 0x2af   : > { %v1793_v4 = vpop.f32.mrf.mxu1  ;;  %2107 = vmatmul.mubr.f32.gmra.mxu0 %v2629_v60  ;;  %v1575_v44 = vadd.f32 %v3978_v34, %v4269_v3  ;;  %v1587_v43 = vadd.f32 %v1586_v18, %v3760_v24 }
 0x2b0   : > { %2642 = vtanh.f32 %v1790_v42  ;;  %v1794_v16 = vadd.f32 %v1793_v4, %v1537_v41  ;;  %v1590_v25 = vpop.f32.mrf.mxu0 }
 0x2b1   : > { %v2631_v58 = vpop.eup %2630  ;;  %2644 = vtanh.f32 %v1788_v23  ;;  %v1795_v35 = vpop.f32.mrf.mxu1 }
 0x2b2   : > { %v2633_v63 = vpop.eup %2632  ;;  %v1796_v62 = vadd.f32 %v1795_v35, %v1539_v36  ;;  %2111 = vmatprep.mubr.f32.mxu0 %v2631_v58  ;;  %v1573_v58 = vadd.f32 %v3972_v22, %v3734_v15  ;;  %v1592_v20 = vpop.f32.mrf.mxu0  ;;  %v4270_v15 = vld [vmem:[#allocation90_spill] sm:$0xff] }
 0x2b3   : > { %v1799_v48 = vpop.f32.mrf.mxu1  ;;  %2112 = vmatmul.mubr.f32.gmra.mxu0 %v2633_v63  ;;  %v1581_v22 = vadd.f32 %v1580_v45, %v4270_v15 }
 0x2b4   : > { %2646 = vtanh.f32 %v1796_v62  ;;  %v1800_v50 = vadd.f32 %v1799_v48, %v1543_v5 }
 0x2b5   : > { %v2635_v38 = vpop.eup %2634  ;;  %2648 = vtanh.f32 %v1794_v16  ;;  %v1801_v53 = vpop.f32.mrf.mxu1 }
 0x2b6   : > { %v2637_v29 = vpop.eup %2636  ;;  %v1802_v31 = vadd.f32 %v1801_v53, %v1545_v17  ;;  %2116 = vmatprep.mubr.f32.mxu0 %v2635_v38 }
 0x2b7   : > { %v1805_v61 = vpop.f32.mrf.mxu1  ;;  %2117 = vmatmul.mubr.f32.gmra.mxu0 %v2637_v29 }
 0x2b8   : > { %2650 = vtanh.f32 %v1802_v31  ;;  %v1806_v9 = vadd.f32 %v1805_v61, %v1549_v54  ;;  %v1585_v54 = vadd.f32 %v1584_v30, %v3754_v37 }
 0x2b9   : > { %v2639_v2 = vpop.eup %2638  ;;  %2652 = vtanh.f32 %v1800_v50  ;;  %v1807_v11 = vpop.f32.mrf.mxu1 }
 0x2ba   : > { %v2641_v12 = vpop.eup %2640  ;;  %v1808_v14 = vadd.f32 %v1807_v11, %v1551_v46  ;;  %2121 = vmatprep.mubr.f32.mxu0 %v2639_v2  ;;  %v1596_v50 = vpop.f32.mrf.mxu0  ;;  %v4271_v11 = vld [vmem:[#allocation91_spill] sm:$0xff] }
 0x2bb   : > { %v1811_v32 = vpop.f32.mrf.mxu1  ;;  %2122 = vmatmul.mubr.f32.gmra.mxu0 %v2641_v12  ;;  %v1591_v12 = vadd.f32 %v1590_v25, %v4271_v11 }
 0x2bc   : > { %2654 = vtanh.f32 %v1808_v14  ;;  %v1812_v55 = vadd.f32 %v1811_v32, %v1555_v57  ;;  %v1598_v0 = vpop.f32.mrf.mxu0  ;;  %v4272_v57 = vld [vmem:[#allocation92_spill] sm:$0xff] }
 0x2bd   : > { %v2643_v51 = vpop.eup %2642  ;;  %2656 = vtanh.f32 %v1806_v9  ;;  %v1813_v59 = vpop.f32.mrf.mxu1  ;;  %v1593_v32 = vadd.f32 %v1592_v20, %v4272_v57  ;;  %v4017_v20 = vld [vmem:[#allocation10] ss:$0 sm:$0xff] }
 0x2be   : > { %v2645_v49 = vpop.eup %2644  ;;  %v1814_v10 = vadd.f32 %v1813_v59, %v1557_v28  ;;  %2126 = vmatprep.mubr.f32.mxu0 %v2643_v51  ;;  %v1602_v1 = vpop.f32.mrf.mxu0 }
 0x2bf   : > { %v1817_v52 = vpop.f32.mrf.mxu1  ;;  %2127 = vmatmul.mubr.f32.gmra.mxu0 %v2645_v49 }
 0x2c0   : > { %2658 = vtanh.f32 %v1814_v10  ;;  %v1818_v33 = vadd.f32 %v1817_v52, %v1561_v8  ;;  %v4274_v10 = vld [vmem:[#allocation94_spill] sm:$0xff]  ;;  %v1604_v47 = vpop.f32.mrf.mxu0 }
 0x2c1   : > { %v2647_v6 = vpop.eup %2646  ;;  %2660 = vtanh.f32 %v1812_v55  ;;  %v1819_v21 = vpop.f32.mrf.mxu1  ;;  %v4273_v55 = vld [vmem:[#allocation93_spill] sm:$0xff]  ;;  %v1599_v8 = vadd.f32 %v1598_v0, %v4274_v10 }
 0x2c2   : > { %v2649_v7 = vpop.eup %2648  ;;  %v1820_v23 = vadd.f32 %v1819_v21, %v1563_v13  ;;  %2131 = vmatprep.mubr.f32.mxu0 %v2647_v6  ;;  %v1597_v59 = vadd.f32 %v1596_v50, %v4273_v55  ;;  %v4275_v21 = vld [vmem:[#allocation95_spill] sm:$0xff] }
 0x2c3   : > { %v1823_v60 = vpop.f32.mrf.mxu1  ;;  %2132 = vmatmul.mubr.f32.gmra.mxu0 %v2649_v7  ;;  %v1603_v7 = vadd.f32 %v1602_v1, %v4275_v21 }
 0x2c4   : > { %2662 = vtanh.f32 %v1820_v23  ;;  %v1824_v41 = vadd.f32 %v1823_v60, %v1567_v19  ;;  %v4276_v19 = vld [vmem:[#allocation96_spill] sm:$0xff] }
 0x2c5   : > { %v2651_v42 = vpop.eup %2650  ;;  %2664 = vtanh.f32 %v1818_v33  ;;  %v1825_v4 = vpop.f32.mrf.mxu1  ;;  %v1605_v60 = vadd.f32 %v1604_v47, %v4276_v19 }
 0x2c6   : > { %v2653_v27 = vpop.eup %2652  ;;  %v1826_v36 = vadd.f32 %v1825_v4, %v1569_v40  ;;  %2136 = vmatprep.mubr.f32.mxu0 %v2651_v42 }
 0x2c7   : > { %v1829_v16 = vpop.f32.mrf.mxu1  ;;  %2137 = vmatmul.mubr.f32.gmra.mxu0 %v2653_v27 }
 0x2c8   : > { %2666 = vtanh.f32 %v1826_v36  ;;  %v1830_v63 = vadd.f32 %v1829_v16, %v1573_v58 }
 0x2c9   : > { %v2655_v35 = vpop.eup %2654  ;;  %2668 = vtanh.f32 %v1824_v41  ;;  %v1831_v62 = vpop.f32.mrf.mxu1 }
 0x2ca   : > { %v2657_v5 = vpop.eup %2656  ;;  %v1832_v48 = vadd.f32 %v1831_v62, %v1575_v44  ;;  %2141 = vmatprep.mubr.f32.mxu0 %v2655_v35 }
 0x2cb   : > { %v1835_v17 = vpop.f32.mrf.mxu1  ;;  %2142 = vmatmul.mubr.f32.gmra.mxu0 %v2657_v5 }
 0x2cc   : > { %2670 = vtanh.f32 %v1832_v48  ;;  %v1836_v34 = vadd.f32 %v1835_v17, %v1579_v39 }
 0x2cd   : > { %v2659_v38 = vpop.eup %2658  ;;  %2672 = vtanh.f32 %v1830_v63  ;;  %v1837_v53 = vpop.f32.mrf.mxu1 }
 0x2ce   : > { %v2661_v29 = vpop.eup %2660  ;;  %v1838_v31 = vadd.f32 %v1837_v53, %v1581_v22  ;;  %2146 = vmatprep.mubr.f32.mxu0 %v2659_v38 }
 0x2cf   : > { %v1841_v61 = vpop.f32.mrf.mxu1  ;;  %2147 = vmatmul.mubr.f32.gmra.mxu0 %v2661_v29 }
 0x2d0   : > { %2674 = vtanh.f32 %v1838_v31  ;;  %v1842_v46 = vadd.f32 %v1841_v61, %v1585_v54 }
 0x2d1   : > { %v2663_v26 = vpop.eup %2662  ;;  %2676 = vtanh.f32 %v1836_v34  ;;  %v1843_v2 = vpop.f32.mrf.mxu1 }
 0x2d2   : > { %v2665_v45 = vpop.eup %2664  ;;  %v1844_v9 = vadd.f32 %v1843_v2, %v1587_v43  ;;  %2151 = vmatprep.mubr.f32.mxu0 %v2663_v26 }
 0x2d3   : > { %v1847_v14 = vpop.f32.mrf.mxu1  ;;  %2152 = vmatmul.mubr.f32.gmra.mxu0 %v2665_v45 }
 0x2d4   : > { %2678 = vtanh.f32 %v1844_v9  ;;  %v1848_v24 = vadd.f32 %v1847_v14, %v1591_v12 }
 0x2d5   : > { %v2667_v37 = vpop.eup %2666  ;;  %2680 = vtanh.f32 %v1842_v46  ;;  %v1849_v28 = vpop.f32.mrf.mxu1 }
 0x2d6   : > { %v2669_v51 = vpop.eup %2668  ;;  %v1850_v30 = vadd.f32 %v1849_v28, %v1593_v32  ;;  %2156 = vmatprep.mubr.f32.mxu0 %v2667_v37 }
 0x2d7   : > { %v1853_v49 = vpop.f32.mrf.mxu1  ;;  %2157 = vmatmul.mubr.f32.gmra.mxu0 %v2669_v51 }
 0x2d8   : > { %2682 = vtanh.f32 %v1850_v30  ;;  %v1854_v13 = vadd.f32 %v1853_v49, %v1597_v59 }
 0x2d9   : > { %v2671_v52 = vpop.eup %2670  ;;  %2684 = vtanh.f32 %v1848_v24  ;;  %v1855_v6 = vpop.f32.mrf.mxu1 }
 0x2da   : > { %v2673_v18 = vpop.eup %2672  ;;  %v1856_v33 = vadd.f32 %v1855_v6, %v1599_v8  ;;  %2161 = vmatprep.mubr.f32.mxu0 %v2671_v52 }
 0x2db   : > { %v1859_v23 = vpop.f32.mrf.mxu1  ;;  %2162 = vmatmul.mubr.f32.gmra.mxu0 %v2673_v18 }
 0x2dc   : > { %2686 = vtanh.f32 %v1856_v33  ;;  %v1860_v40 = vadd.f32 %v1859_v23, %v1603_v7 }
 0x2dd   : > { %v2675_v56 = vpop.eup %2674  ;;  %2688 = vtanh.f32 %v1854_v13  ;;  %v1861_v42 = vpop.f32.mrf.mxu1 }
 0x2de   : > { %v2677_v25 = vpop.eup %2676  ;;  %v1862_v41 = vadd.f32 %v1861_v42, %v1605_v60  ;;  %2166 = vmatprep.mubr.f32.mxu0 %v2675_v56 }
 0x2df   : > { %2167 = vmatmul.mubr.f32.gmra.mxu0 %v2677_v25 }
 0x2e0   : > { %2690 = vtanh.f32 %v1862_v41 }
 0x2e1   : > { %v2679_v4 = vpop.eup %2678  ;;  %2692 = vtanh.f32 %v1860_v40 }
 0x2e2   : > { %v2681_v27 = vpop.eup %2680  ;;  %2171 = vmatprep.mubr.f32.mxu0 %v2679_v4 }
 0x2e3   : > { %2172 = vmatmul.mubr.f32.gmra.mxu0 %v2681_v27 }
 0x2e5   : > { %v2683_v36 = vpop.eup %2682 }
 0x2e6   : > { %v2685_v58 = vpop.eup %2684  ;;  %2176 = vmatprep.mubr.f32.mxu0 %v2683_v36 }
 0x2e7   : > { %2177 = vmatmul.mubr.f32.gmra.mxu0 %v2685_v58 }
 0x2e9   : > { %v2687_v16 = vpop.eup %2686 }
 0x2ea   : > { %v2689_v3 = vpop.eup %2688  ;;  %2181 = vmatprep.mubr.f32.mxu0 %v2687_v16 }
 0x2eb   : > { %2182 = vmatmul.mubr.f32.gmra.mxu0 %v2689_v3 }
 0x2ed   : > { %v2691_v44 = vpop.eup %2690 }
 0x2ee   : > { %v2693_v35 = vpop.eup %2692  ;;  %2186 = vmatprep.mubr.f32.mxu0 %v2691_v44 }
 0x2ef   : > { %2187 = vmatmul.mubr.f32.gmra.mxu0 %v2693_v35 }
 0x333   : > { %v2033_v63 = vpop.f32.mrf.mxu0 }
 0x334   : > { %v2034_v62 = vadd.f32 %v4017_v20, %v2033_v63 }
 0x335   : > { %v2035_v5 = vpop.f32.mrf.mxu0 }
 0x336   : > { %2192 = vxpose.xlu0.b32.start [1/16] (narrow) %v2034_v62, 8 }
 0x337   : > { %v2038_v48 = vpop.f32.mrf.mxu0 }
 0x338   : > { %v2039_v39 = vadd.f32 %v4017_v20, %v2038_v48 }
 0x339   : > { %v2040_v17 = vpop.f32.mrf.mxu0 }
 0x33a   : > { %2193 = vxpose.xlu0.b32.cont [2/16] (narrow) %v2039_v39, 8 }
 0x33b   : > { %v2043_v15 = vpop.f32.mrf.mxu0 }
 0x33c   : > { %v2044_v22 = vadd.f32 %v4017_v20, %v2043_v15 }
 0x33d   : > { %v2045_v38 = vpop.f32.mrf.mxu0 }
 0x33e   : > { %2194 = vxpose.xlu0.b32.cont [3/16] (narrow) %v2044_v22, 8 }
 0x33f   : > { %v2048_v50 = vpop.f32.mrf.mxu0 }
 0x340   : > { %v2049_v34 = vadd.f32 %v4017_v20, %v2048_v50 }
 0x341   : > { %v2050_v53 = vpop.f32.mrf.mxu0 }
 0x342   : > { %2195 = vxpose.xlu0.b32.cont [4/16] (narrow) %v2049_v34, 8 }
 0x343   : > { %v2053_v29 = vpop.f32.mrf.mxu0 }
 0x344   : > { %v2054_v31 = vadd.f32 %v4017_v20, %v2053_v29 }
 0x345   : > { %v2055_v54 = vpop.f32.mrf.mxu0 }
 0x346   : > { %2196 = vxpose.xlu0.b32.cont [5/16] (narrow) %v2054_v31, 8 }
 0x347   : > { %v2058_v61 = vpop.f32.mrf.mxu0 }
 0x348   : > { %v2059_v43 = vadd.f32 %v4017_v20, %v2058_v61 }
 0x349   : > { %v2060_v26 = vpop.f32.mrf.mxu0 }
 0x34a   : > { %2197 = vxpose.xlu0.b32.cont [6/16] (narrow) %v2059_v43, 8 }
 0x34b   : > { %v2063_v0 = vpop.f32.mrf.mxu0 }
 0x34c   : > { %v2064_v46 = vadd.f32 %v4017_v20, %v2063_v0 }
 0x34d   : > { %v2065_v2 = vpop.f32.mrf.mxu0 }
 0x34e   : > { %2198 = vxpose.xlu0.b32.cont [7/16] (narrow) %v2064_v46, 8 }
 0x34f   : > { %v2068_v45 = vpop.f32.mrf.mxu0 }
 0x350   : > { %v2069_v9 = vadd.f32 %v4017_v20, %v2068_v45 }
 0x351   : > { %v2070_v11 = vpop.f32.mrf.mxu0 }
 0x352   : > { %2199 = vxpose.xlu0.b32.cont [8/16] (narrow) %v2069_v9, 8 }
 0x353   : > { %v2073_v12 = vpop.f32.mrf.mxu0 }
 0x354   : > { %v2074_v14 = vadd.f32 %v4017_v20, %v2073_v12 }
 0x355   : > { %v2075_v57 = vpop.f32.mrf.mxu0 }
 0x356   : > { %2200 = vxpose.xlu0.b32.cont [9/16] (narrow) %v2074_v14, 8 }
 0x357   : > { %v2078_v32 = vpop.f32.mrf.mxu0 }
 0x358   : > { %v2079_v37 = vadd.f32 %v4017_v20, %v2078_v32 }
 0x359   : > { %v2080_v1 = vpop.f32.mrf.mxu0 }
 0x35a   : > { %2201 = vxpose.xlu0.b32.cont [10/16] (narrow) %v2079_v37, 8 }
 0x35b   : > { %v2083_v24 = vpop.f32.mrf.mxu0 }
 0x35c   : > { %v2084_v28 = vadd.f32 %v4017_v20, %v2083_v24 }
 0x35d   : > { %v2085_v51 = vpop.f32.mrf.mxu0 }
 0x35e   : > { %2202 = vxpose.xlu0.b32.cont [11/16] (narrow) %v2084_v28, 8 }
 0x35f   : > { %v2088_v30 = vpop.f32.mrf.mxu0 }
 0x360   : > { %v2089_v55 = vadd.f32 %v4017_v20, %v2088_v30 }
 0x361   : > { %v2090_v59 = vpop.f32.mrf.mxu0 }
 0x362   : > { %2203 = vxpose.xlu0.b32.cont [12/16] (narrow) %v2089_v55, 8 }
 0x363   : > { %v2093_v49 = vpop.f32.mrf.mxu0 }
 0x364   : > { %v2094_v10 = vadd.f32 %v4017_v20, %v2093_v49 }
 0x365   : > { %v2095_v8 = vpop.f32.mrf.mxu0 }
 0x366   : > { %2204 = vxpose.xlu0.b32.cont [13/16] (narrow) %v2094_v10, 8 }
 0x367   : > { %v2098_v52 = vpop.f32.mrf.mxu0 }
 0x368   : > { %v2099_v47 = vadd.f32 %v4017_v20, %v2098_v52 }
 0x369   : > { %v2100_v13 = vpop.f32.mrf.mxu0 }
 0x36a   : > { %2205 = vxpose.xlu0.b32.cont [14/16] (narrow) %v2099_v47, 8 }
 0x36b   : > { %v2103_v6 = vpop.f32.mrf.mxu0 }
 0x36c   : > { %v2104_v18 = vadd.f32 %v4017_v20, %v2103_v6 }
 0x36d   : > { %v2105_v33 = vpop.f32.mrf.mxu0 }
 0x36e   : > { %2206 = vxpose.xlu0.b32.cont [15/16] (narrow) %v2104_v18, 8 }
 0x36f   : > { %v2108_v21 = vpop.f32.mrf.mxu0 }
 0x370   : > { %v2109_v7 = vadd.f32 %v4017_v20, %v2108_v21 }
 0x371   : > { %v2110_v23 = vpop.f32.mrf.mxu0 }
 0x372   : > { %2207 = vxpose.xlu0.b32.end [16/16] (narrow) %v2109_v7, 8 }
 0x373   : > { %v2113_v19 = vpop.f32.mrf.mxu0 }
 0x374   : > { %v2114_v60 = vadd.f32 %v4017_v20, %v2113_v19 }
 0x375   : > { %v2115_v56 = vpop.f32.mrf.mxu0 }
 0x376   : > { %2224 = vxpose.xlu1.b32.start [1/16] (narrow) %v2114_v60, 8 }
 0x377   : > { %v2118_v40 = vpop.f32.mrf.mxu0 }
 0x378   : > { %v2119_v42 = vadd.f32 %v4017_v20, %v2118_v40 }
 0x379   : > { %v2120_v25 = vpop.f32.mrf.mxu0 }
 0x37a   : > { %2225 = vxpose.xlu1.b32.cont [2/16] (narrow) %v2119_v42, 8 }
 0x37b   : > { %v2123_v41 = vpop.f32.mrf.mxu0 }
 0x37c   : > { %v2124_v4 = vadd.f32 %v4017_v20, %v2123_v41 }
 0x37d   : > { %v2125_v27 = vpop.f32.mrf.mxu0 }
 0x37e   : > { %2226 = vxpose.xlu1.b32.cont [3/16] (narrow) %v2124_v4, 8 }
 0x37f   : > { %v2128_v36 = vpop.f32.mrf.mxu0 }
 0x380   : > { %v2129_v58 = vadd.f32 %v4017_v20, %v2128_v36 }
 0x381   : > { %v2130_v16 = vpop.f32.mrf.mxu0 }
 0x382   : > { %2227 = vxpose.xlu1.b32.cont [4/16] (narrow) %v2129_v58, 8 }
 0x383   : > { %v2133_v3 = vpop.f32.mrf.mxu0 }
 0x384   : > { %v2134_v44 = vadd.f32 %v4017_v20, %v2133_v3 }
 0x385   : > { %v2135_v35 = vpop.f32.mrf.mxu0 }
 0x386   : > { %2228 = vxpose.xlu1.b32.cont [5/16] (narrow) %v2134_v44, 8 }
 0x387   : > { %v2138_v63 = vpop.f32.mrf.mxu0 }
 0x388   : > { %v2139_v62 = vadd.f32 %v4017_v20, %v2138_v63 }
 0x389   : > { %v2140_v5 = vpop.f32.mrf.mxu0 }
 0x38a   : > { %2229 = vxpose.xlu1.b32.cont [6/16] (narrow) %v2139_v62, 8 }
 0x38b   : > { %v2143_v48 = vpop.f32.mrf.mxu0 }
 0x38c   : > { %v2144_v39 = vadd.f32 %v4017_v20, %v2143_v48 }
 0x38d   : > { %v2145_v17 = vpop.f32.mrf.mxu0 }
 0x38e   : > { %2230 = vxpose.xlu1.b32.cont [7/16] (narrow) %v2144_v39, 8 }
 0x38f   : > { %v2148_v15 = vpop.f32.mrf.mxu0 }
 0x390   : > { %v2149_v22 = vadd.f32 %v4017_v20, %v2148_v15 }
 0x391   : > { %v2150_v38 = vpop.f32.mrf.mxu0 }
 0x392   : > { %2231 = vxpose.xlu1.b32.cont [8/16] (narrow) %v2149_v22, 8 }
 0x393   : > { %v2153_v50 = vpop.f32.mrf.mxu0 }
 0x394   : > { %v2154_v34 = vadd.f32 %v4017_v20, %v2153_v50 }
 0x395   : > { %v2155_v53 = vpop.f32.mrf.mxu0 }
 0x396   : > { %2232 = vxpose.xlu1.b32.cont [9/16] (narrow) %v2154_v34, 8 }
 0x397   : > { %v2158_v29 = vpop.f32.mrf.mxu0 }
 0x398   : > { %v2159_v31 = vadd.f32 %v4017_v20, %v2158_v29 }
 0x399   : > { %v2160_v54 = vpop.f32.mrf.mxu0 }
 0x39a   : > { %2233 = vxpose.xlu1.b32.cont [10/16] (narrow) %v2159_v31, 8 }
 0x39b   : > { %v2163_v61 = vpop.f32.mrf.mxu0 }
 0x39c   : > { %v2164_v43 = vadd.f32 %v4017_v20, %v2163_v61 }
 0x39d   : > { %v2165_v26 = vpop.f32.mrf.mxu0 }
 0x39e   : > { %2234 = vxpose.xlu1.b32.cont [11/16] (narrow) %v2164_v43, 8 }
 0x39f   : > { %v2168_v0 = vpop.f32.mrf.mxu0 }
 0x3a0   : > { %v2169_v46 = vadd.f32 %v4017_v20, %v2168_v0 }
 0x3a1   : > { %v2170_v2 = vpop.f32.mrf.mxu0 }
 0x3a2   : > { %2235 = vxpose.xlu1.b32.cont [12/16] (narrow) %v2169_v46, 8 }
 0x3a3   : > { %v2173_v45 = vpop.f32.mrf.mxu0 }
 0x3a4   : > { %v2174_v9 = vadd.f32 %v4017_v20, %v2173_v45 }
 0x3a5   : > { %v2175_v11 = vpop.f32.mrf.mxu0 }
 0x3a6   : > { %2236 = vxpose.xlu1.b32.cont [13/16] (narrow) %v2174_v9, 8 }
 0x3a7   : > { %v2178_v12 = vpop.f32.mrf.mxu0 }
 0x3a8   : > { %v2179_v14 = vadd.f32 %v4017_v20, %v2178_v12 }
 0x3a9   : > { %v2180_v57 = vpop.f32.mrf.mxu0 }
 0x3aa   : > { %2237 = vxpose.xlu1.b32.cont [14/16] (narrow) %v2179_v14, 8 }
 0x3ab   : > { %v2183_v32 = vpop.f32.mrf.mxu0 }
 0x3ac   : > { %v2184_v37 = vadd.f32 %v4017_v20, %v2183_v32 }
 0x3ad   : > { %v2185_v1 = vpop.f32.mrf.mxu0 }
 0x3ae   : > { %2238 = vxpose.xlu1.b32.cont [15/16] (narrow) %v2184_v37, 8 }
 0x3af   : > { %v2188_v24 = vpop.f32.mrf.mxu0 }
 0x3b0   : > { %v2189_v28 = vadd.f32 %v4017_v20, %v2188_v24 }
 0x3b1   : > { %v2190_v51 = vpop.f32.mrf.mxu0 }
 0x3b2   : > { %2239 = vxpose.xlu1.b32.end [16/16] (narrow) %v2189_v28, 8  ;;  %v2208_v30 = vpop.trf.xlu0 }
 0x3b3   : > { %2256 = vst [vmem:[%s304_s7] sm:$0xff] %v2208_v30 }
 0x3f2   : > { %v2240_v55 = vpop.trf.xlu1 }
 0x3f3   : > { %2257 = vst [vmem:[%s304_s7 + $0x8] sm:$0xff] %v2240_v55 }
 0x3f4   : > { %2837 = shalt.err (!%p2834_p2)
}
 0x3f5   : > { %s2838_s11 = scalar_lea.hbm %s2271_s15, 256  ;;  %s2842_s14 = scalar_lea.hbm %s4097_s5, 768 }
 0x3f6   : > { %p2839_p1 = scmp.ne.s32.totalorder %s2271_s15, %s2838_s11  ;;  %p2843_p13 = scmp.lt.s32.totalorder %s2271_s15, %s4097_s5 }
 0x3f7   : > { %p2844_p7 = scmp.lt.s32.totalorder %s2842_s14, %s2838_s11 }
 0x3f8   : > { %p2840_p3 = pnand %p2839_p1, %p4277_p4 }
 0x3f9   : > { %p2845_p9 = por %p2844_p7, %p2843_p13 }
 0x3fa   : > { %p2841_p5 = pneg %p2840_p3 }
 0x3fc   : > { %p2846_p12 = pnand %p2845_p9, %p2841_p5 }
 0x3fe   : > { %2849 = shalt.err (!%p2846_p12)
}
 0x3ff   : > { %2495 = dma.vmem_to_hbm [thread:$0]  (%p4277_p4), %s4053_s16, 256, %s2271_s15, %s2259_s28  }
 0x400 PF: > { %p2522_p6 = scmp.ge.s32.totalorder %s2896_s21, 2  ;;  %s2285_s7 = sand.u32 1, %s2884_s18  }
 0x401   : > { %p4278_p8 = scmp.ne.s32.totalorder %s4106_s6, 0  ;;  %s2286_s17 = scalar_lea.sflag [#allocation4], %s2285_s7 }
 0x403   : > { %p2511_p11 = pnand %p2522_p6, %p4278_p8 }
 0x405   : > { %p2512_p10 = pneg %p2511_p11 }
 0x407   : > { %2879 = dma.done.wait (%p2512_p10), %s2286_s17, 256  }
 0x408   : > { %2881 = vsyncadd (%p2512_p10), %s2286_s17, 4294967040  ;;  %p20_p0 = scmp.ge.s32.totalorder %s2966_s24, 5   ;;  %s4279_s18 = smov %s2888_s19 }
 0x409   : > { %s4280_s19 = smov %s2892_s20  ;;  %s4281_s20 = smov %s2978_s27 }
 0x40a   : > { %s4282_s21 = smov %s2966_s24  ;;  %22 = sbr.rel (!%p20_p0) target bundleno = 7 (0x7), region = 101 }
 0x40f   :  { %2291 = vsyncpa [#allocation3], 1 }
 0x410   :  { %2293 = vsyncpa [#allocation3 + $0x1], 1 }
 0x411   :  { %2294 = vsyncpa [#allocation6], 1 }
 0x412   :  { %2295 = vsyncpa [#allocation9], 1 }
 0x413   :  { %2296 = vsyncpa [#allocation4], 1 }
 0x414   :  { %2298 = vsyncpa [#allocation4 + $0x1], 1 }

</bundles_post_ra>
